<compile_context>
chip_gen: v7x
topology: tpu7x:2x2x1
jax: 0.10.0
libtpu: 0.0.40
codegen_flags: <defaults>
</compile_context>

<pallas_src>
import functools

import jax
import jax.numpy as jnp
import numpy as np
from jax import lax
from jax.experimental import pallas as pl
from jax.experimental.pallas import tpu as pltpu


# ------------------------------ the single fused kernel ------------------------------

def _refnet_kernel(x_ref, wpack_ref, bpack_ref, dc1w_ref, dc2w_ref,
                   scat1_ref, scat2_ref, sel1_ref, sel2_ref, out_ref,
                   *, H, W, C, wlay, blay):
    bf16 = jnp.bfloat16
    f32 = jnp.float32

    def Wm(name):                                    # bf16 weight-slab slice (static)
        r, nr, nc = wlay[name]
        return wpack_ref[r:r + nr, 0:nc]

    def Bv(name):                                    # f32 bias-slab slice (static)
        c0, n = blay[name]
        return bpack_ref[:, c0:c0 + n]

    def mm(a, b):                                    # bf16 MXU matmul, f32 accumulation
        return jnp.dot(a.astype(bf16), b, preferred_element_type=f32)

    # RefNet_basic core: the SAME conv (w, b) applied twice, as in PyTorch.
    def core(x, w, b):
        xc = mm(x, w) + b
        t = jnp.maximum(xc, 0.0)
        t = jnp.maximum(mm(t, w) + b, 0.0)
        return xc + t

    # att_i / down_i share the same input: both cores batched in one pass
    # (w1 = [w_att | w_down], w2 = blockdiag(w_att, w_down), b = [b_att | b_down]).
    def dual_core(x, w1, w2, b):
        xc = mm(x, w1) + b
        t = jnp.maximum(xc, 0.0)
        t = jnp.maximum(mm(t, w2) + b, 0.0)
        return xc + t

    # SE: per-slice mean over pixels, 2 FC layers, sigmoid gate, 1x1 conv.
    def se(y, w1, w2, wc, bc):
        pooled = jnp.mean(y, axis=0, keepdims=True)                      # (1, C) f32
        hdn = jnp.maximum(mm(pooled, w1), 0.0)
        gate = pl.reciprocal(1.0 + jnp.exp(-mm(hdn, w2)), approx=True)   # sigmoid
        return mm(y * gate, wc) + bc

    # MaxPool2d(2,2): one precomputed 0/1 gather matmul + 3 elementwise maxes.
    def maxpool(y, sel_ref, n_pool):
        g = jnp.dot(sel_ref[...], y.astype(bf16), preferred_element_type=f32)
        return jnp.maximum(jnp.maximum(g[:n_pool], g[n_pool:2 * n_pool]),
                           jnp.maximum(g[2 * n_pool:3 * n_pool], g[3 * n_pool:]))

    # ConvTranspose2d(k=4, s=2, p=1), parity-decomposed.
    def shift_flat(t, k):
        # result[p] = t[p + k] on the flat row-major pixel axis, zero padded (k static).
        z = jnp.zeros((abs(k), t.shape[1]), t.dtype)
        if k > 0:
            return jnp.concatenate([t[k:, :], z], axis=0)
        return jnp.concatenate([z, t[:t.shape[0] + k, :]], axis=0)

    def deconv4x4_s2(xin, wall_ref, scat_ref, b, hi, wi, cout):
        n_in = hi * wi
        taps = mm(xin, wall_ref[...])                 # all 16 taps in one matmul

        def tap(kh, kw):
            o = (kh * 4 + kw) * cout
            return taps[:, o:o + cout]

        col = lax.broadcasted_iota(jnp.int32, (n_in, 1), 0) % wi
        colmask = {-1: (col != 0).astype(f32), 1: (col != wi - 1).astype(f32)}

        def col_shift(t, d):                          # +-1 pixel within an image row
            return shift_flat(t, d) * colmask[d]

        def row_shift(t, d):                          # +-1 image row (zero pad = boundary)
            return shift_flat(t, d * wi)

        # Parity classes (rh, rw): output pixels (2*ih + rh, 2*iw + rw).
        #   rh==0 -> taps kh in {1 (shift 0), 3 (shift -1)}
        #   rh==1 -> taps kh in {2 (shift 0), 0 (shift +1)}   (same for columns)
        parts = []
        for rh in (0, 1):
            kh0, kh1, dh = (1, 3, -1) if rh == 0 else (2, 0, 1)
            for rw in (0, 1):
                kw0, kw1, dw = (1, 3, -1) if rw == 0 else (2, 0, 1)
                b0 = tap(kh0, kw0) + col_shift(tap(kh0, kw1), dw)
                b1 = tap(kh1, kw0) + col_shift(tap(kh1, kw1), dw)
                parts.append(b0 + row_shift(b1, dh))
        acc = jnp.concatenate(parts, axis=0)          # (4*n_in, cout), class-major
        # one 0/1 permutation matmul interleaves the 4 parity sub-images row-major
        return jnp.dot(scat_ref[...], acc.astype(bf16),
                       preferred_element_type=f32) + b

    # =============================== forward ===============================
    x = x_ref[0]                                                         # (H*W, C) f32

    # stage 1: att_1 + down_1 cores batched
    y1 = dual_core(x, Wm('core1_w1'), Wm('core1_w2'), Bv('core1_b'))     # (HW, 2C)
    res1 = se(y1[:, :C], Wm('se1_w1'), Wm('se1_w2'),
              Wm('se1_wc'), Bv('se1_bc'))                                # (HW, 32)
    p1 = maxpool(y1[:, C:], sel1_ref, (H // 2) * (W // 2))               # (HW/4, C)
    down1 = mm(p1, Wm('down1_c2_w')) + Bv('down1_c2_b')                  # (HW/4, 32)

    # stage 2: att_2 + down_2 cores batched
    y2 = dual_core(down1, Wm('core2_w1'), Wm('core2_w2'), Bv('core2_b'))  # (HW/4, 64)
    res2 = se(y2[:, :32], Wm('se2_w1'), Wm('se2_w2'),
              Wm('se2_wc'), Bv('se2_bc'))                                # (HW/4, 64)
    p2 = maxpool(y2[:, 32:], sel2_ref, (H // 4) * (W // 4))              # (HW/16, 32)
    down2 = mm(p2, Wm('down2_c2_w')) + Bv('down2_c2_b')                  # (HW/16, 64)

    # bottleneck 1x1 conv + decoder
    c1 = mm(down2, Wm('conv1_w')) + Bv('conv1_b')                        # (HW/16, 128)
    d1 = deconv4x4_s2(c1, dc1w_ref, scat1_ref, Bv('dc1_b'),
                      H // 4, W // 4, 64)                                # (HW/4, 64)
    d1 = core(d1 + res2, Wm('rb1_w'), Bv('rb1_b'))
    d2 = deconv4x4_s2(d1, dc2w_ref, scat2_ref, Bv('dc2_b'),
                      H // 2, W // 2, 32)                                # (HW, 32)
    d2 = core(d2 + res1, Wm('rb2_w'), Bv('rb2_b'))

    # final Conv2d(32,1,1,1) as a transposed-rhs dot -> lane-dense (1, HW) row.
    row = lax.dot_general(Wm('final_w'), d2.astype(bf16),
                          (((1,), (1,)), ((), ())),
                          preferred_element_type=f32) + Bv('final_b')
    out_ref[0] = row


# ------------------------------ host-side constants & packing ------------------------------

def _block_diag(a, b):
    n1, m1 = a.shape
    n2, m2 = b.shape
    out = jnp.zeros((n1 + n2, m1 + m2), jnp.float32)
    return out.at[:n1, :m1].set(a).at[n1:, m1:].set(b)


def _maxpool_sel(h, w):
    # (4*n_pool, n_in) 0/1 gather matrix for MaxPool2d(2,2) on a row-major flattened
    # (h*w) pixel axis; window element k lives in rows [k*n_pool, (k+1)*n_pool).
    hh, wh = h // 2, w // 2
    n_pool, n_in = hh * wh, h * w
    s = np.zeros((4 * n_pool, n_in), np.float32)
    for k, (dr, dc) in enumerate(((0, 0), (0, 1), (1, 0), (1, 1))):
        for oi in range(hh):
            for oj in range(wh):
                s[k * n_pool + oi * wh + oj, (2 * oi + dr) * w + (2 * oj + dc)] = 1.0
    return s


def _deconv_scatter(hi, wi):
    # (n_out, 4*n_in) 0/1 permutation matrix interleaving the 4 stride-2 parity
    # sub-images (class order (rh, rw) = (0,0),(0,1),(1,0),(1,1)) of a
    # ConvTranspose2d(k=4, s=2, p=1) into row-major (2*hi, 2*wi) output order.
    n_in, wo = hi * wi, 2 * wi
    s = np.zeros((4 * n_in, 4 * n_in), np.float32)
    for ci, (rh, rw) in enumerate(((0, 0), (0, 1), (1, 0), (1, 1))):
        for ih in range(hi):
            for iw in range(wi):
                s[(2 * ih + rh) * wo + (2 * iw + rw), ci * n_in + ih * wi + iw] = 1.0
    return s


def _pack_params(p):
    # Pack all small per-layer weights into one bf16 (R, 128) lane-dense slab
    # (each entry 8-row aligned) and all biases into one f32 (1, 12*128) slab.
    core1_w1 = jnp.concatenate([p['att1_w'], p['down1_w']], axis=1)
    core1_w2 = _block_diag(p['att1_w'], p['down1_w'])
    core1_b = jnp.concatenate([p['att1_b'], p['down1_b']], axis=1)
    core2_w1 = jnp.concatenate([p['att2_w'], p['down2_w']], axis=1)
    core2_w2 = _block_diag(p['att2_w'], p['down2_w'])
    core2_b = jnp.concatenate([p['att2_b'], p['down2_b']], axis=1)

    wmats = (
        ('core1_w1', core1_w1), ('core1_w2', core1_w2),
        ('se1_w1', p['att1_se_w1']), ('se1_w2', p['att1_se_w2']),
        ('se1_wc', p['att1_se_wc']), ('down1_c2_w', p['down1_c2_w']),
        ('core2_w1', core2_w1), ('core2_w2', core2_w2),
        ('se2_w1', p['att2_se_w1']), ('se2_w2', p['att2_se_w2']),
        ('se2_wc', p['att2_se_wc']), ('down2_c2_w', p['down2_c2_w']),
        ('conv1_w', p['conv1_w']), ('rb1_w', p['rb1_w']), ('rb2_w', p['rb2_w']),
        ('final_w', p['final_wt']),
    )
    wlay, rows, r = {}, [], 0
    for name, m in wmats:
        nr, nc = m.shape
        wlay[name] = (r, nr, nc)
        pad_r = (-nr) % 8
        rows.append(jnp.pad(m, ((0, pad_r), (0, 128 - nc))))
        r += nr + pad_r
    wpack = jnp.concatenate(rows, axis=0).astype(jnp.bfloat16)

    bvecs = (
        ('core1_b', core1_b), ('se1_bc', p['att1_se_bc']),
        ('down1_c2_b', p['down1_c2_b']), ('core2_b', core2_b),
        ('se2_bc', p['att2_se_bc']), ('down2_c2_b', p['down2_c2_b']),
        ('conv1_b', p['conv1_b']), ('dc1_b', p['dc1_b']), ('rb1_b', p['rb1_b']),
        ('dc2_b', p['dc2_b']), ('rb2_b', p['rb2_b']), ('final_b', p['final_b']),
    )
    blay, bparts = {}, []
    for i, (name, v) in enumerate(bvecs):
        n = v.shape[1]
        blay[name] = (i * 128, n)
        bparts.append(jnp.pad(v, ((0, 0), (0, 128 - n))))
    bpack = jnp.concatenate(bparts, axis=1).astype(jnp.float32)
    return wpack, wlay, bpack, blay


# ------------------------------ wrapper ------------------------------

def refnet_forward(x_nchw, p):
    s, c, h, w = x_nchw.shape
    hw = h * w
    # NCHW -> channels-last, spatially flattened (one tiny XLA transpose); everything
    # after this point runs inside a single fused Pallas kernel.
    x = jnp.transpose(x_nchw, (0, 2, 3, 1)).reshape(s, hw, c).astype(jnp.float32)

    wpack, wlay, bpack, blay = _pack_params(p)
    dc1w = p['dc1_wall'].astype(jnp.bfloat16)                 # (128, 16*64)
    dc2w = p['dc2_wall'].astype(jnp.bfloat16)                 # (64, 16*32)

    # precomputed 0/1 spatial-op constants (bf16, DMA'd once, VMEM-resident)
    sel1 = jnp.asarray(_maxpool_sel(h, w), jnp.bfloat16)
    sel2 = jnp.asarray(_maxpool_sel(h // 2, w // 2), jnp.bfloat16)
    scat1 = jnp.asarray(_deconv_scatter(h // 4, w // 4), jnp.bfloat16)
    scat2 = jnp.asarray(_deconv_scatter(h // 2, w // 2), jnp.bfloat16)

    consts = (wpack, bpack, dc1w, dc2w, scat1, scat2, sel1, sel2)
    in_specs = [pl.BlockSpec((1, hw, c), lambda i: (i, 0, 0))]
    in_specs += [pl.BlockSpec(a.shape, lambda i: (0, 0)) for a in consts]

    out = pl.pallas_call(
        functools.partial(_refnet_kernel, H=h, W=w, C=c, wlay=wlay, blay=blay),
        out_shape=jax.ShapeDtypeStruct((s, 1, hw), jnp.float32),
        grid=(s,),
        in_specs=in_specs,
        out_specs=pl.BlockSpec((1, 1, hw), lambda i: (i, 0, 0)),
        compiler_params=pltpu.CompilerParams(
            dimension_semantics=("parallel",),
            vmem_limit_bytes=32 * 1024 * 1024),
    )(x, *consts)
    return out.reshape(s, 1, h, w)                            # NCHW (S, 1, H, W)


# ------------------------------ parameters ------------------------------

def init_params(key, in_chan):
    # Deterministic synthetic weights (this is not a checkpoint load).
    def nrm(k, shape, scale=0.1):
        return scale * jax.random.normal(k, shape, jnp.float32)

    keys = iter(jax.random.split(key, 40))
    c = in_chan
    p = {}
    # att_1 = RefNet_basic(in_chan, 32, se=True)
    p['att1_w'] = nrm(next(keys), (c, c)); p['att1_b'] = nrm(next(keys), (1, c))
    p['att1_se_w1'] = nrm(next(keys), (c, c // 2))
    p['att1_se_w2'] = nrm(next(keys), (c // 2, c))
    p['att1_se_wc'] = nrm(next(keys), (c, 32)); p['att1_se_bc'] = nrm(next(keys), (1, 32))
    # down_1 = RefNet_basic(in_chan, 32, maxpool=True)
    p['down1_w'] = nrm(next(keys), (c, c)); p['down1_b'] = nrm(next(keys), (1, c))
    p['down1_c2_w'] = nrm(next(keys), (c, 32)); p['down1_c2_b'] = nrm(next(keys), (1, 32))
    # att_2 = RefNet_basic(32, 64, se=True)
    p['att2_w'] = nrm(next(keys), (32, 32)); p['att2_b'] = nrm(next(keys), (1, 32))
    p['att2_se_w1'] = nrm(next(keys), (32, 16))
    p['att2_se_w2'] = nrm(next(keys), (16, 32))
    p['att2_se_wc'] = nrm(next(keys), (32, 64)); p['att2_se_bc'] = nrm(next(keys), (1, 64))
    # down_2 = RefNet_basic(32, 64, maxpool=True)
    p['down2_w'] = nrm(next(keys), (32, 32)); p['down2_b'] = nrm(next(keys), (1, 32))
    p['down2_c2_w'] = nrm(next(keys), (32, 64)); p['down2_c2_b'] = nrm(next(keys), (1, 64))
    # conv_1 = Conv2d(64, 128, 1, 1)
    p['conv1_w'] = nrm(next(keys), (64, 128)); p['conv1_b'] = nrm(next(keys), (1, 128))
    # deconv_1 = ConvTranspose2d(128, 64, 4, 2, 1): weight as (Cin, 16*Cout),
    # tap (kh, kw) in columns [(kh*4 + kw)*Cout, (kh*4 + kw + 1)*Cout).
    dc1_w = nrm(next(keys), (128, 64, 4, 4)); dc1_b = nrm(next(keys), (64,))
    p['dc1_wall'] = jnp.transpose(dc1_w, (0, 2, 3, 1)).reshape(128, 16 * 64)
    p['dc1_b'] = dc1_b.reshape(1, 64)
    # refbasic_1 = RefNet_basic(64, 64)
    p['rb1_w'] = nrm(next(keys), (64, 64)); p['rb1_b'] = nrm(next(keys), (1, 64))
    # deconv_2 = ConvTranspose2d(64, 32, 4, 2, 1)
    dc2_w = nrm(next(keys), (64, 32, 4, 4)); dc2_b = nrm(next(keys), (32,))
    p['dc2_wall'] = jnp.transpose(dc2_w, (0, 2, 3, 1)).reshape(64, 16 * 32)
    p['dc2_b'] = dc2_b.reshape(1, 32)
    # refbasic_2 = RefNet_basic(32, 32)
    p['rb2_w'] = nrm(next(keys), (32, 32)); p['rb2_b'] = nrm(next(keys), (1, 32))
    # final Conv2d(32, 1, 1, 1): fixed deterministic parameter (see TODO at top).
    p['final_wt'] = nrm(next(keys), (32, 1)).reshape(1, 32)
    p['final_b'] = nrm(next(keys), (1, 1))
    return p


# ------------------------------ main ------------------------------

if __name__ == "__main__":
    in_chan, S, H, W = 4, 2, 16, 16
    key = jax.random.PRNGKey(0)
    pkey, xkey = jax.random.split(key)
    params = init_params(pkey, in_chan)
    x = jax.random.normal(xkey, (S, in_chan, H, W), jnp.float32)

    fwd = jax.jit(refnet_forward)
    out = jax.block_until_ready(fwd(x, params))

    assert out.shape == (S, 1, H, W), out.shape
    assert bool(jnp.all(jnp.isfinite(out)))
    print("KERNEL_OK")
</pallas_src>

<mosaic_0001>
module attributes {stable_mosaic.version = 11 : i64} {
  func.func @_refnet_kernel(%arg0: i32, %arg1: memref<1x256x4xf32, #tpu.memory_space<vmem>>, %arg2: memref<424x128xbf16, #tpu.memory_space<vmem>>, %arg3: memref<1x1536xf32, #tpu.memory_space<vmem>>, %arg4: memref<128x1024xbf16, #tpu.memory_space<vmem>>, %arg5: memref<64x512xbf16, #tpu.memory_space<vmem>>, %arg6: memref<64x64xbf16, #tpu.memory_space<vmem>>, %arg7: memref<256x256xbf16, #tpu.memory_space<vmem>>, %arg8: memref<256x256xbf16, #tpu.memory_space<vmem>>, %arg9: memref<64x64xbf16, #tpu.memory_space<vmem>>, %arg10: memref<1x1x256xf32, #tpu.memory_space<vmem>>) attributes {dimension_semantics = [#tpu.dimension_semantics<parallel>], iteration_bounds = array<i64: 2>, scalar_prefetch = 0 : i64, scratch_operands = 0 : i64, tpu.core_type = #tpu.core_type<tc>, window_params = [{transform_indices = @transform_0, window_bounds = array<i64: 1, 256, 4>}, {pipeline_mode = #tpu.pipeline_mode<synchronous>, transform_indices = @transform_1, window_bounds = array<i64: 424, 128>}, {pipeline_mode = #tpu.pipeline_mode<synchronous>, transform_indices = @transform_2, window_bounds = array<i64: 1, 1536>}, {pipeline_mode = #tpu.pipeline_mode<synchronous>, transform_indices = @transform_3, window_bounds = array<i64: 128, 1024>}, {pipeline_mode = #tpu.pipeline_mode<synchronous>, transform_indices = @transform_4, window_bounds = array<i64: 64, 512>}, {pipeline_mode = #tpu.pipeline_mode<synchronous>, transform_indices = @transform_5, window_bounds = array<i64: 64, 64>}, {pipeline_mode = #tpu.pipeline_mode<synchronous>, transform_indices = @transform_6, window_bounds = array<i64: 256, 256>}, {pipeline_mode = #tpu.pipeline_mode<synchronous>, transform_indices = @transform_7, window_bounds = array<i64: 256, 256>}, {pipeline_mode = #tpu.pipeline_mode<synchronous>, transform_indices = @transform_8, window_bounds = array<i64: 64, 64>}, {transform_indices = @transform_9, window_bounds = array<i64: 1, 1, 256>}]} {
    %c0 = arith.constant 0 : index
    %c0_0 = arith.constant 0 : index
    %c0_1 = arith.constant 0 : index
    %0 = vector.load %arg1[%c0, %c0_0, %c0_1] : memref<1x256x4xf32, #tpu.memory_space<vmem>>, vector<1x256x4xf32>
    %1 = vector.shape_cast %0 : vector<1x256x4xf32> to vector<256x4xf32>
    %c0_2 = arith.constant 0 : index
    %c0_3 = arith.constant 0 : index
    %2 = vector.load %arg2[%c0_2, %c0_3] : memref<424x128xbf16, #tpu.memory_space<vmem>>, vector<4x8xbf16>
    %c8 = arith.constant 8 : index
    %c0_4 = arith.constant 0 : index
    %3 = vector.load %arg2[%c8, %c0_4] : memref<424x128xbf16, #tpu.memory_space<vmem>>, vector<8x8xbf16>
    %c0_5 = arith.constant 0 : index
    %c0_6 = arith.constant 0 : index
    %4 = vector.load %arg3[%c0_5, %c0_6] : memref<1x1536xf32, #tpu.memory_space<vmem>>, vector<1x8xf32>
    %5 = arith.truncf %1 : vector<256x4xf32> to vector<256x4xbf16>
    %cst = arith.constant dense<0.000000e+00> : vector<256x8xf32>
    %6 = tpu.matmul %5, %2, %cst {dimension_numbers = #tpu.dot_dimension_numbers<[1], [0], [0], [1], [0, 0, 1, 1], [], []>} : vector<256x4xbf16>, vector<4x8xbf16>, vector<256x8xf32> -> vector<256x8xf32>
    %7 = vector.broadcast %4 : vector<1x8xf32> to vector<256x8xf32>
    %8 = arith.addf %6, %7 : vector<256x8xf32>
    %cst_7 = arith.constant 0.000000e+00 : f32
    %9 = vector.broadcast %cst_7 : f32 to vector<256x8xf32>
    %10 = arith.maximumf %8, %9 : vector<256x8xf32>
    %11 = arith.truncf %10 : vector<256x8xf32> to vector<256x8xbf16>
    %cst_8 = arith.constant dense<0.000000e+00> : vector<256x8xf32>
    %12 = tpu.matmul %11, %3, %cst_8 {dimension_numbers = #tpu.dot_dimension_numbers<[1], [0], [0], [1], [0, 0, 1, 1], [], []>} : vector<256x8xbf16>, vector<8x8xbf16>, vector<256x8xf32> -> vector<256x8xf32>
    %13 = vector.broadcast %4 : vector<1x8xf32> to vector<256x8xf32>
    %14 = arith.addf %12, %13 : vector<256x8xf32>
    %cst_9 = arith.constant 0.000000e+00 : f32
    %15 = vector.broadcast %cst_9 : f32 to vector<256x8xf32>
    %16 = arith.maximumf %14, %15 : vector<256x8xf32>
    %17 = arith.addf %8, %16 : vector<256x8xf32>
    %18 = vector.extract_strided_slice %17 {offsets = [0, 0], sizes = [256, 4], strides = [1, 1]} : vector<256x8xf32> to vector<256x4xf32>
    %c16 = arith.constant 16 : index
    %c0_10 = arith.constant 0 : index
    %19 = vector.load %arg2[%c16, %c0_10] : memref<424x128xbf16, #tpu.memory_space<vmem>>, vector<4x2xbf16>
    %c24 = arith.constant 24 : index
    %c0_11 = arith.constant 0 : index
    %20 = vector.load %arg2[%c24, %c0_11] : memref<424x128xbf16, #tpu.memory_space<vmem>>, vector<2x4xbf16>
    %c32 = arith.constant 32 : index
    %c0_12 = arith.constant 0 : index
    %21 = vector.load %arg2[%c32, %c0_12] : memref<424x128xbf16, #tpu.memory_space<vmem>>, vector<4x32xbf16>
    %c0_13 = arith.constant 0 : index
    %c128 = arith.constant 128 : index
    %22 = vector.load %arg3[%c0_13, %c128] : memref<1x1536xf32, #tpu.memory_space<vmem>>, vector<1x32xf32>
    %cst_14 = arith.constant dense<0.000000e+00> : vector<4xf32>
    %23 = vector.multi_reduction <add>, %18, %cst_14 [0] : vector<256x4xf32> to vector<4xf32>
    %24 = vector.shape_cast %23 : vector<4xf32> to vector<1x4xf32>
    %cst_15 = arith.constant 2.560000e+02 : f32
    %25 = vector.broadcast %cst_15 : f32 to vector<1x4xf32>
    %26 = arith.divf %24, %25 : vector<1x4xf32>
    %27 = arith.truncf %26 : vector<1x4xf32> to vector<1x4xbf16>
    %cst_16 = arith.constant dense<0.000000e+00> : vector<1x2xf32>
    %28 = tpu.matmul %27, %19, %cst_16 {dimension_numbers = #tpu.dot_dimension_numbers<[1], [0], [0], [1], [0, 0, 1, 1], [], []>} : vector<1x4xbf16>, vector<4x2xbf16>, vector<1x2xf32> -> vector<1x2xf32>
    %cst_17 = arith.constant 0.000000e+00 : f32
    %29 = vector.broadcast %cst_17 : f32 to vector<1x2xf32>
    %30 = arith.maximumf %28, %29 : vector<1x2xf32>
    %31 = arith.truncf %30 : vector<1x2xf32> to vector<1x2xbf16>
    %cst_18 = arith.constant dense<0.000000e+00> : vector<1x4xf32>
    %32 = tpu.matmul %31, %20, %cst_18 {dimension_numbers = #tpu.dot_dimension_numbers<[1], [0], [0], [1], [0, 0, 1, 1], [], []>} : vector<1x2xbf16>, vector<2x4xbf16>, vector<1x4xf32> -> vector<1x4xf32>
    %cst_19 = arith.constant 0.000000e+00 : f32
    %33 = vector.broadcast %cst_19 : f32 to vector<1x4xf32>
    %34 = arith.subf %33, %32 : vector<1x4xf32>
    %35 = math.exp %34 : vector<1x4xf32>
    %cst_20 = arith.constant 1.000000e+00 : f32
    %36 = vector.broadcast %cst_20 : f32 to vector<1x4xf32>
    %37 = arith.addf %36, %35 : vector<1x4xf32>
    %38 = tpu.reciprocal %37 {approx = true} : vector<1x4xf32> -> vector<1x4xf32>
    %39 = vector.broadcast %38 : vector<1x4xf32> to vector<256x4xf32>
    %40 = arith.mulf %18, %39 : vector<256x4xf32>
    %41 = arith.truncf %40 : vector<256x4xf32> to vector<256x4xbf16>
    %cst_21 = arith.constant dense<0.000000e+00> : vector<256x32xf32>
    %42 = tpu.matmul %41, %21, %cst_21 {dimension_numbers = #tpu.dot_dimension_numbers<[1], [0], [0], [1], [0, 0, 1, 1], [], []>} : vector<256x4xbf16>, vector<4x32xbf16>, vector<256x32xf32> -> vector<256x32xf32>
    %43 = vector.broadcast %22 : vector<1x32xf32> to vector<256x32xf32>
    %44 = arith.addf %42, %43 : vector<256x32xf32>
    %45 = vector.extract_strided_slice %17 {offsets = [0, 4], sizes = [256, 4], strides = [1, 1]} : vector<256x8xf32> to vector<256x4xf32>
    %c0_22 = arith.constant 0 : index
    %c0_23 = arith.constant 0 : index
    %46 = vector.load %arg8[%c0_22, %c0_23] : memref<256x256xbf16, #tpu.memory_space<vmem>>, vector<256x256xbf16>
    %47 = arith.truncf %45 : vector<256x4xf32> to vector<256x4xbf16>
    %cst_24 = arith.constant dense<0.000000e+00> : vector<256x4xf32>
    %48 = tpu.matmul %46, %47, %cst_24 {dimension_numbers = #tpu.dot_dimension_numbers<[1], [0], [0], [1], [0, 0, 1, 1], [], []>} : vector<256x256xbf16>, vector<256x4xbf16>, vector<256x4xf32> -> vector<256x4xf32>
    %49 = vector.extract_strided_slice %48 {offsets = [0, 0], sizes = [64, 4], strides = [1, 1]} : vector<256x4xf32> to vector<64x4xf32>
    %50 = vector.extract_strided_slice %48 {offsets = [64, 0], sizes = [64, 4], strides = [1, 1]} : vector<256x4xf32> to vector<64x4xf32>
    %51 = arith.maximumf %49, %50 : vector<64x4xf32>
    %52 = vector.extract_strided_slice %48 {offsets = [128, 0], sizes = [64, 4], strides = [1, 1]} : vector<256x4xf32> to vector<64x4xf32>
    %53 = vector.extract_strided_slice %48 {offsets = [192, 0], sizes = [64, 4], strides = [1, 1]} : vector<256x4xf32> to vector<64x4xf32>
    %54 = arith.maximumf %52, %53 : vector<64x4xf32>
    %55 = arith.maximumf %51, %54 : vector<64x4xf32>
    %c40 = arith.constant 40 : index
    %c0_25 = arith.constant 0 : index
    %56 = vector.load %arg2[%c40, %c0_25] : memref<424x128xbf16, #tpu.memory_space<vmem>>, vector<4x32xbf16>
    %57 = arith.truncf %55 : vector<64x4xf32> to vector<64x4xbf16>
    %cst_26 = arith.constant dense<0.000000e+00> : vector<64x32xf32>
    %58 = tpu.matmul %57, %56, %cst_26 {dimension_numbers = #tpu.dot_dimension_numbers<[1], [0], [0], [1], [0, 0, 1, 1], [], []>} : vector<64x4xbf16>, vector<4x32xbf16>, vector<64x32xf32> -> vector<64x32xf32>
    %c0_27 = arith.constant 0 : index
    %c256 = arith.constant 256 : index
    %59 = vector.load %arg3[%c0_27, %c256] : memref<1x1536xf32, #tpu.memory_space<vmem>>, vector<1x32xf32>
    %60 = vector.broadcast %59 : vector<1x32xf32> to vector<64x32xf32>
    %61 = arith.addf %58, %60 : vector<64x32xf32>
    %c48 = arith.constant 48 : index
    %c0_28 = arith.constant 0 : index
    %62 = vector.load %arg2[%c48, %c0_28] : memref<424x128xbf16, #tpu.memory_space<vmem>>, vector<32x64xbf16>
    %c80 = arith.constant 80 : index
    %c0_29 = arith.constant 0 : index
    %63 = vector.load %arg2[%c80, %c0_29] : memref<424x128xbf16, #tpu.memory_space<vmem>>, vector<64x64xbf16>
    %c0_30 = arith.constant 0 : index
    %c384 = arith.constant 384 : index
    %64 = vector.load %arg3[%c0_30, %c384] : memref<1x1536xf32, #tpu.memory_space<vmem>>, vector<1x64xf32>
    %65 = arith.truncf %61 : vector<64x32xf32> to vector<64x32xbf16>
    %cst_31 = arith.constant dense<0.000000e+00> : vector<64x64xf32>
    %66 = tpu.matmul %65, %62, %cst_31 {dimension_numbers = #tpu.dot_dimension_numbers<[1], [0], [0], [1], [0, 0, 1, 1], [], []>} : vector<64x32xbf16>, vector<32x64xbf16>, vector<64x64xf32> -> vector<64x64xf32>
    %67 = vector.broadcast %64 : vector<1x64xf32> to vector<64x64xf32>
    %68 = arith.addf %66, %67 : vector<64x64xf32>
    %cst_32 = arith.constant 0.000000e+00 : f32
    %69 = vector.broadcast %cst_32 : f32 to vector<64x64xf32>
    %70 = arith.maximumf %68, %69 : vector<64x64xf32>
    %71 = arith.truncf %70 : vector<64x64xf32> to vector<64x64xbf16>
    %cst_33 = arith.constant dense<0.000000e+00> : vector<64x64xf32>
    %72 = tpu.matmul %71, %63, %cst_33 {dimension_numbers = #tpu.dot_dimension_numbers<[1], [0], [0], [1], [0, 0, 1, 1], [], []>} : vector<64x64xbf16>, vector<64x64xbf16>, vector<64x64xf32> -> vector<64x64xf32>
    %73 = vector.broadcast %64 : vector<1x64xf32> to vector<64x64xf32>
    %74 = arith.addf %72, %73 : vector<64x64xf32>
    %cst_34 = arith.constant 0.000000e+00 : f32
    %75 = vector.broadcast %cst_34 : f32 to vector<64x64xf32>
    %76 = arith.maximumf %74, %75 : vector<64x64xf32>
    %77 = arith.addf %68, %76 : vector<64x64xf32>
    %78 = vector.extract_strided_slice %77 {offsets = [0, 0], sizes = [64, 32], strides = [1, 1]} : vector<64x64xf32> to vector<64x32xf32>
    %c144 = arith.constant 144 : index
    %c0_35 = arith.constant 0 : index
    %79 = vector.load %arg2[%c144, %c0_35] : memref<424x128xbf16, #tpu.memory_space<vmem>>, vector<32x16xbf16>
    %c176 = arith.constant 176 : index
    %c0_36 = arith.constant 0 : index
    %80 = vector.load %arg2[%c176, %c0_36] : memref<424x128xbf16, #tpu.memory_space<vmem>>, vector<16x32xbf16>
    %c192 = arith.constant 192 : index
    %c0_37 = arith.constant 0 : index
    %81 = vector.load %arg2[%c192, %c0_37] : memref<424x128xbf16, #tpu.memory_space<vmem>>, vector<32x64xbf16>
    %c0_38 = arith.constant 0 : index
    %c512 = arith.constant 512 : index
    %82 = vector.load %arg3[%c0_38, %c512] : memref<1x1536xf32, #tpu.memory_space<vmem>>, vector<1x64xf32>
    %cst_39 = arith.constant dense<0.000000e+00> : vector<32xf32>
    %83 = vector.multi_reduction <add>, %78, %cst_39 [0] : vector<64x32xf32> to vector<32xf32>
    %84 = vector.shape_cast %83 : vector<32xf32> to vector<1x32xf32>
    %cst_40 = arith.constant 6.400000e+01 : f32
    %85 = vector.broadcast %cst_40 : f32 to vector<1x32xf32>
    %86 = arith.divf %84, %85 : vector<1x32xf32>
    %87 = arith.truncf %86 : vector<1x32xf32> to vector<1x32xbf16>
    %cst_41 = arith.constant dense<0.000000e+00> : vector<1x16xf32>
    %88 = tpu.matmul %87, %79, %cst_41 {dimension_numbers = #tpu.dot_dimension_numbers<[1], [0], [0], [1], [0, 0, 1, 1], [], []>} : vector<1x32xbf16>, vector<32x16xbf16>, vector<1x16xf32> -> vector<1x16xf32>
    %cst_42 = arith.constant 0.000000e+00 : f32
    %89 = vector.broadcast %cst_42 : f32 to vector<1x16xf32>
    %90 = arith.maximumf %88, %89 : vector<1x16xf32>
    %91 = arith.truncf %90 : vector<1x16xf32> to vector<1x16xbf16>
    %cst_43 = arith.constant dense<0.000000e+00> : vector<1x32xf32>
    %92 = tpu.matmul %91, %80, %cst_43 {dimension_numbers = #tpu.dot_dimension_numbers<[1], [0], [0], [1], [0, 0, 1, 1], [], []>} : vector<1x16xbf16>, vector<16x32xbf16>, vector<1x32xf32> -> vector<1x32xf32>
    %cst_44 = arith.constant 0.000000e+00 : f32
    %93 = vector.broadcast %cst_44 : f32 to vector<1x32xf32>
    %94 = arith.subf %93, %92 : vector<1x32xf32>
    %95 = math.exp %94 : vector<1x32xf32>
    %cst_45 = arith.constant 1.000000e+00 : f32
    %96 = vector.broadcast %cst_45 : f32 to vector<1x32xf32>
    %97 = arith.addf %96, %95 : vector<1x32xf32>
    %98 = tpu.reciprocal %97 {approx = true} : vector<1x32xf32> -> vector<1x32xf32>
    %99 = vector.broadcast %98 : vector<1x32xf32> to vector<64x32xf32>
    %100 = arith.mulf %78, %99 : vector<64x32xf32>
    %101 = arith.truncf %100 : vector<64x32xf32> to vector<64x32xbf16>
    %cst_46 = arith.constant dense<0.000000e+00> : vector<64x64xf32>
    %102 = tpu.matmul %101, %81, %cst_46 {dimension_numbers = #tpu.dot_dimension_numbers<[1], [0], [0], [1], [0, 0, 1, 1], [], []>} : vector<64x32xbf16>, vector<32x64xbf16>, vector<64x64xf32> -> vector<64x64xf32>
    %103 = vector.broadcast %82 : vector<1x64xf32> to vector<64x64xf32>
    %104 = arith.addf %102, %103 : vector<64x64xf32>
    %105 = vector.extract_strided_slice %77 {offsets = [0, 32], sizes = [64, 32], strides = [1, 1]} : vector<64x64xf32> to vector<64x32xf32>
    %c0_47 = arith.constant 0 : index
    %c0_48 = arith.constant 0 : index
    %106 = vector.load %arg9[%c0_47, %c0_48] : memref<64x64xbf16, #tpu.memory_space<vmem>>, vector<64x64xbf16>
    %107 = arith.truncf %105 : vector<64x32xf32> to vector<64x32xbf16>
    %cst_49 = arith.constant dense<0.000000e+00> : vector<64x32xf32>
    %108 = tpu.matmul %106, %107, %cst_49 {dimension_numbers = #tpu.dot_dimension_numbers<[1], [0], [0], [1], [0, 0, 1, 1], [], []>} : vector<64x64xbf16>, vector<64x32xbf16>, vector<64x32xf32> -> vector<64x32xf32>
    %109 = vector.extract_strided_slice %108 {offsets = [0, 0], sizes = [16, 32], strides = [1, 1]} : vector<64x32xf32> to vector<16x32xf32>
    %110 = vector.extract_strided_slice %108 {offsets = [16, 0], sizes = [16, 32], strides = [1, 1]} : vector<64x32xf32> to vector<16x32xf32>
    %111 = arith.maximumf %109, %110 : vector<16x32xf32>
    %112 = vector.extract_strided_slice %108 {offsets = [32, 0], sizes = [16, 32], strides = [1, 1]} : vector<64x32xf32> to vector<16x32xf32>
    %113 = vector.extract_strided_slice %108 {offsets = [48, 0], sizes = [16, 32], strides = [1, 1]} : vector<64x32xf32> to vector<16x32xf32>
    %114 = arith.maximumf %112, %113 : vector<16x32xf32>
    %115 = arith.maximumf %111, %114 : vector<16x32xf32>
    %c224 = arith.constant 224 : index
    %c0_50 = arith.constant 0 : index
    %116 = vector.load %arg2[%c224, %c0_50] : memref<424x128xbf16, #tpu.memory_space<vmem>>, vector<32x64xbf16>
    %117 = arith.truncf %115 : vector<16x32xf32> to vector<16x32xbf16>
    %cst_51 = arith.constant dense<0.000000e+00> : vector<16x64xf32>
    %118 = tpu.matmul %117, %116, %cst_51 {dimension_numbers = #tpu.dot_dimension_numbers<[1], [0], [0], [1], [0, 0, 1, 1], [], []>} : vector<16x32xbf16>, vector<32x64xbf16>, vector<16x64xf32> -> vector<16x64xf32>
    %c0_52 = arith.constant 0 : index
    %c640 = arith.constant 640 : index
    %119 = vector.load %arg3[%c0_52, %c640] : memref<1x1536xf32, #tpu.memory_space<vmem>>, vector<1x64xf32>
    %120 = vector.broadcast %119 : vector<1x64xf32> to vector<16x64xf32>
    %121 = arith.addf %118, %120 : vector<16x64xf32>
    %c256_53 = arith.constant 256 : index
    %c0_54 = arith.constant 0 : index
    %122 = vector.load %arg2[%c256_53, %c0_54] : memref<424x128xbf16, #tpu.memory_space<vmem>>, vector<64x128xbf16>
    %123 = arith.truncf %121 : vector<16x64xf32> to vector<16x64xbf16>
    %cst_55 = arith.constant dense<0.000000e+00> : vector<16x128xf32>
    %124 = tpu.matmul %123, %122, %cst_55 {dimension_numbers = #tpu.dot_dimension_numbers<[1], [0], [0], [1], [0, 0, 1, 1], [], []>} : vector<16x64xbf16>, vector<64x128xbf16>, vector<16x128xf32> -> vector<16x128xf32>
    %c0_56 = arith.constant 0 : index
    %c768 = arith.constant 768 : index
    %125 = vector.load %arg3[%c0_56, %c768] : memref<1x1536xf32, #tpu.memory_space<vmem>>, vector<1x128xf32>
    %126 = vector.broadcast %125 : vector<1x128xf32> to vector<16x128xf32>
    %127 = arith.addf %124, %126 : vector<16x128xf32>
    %c0_57 = arith.constant 0 : index
    %c896 = arith.constant 896 : index
    %128 = vector.load %arg3[%c0_57, %c896] : memref<1x1536xf32, #tpu.memory_space<vmem>>, vector<1x64xf32>
    %c0_58 = arith.constant 0 : index
    %c0_59 = arith.constant 0 : index
    %129 = vector.load %arg4[%c0_58, %c0_59] : memref<128x1024xbf16, #tpu.memory_space<vmem>>, vector<128x1024xbf16>
    %130 = arith.truncf %127 : vector<16x128xf32> to vector<16x128xbf16>
    %cst_60 = arith.constant dense<0.000000e+00> : vector<16x1024xf32>
    %131 = tpu.matmul %130, %129, %cst_60 {dimension_numbers = #tpu.dot_dimension_numbers<[1], [0], [0], [1], [0, 0, 1, 1], [], []>} : vector<16x128xbf16>, vector<128x1024xbf16>, vector<16x1024xf32> -> vector<16x1024xf32>
    %132 = tpu.iota {dimensions = array<i32: 0>} : vector<16x1xi32>
    %c4_i32 = arith.constant 4 : i32
    %c0_i32 = arith.constant 0 : i32
    %133 = arith.cmpi eq, %c4_i32, %c0_i32 : i32
    %c1_i32 = arith.constant 1 : i32
    %134 = arith.select %133, %c1_i32, %c4_i32 : i32
    %135 = vector.broadcast %134 : i32 to vector<16x1xi32>
    %136 = arith.remsi %132, %135 : vector<16x1xi32>
    %c0_i32_61 = arith.constant 0 : i32
    %137 = vector.broadcast %c0_i32_61 : i32 to vector<16x1xi32>
    %138 = arith.cmpi ne, %136, %137 : vector<16x1xi32>
    %c0_i32_62 = arith.constant 0 : i32
    %139 = vector.broadcast %c0_i32_62 : i32 to vector<16x1xi32>
    %140 = arith.cmpi slt, %136, %139 : vector<16x1xi32>
    %c0_i32_63 = arith.constant 0 : i32
    %141 = arith.cmpi slt, %134, %c0_i32_63 : i32
    %142 = vector.broadcast %141 : i1 to vector<16x1xi1>
    %143 = vector.broadcast %142 : vector<16x1xi1> to vector<16x1xi1>
    %144 = arith.xori %140, %143 : vector<16x1xi1>
    %145 = arith.andi %144, %138 : vector<16x1xi1>
    %146 = vector.broadcast %134 : i32 to vector<16x1xi32>
    %147 = arith.addi %136, %146 : vector<16x1xi32>
    %148 = arith.select %145, %147, %136 : vector<16x1xi1>, vector<16x1xi32>
    %c0_i32_64 = arith.constant 0 : i32
    %149 = vector.broadcast %c0_i32_64 : i32 to vector<16x1xi32>
    %150 = arith.cmpi ne, %148, %149 : vector<16x1xi32>
    %151 = arith.extui %150 : vector<16x1xi1> to vector<16x1xi32>
    %152 = arith.sitofp %151 : vector<16x1xi32> to vector<16x1xf32>
    %c3_i32 = arith.constant 3 : i32
    %153 = vector.broadcast %c3_i32 : i32 to vector<16x1xi32>
    %154 = arith.cmpi ne, %148, %153 : vector<16x1xi32>
    %155 = arith.extui %154 : vector<16x1xi1> to vector<16x1xi32>
    %156 = arith.sitofp %155 : vector<16x1xi32> to vector<16x1xf32>
    %157 = vector.extract_strided_slice %131 {offsets = [0, 320], sizes = [16, 64], strides = [1, 1]} : vector<16x1024xf32> to vector<16x64xf32>
    %158 = vector.extract_strided_slice %131 {offsets = [0, 448], sizes = [16, 64], strides = [1, 1]} : vector<16x1024xf32> to vector<16x64xf32>
    %cst_65 = arith.constant 0.000000e+00 : f32
    %159 = vector.broadcast %cst_65 : f32 to vector<1x64xf32>
    %160 = vector.extract_strided_slice %158 {offsets = [0, 0], sizes = [15, 64], strides = [1, 1]} : vector<16x64xf32> to vector<15x64xf32>
    %161 = tpu.concatenate %159, %160 in 0 : vector<1x64xf32>, vector<15x64xf32> -> vector<16x64xf32>
    %162 = vector.broadcast %152 : vector<16x1xf32> to vector<16x64xf32>
    %163 = arith.mulf %161, %162 : vector<16x64xf32>
    %164 = arith.addf %157, %163 : vector<16x64xf32>
    %165 = vector.extract_strided_slice %131 {offsets = [0, 832], sizes = [16, 64], strides = [1, 1]} : vector<16x1024xf32> to vector<16x64xf32>
    %166 = vector.extract_strided_slice %131 {offsets = [0, 960], sizes = [16, 64], strides = [1, 1]} : vector<16x1024xf32> to vector<16x64xf32>
    %cst_66 = arith.constant 0.000000e+00 : f32
    %167 = vector.broadcast %cst_66 : f32 to vector<1x64xf32>
    %168 = vector.extract_strided_slice %166 {offsets = [0, 0], sizes = [15, 64], strides = [1, 1]} : vector<16x64xf32> to vector<15x64xf32>
    %169 = tpu.concatenate %167, %168 in 0 : vector<1x64xf32>, vector<15x64xf32> -> vector<16x64xf32>
    %170 = vector.broadcast %152 : vector<16x1xf32> to vector<16x64xf32>
    %171 = arith.mulf %169, %170 : vector<16x64xf32>
    %172 = arith.addf %165, %171 : vector<16x64xf32>
    %cst_67 = arith.constant 0.000000e+00 : f32
    %173 = vector.broadcast %cst_67 : f32 to vector<4x64xf32>
    %174 = vector.extract_strided_slice %172 {offsets = [0, 0], sizes = [12, 64], strides = [1, 1]} : vector<16x64xf32> to vector<12x64xf32>
    %175 = tpu.concatenate %173, %174 in 0 : vector<4x64xf32>, vector<12x64xf32> -> vector<16x64xf32>
    %176 = arith.addf %164, %175 : vector<16x64xf32>
    %177 = vector.extract_strided_slice %131 {offsets = [0, 384], sizes = [16, 64], strides = [1, 1]} : vector<16x1024xf32> to vector<16x64xf32>
    %178 = vector.extract_strided_slice %131 {offsets = [0, 256], sizes = [16, 64], strides = [1, 1]} : vector<16x1024xf32> to vector<16x64xf32>
    %cst_68 = arith.constant 0.000000e+00 : f32
    %179 = vector.broadcast %cst_68 : f32 to vector<1x64xf32>
    %180 = vector.extract_strided_slice %178 {offsets = [1, 0], sizes = [15, 64], strides = [1, 1]} : vector<16x64xf32> to vector<15x64xf32>
    %181 = tpu.concatenate %180, %179 in 0 : vector<15x64xf32>, vector<1x64xf32> -> vector<16x64xf32>
    %182 = vector.broadcast %156 : vector<16x1xf32> to vector<16x64xf32>
    %183 = arith.mulf %181, %182 : vector<16x64xf32>
    %184 = arith.addf %177, %183 : vector<16x64xf32>
    %185 = vector.extract_strided_slice %131 {offsets = [0, 896], sizes = [16, 64], strides = [1, 1]} : vector<16x1024xf32> to vector<16x64xf32>
    %186 = vector.extract_strided_slice %131 {offsets = [0, 768], sizes = [16, 64], strides = [1, 1]} : vector<16x1024xf32> to vector<16x64xf32>
    %cst_69 = arith.constant 0.000000e+00 : f32
    %187 = vector.broadcast %cst_69 : f32 to vector<1x64xf32>
    %188 = vector.extract_strided_slice %186 {offsets = [1, 0], sizes = [15, 64], strides = [1, 1]} : vector<16x64xf32> to vector<15x64xf32>
    %189 = tpu.concatenate %188, %187 in 0 : vector<15x64xf32>, vector<1x64xf32> -> vector<16x64xf32>
    %190 = vector.broadcast %156 : vector<16x1xf32> to vector<16x64xf32>
    %191 = arith.mulf %189, %190 : vector<16x64xf32>
    %192 = arith.addf %185, %191 : vector<16x64xf32>
    %cst_70 = arith.constant 0.000000e+00 : f32
    %193 = vector.broadcast %cst_70 : f32 to vector<4x64xf32>
    %194 = vector.extract_strided_slice %192 {offsets = [0, 0], sizes = [12, 64], strides = [1, 1]} : vector<16x64xf32> to vector<12x64xf32>
    %195 = tpu.concatenate %193, %194 in 0 : vector<4x64xf32>, vector<12x64xf32> -> vector<16x64xf32>
    %196 = arith.addf %184, %195 : vector<16x64xf32>
    %197 = vector.extract_strided_slice %131 {offsets = [0, 576], sizes = [16, 64], strides = [1, 1]} : vector<16x1024xf32> to vector<16x64xf32>
    %198 = vector.extract_strided_slice %131 {offsets = [0, 704], sizes = [16, 64], strides = [1, 1]} : vector<16x1024xf32> to vector<16x64xf32>
    %cst_71 = arith.constant 0.000000e+00 : f32
    %199 = vector.broadcast %cst_71 : f32 to vector<1x64xf32>
    %200 = vector.extract_strided_slice %198 {offsets = [0, 0], sizes = [15, 64], strides = [1, 1]} : vector<16x64xf32> to vector<15x64xf32>
    %201 = tpu.concatenate %199, %200 in 0 : vector<1x64xf32>, vector<15x64xf32> -> vector<16x64xf32>
    %202 = vector.broadcast %152 : vector<16x1xf32> to vector<16x64xf32>
    %203 = arith.mulf %201, %202 : vector<16x64xf32>
    %204 = arith.addf %197, %203 : vector<16x64xf32>
    %205 = vector.extract_strided_slice %131 {offsets = [0, 64], sizes = [16, 64], strides = [1, 1]} : vector<16x1024xf32> to vector<16x64xf32>
    %206 = vector.extract_strided_slice %131 {offsets = [0, 192], sizes = [16, 64], strides = [1, 1]} : vector<16x1024xf32> to vector<16x64xf32>
    %cst_72 = arith.constant 0.000000e+00 : f32
    %207 = vector.broadcast %cst_72 : f32 to vector<1x64xf32>
    %208 = vector.extract_strided_slice %206 {offsets = [0, 0], sizes = [15, 64], strides = [1, 1]} : vector<16x64xf32> to vector<15x64xf32>
    %209 = tpu.concatenate %207, %208 in 0 : vector<1x64xf32>, vector<15x64xf32> -> vector<16x64xf32>
    %210 = vector.broadcast %152 : vector<16x1xf32> to vector<16x64xf32>
    %211 = arith.mulf %209, %210 : vector<16x64xf32>
    %212 = arith.addf %205, %211 : vector<16x64xf32>
    %cst_73 = arith.constant 0.000000e+00 : f32
    %213 = vector.broadcast %cst_73 : f32 to vector<4x64xf32>
    %214 = vector.extract_strided_slice %212 {offsets = [4, 0], sizes = [12, 64], strides = [1, 1]} : vector<16x64xf32> to vector<12x64xf32>
    %215 = tpu.concatenate %214, %213 in 0 : vector<12x64xf32>, vector<4x64xf32> -> vector<16x64xf32>
    %216 = arith.addf %204, %215 : vector<16x64xf32>
    %217 = vector.extract_strided_slice %131 {offsets = [0, 640], sizes = [16, 64], strides = [1, 1]} : vector<16x1024xf32> to vector<16x64xf32>
    %218 = vector.extract_strided_slice %131 {offsets = [0, 512], sizes = [16, 64], strides = [1, 1]} : vector<16x1024xf32> to vector<16x64xf32>
    %cst_74 = arith.constant 0.000000e+00 : f32
    %219 = vector.broadcast %cst_74 : f32 to vector<1x64xf32>
    %220 = vector.extract_strided_slice %218 {offsets = [1, 0], sizes = [15, 64], strides = [1, 1]} : vector<16x64xf32> to vector<15x64xf32>
    %221 = tpu.concatenate %220, %219 in 0 : vector<15x64xf32>, vector<1x64xf32> -> vector<16x64xf32>
    %222 = vector.broadcast %156 : vector<16x1xf32> to vector<16x64xf32>
    %223 = arith.mulf %221, %222 : vector<16x64xf32>
    %224 = arith.addf %217, %223 : vector<16x64xf32>
    %225 = vector.extract_strided_slice %131 {offsets = [0, 128], sizes = [16, 64], strides = [1, 1]} : vector<16x1024xf32> to vector<16x64xf32>
    %226 = vector.extract_strided_slice %131 {offsets = [0, 0], sizes = [16, 64], strides = [1, 1]} : vector<16x1024xf32> to vector<16x64xf32>
    %cst_75 = arith.constant 0.000000e+00 : f32
    %227 = vector.broadcast %cst_75 : f32 to vector<1x64xf32>
    %228 = vector.extract_strided_slice %226 {offsets = [1, 0], sizes = [15, 64], strides = [1, 1]} : vector<16x64xf32> to vector<15x64xf32>
    %229 = tpu.concatenate %228, %227 in 0 : vector<15x64xf32>, vector<1x64xf32> -> vector<16x64xf32>
    %230 = vector.broadcast %156 : vector<16x1xf32> to vector<16x64xf32>
    %231 = arith.mulf %229, %230 : vector<16x64xf32>
    %232 = arith.addf %225, %231 : vector<16x64xf32>
    %cst_76 = arith.constant 0.000000e+00 : f32
    %233 = vector.broadcast %cst_76 : f32 to vector<4x64xf32>
    %234 = vector.extract_strided_slice %232 {offsets = [4, 0], sizes = [12, 64], strides = [1, 1]} : vector<16x64xf32> to vector<12x64xf32>
    %235 = tpu.concatenate %234, %233 in 0 : vector<12x64xf32>, vector<4x64xf32> -> vector<16x64xf32>
    %236 = arith.addf %224, %235 : vector<16x64xf32>
    %237 = tpu.concatenate %176, %196, %216, %236 in 0 : vector<16x64xf32>, vector<16x64xf32>, vector<16x64xf32>, vector<16x64xf32> -> vector<64x64xf32>
    %c0_77 = arith.constant 0 : index
    %c0_78 = arith.constant 0 : index
    %238 = vector.load %arg6[%c0_77, %c0_78] : memref<64x64xbf16, #tpu.memory_space<vmem>>, vector<64x64xbf16>
    %239 = arith.truncf %237 : vector<64x64xf32> to vector<64x64xbf16>
    %cst_79 = arith.constant dense<0.000000e+00> : vector<64x64xf32>
    %240 = tpu.matmul %238, %239, %cst_79 {dimension_numbers = #tpu.dot_dimension_numbers<[1], [0], [0], [1], [0, 0, 1, 1], [], []>} : vector<64x64xbf16>, vector<64x64xbf16>, vector<64x64xf32> -> vector<64x64xf32>
    %241 = vector.broadcast %128 : vector<1x64xf32> to vector<64x64xf32>
    %242 = arith.addf %240, %241 : vector<64x64xf32>
    %243 = arith.addf %242, %104 : vector<64x64xf32>
    %c320 = arith.constant 320 : index
    %c0_80 = arith.constant 0 : index
    %244 = vector.load %arg2[%c320, %c0_80] : memref<424x128xbf16, #tpu.memory_space<vmem>>, vector<64x64xbf16>
    %c0_81 = arith.constant 0 : index
    %c1024 = arith.constant 1024 : index
    %245 = vector.load %arg3[%c0_81, %c1024] : memref<1x1536xf32, #tpu.memory_space<vmem>>, vector<1x64xf32>
    %246 = arith.truncf %243 : vector<64x64xf32> to vector<64x64xbf16>
    %cst_82 = arith.constant dense<0.000000e+00> : vector<64x64xf32>
    %247 = tpu.matmul %246, %244, %cst_82 {dimension_numbers = #tpu.dot_dimension_numbers<[1], [0], [0], [1], [0, 0, 1, 1], [], []>} : vector<64x64xbf16>, vector<64x64xbf16>, vector<64x64xf32> -> vector<64x64xf32>
    %248 = vector.broadcast %245 : vector<1x64xf32> to vector<64x64xf32>
    %249 = arith.addf %247, %248 : vector<64x64xf32>
    %cst_83 = arith.constant 0.000000e+00 : f32
    %250 = vector.broadcast %cst_83 : f32 to vector<64x64xf32>
    %251 = arith.maximumf %249, %250 : vector<64x64xf32>
    %252 = arith.truncf %251 : vector<64x64xf32> to vector<64x64xbf16>
    %cst_84 = arith.constant dense<0.000000e+00> : vector<64x64xf32>
    %253 = tpu.matmul %252, %244, %cst_84 {dimension_numbers = #tpu.dot_dimension_numbers<[1], [0], [0], [1], [0, 0, 1, 1], [], []>} : vector<64x64xbf16>, vector<64x64xbf16>, vector<64x64xf32> -> vector<64x64xf32>
    %254 = vector.broadcast %245 : vector<1x64xf32> to vector<64x64xf32>
    %255 = arith.addf %253, %254 : vector<64x64xf32>
    %cst_85 = arith.constant 0.000000e+00 : f32
    %256 = vector.broadcast %cst_85 : f32 to vector<64x64xf32>
    %257 = arith.maximumf %255, %256 : vector<64x64xf32>
    %258 = arith.addf %249, %257 : vector<64x64xf32>
    %c0_86 = arith.constant 0 : index
    %c1152 = arith.constant 1152 : index
    %259 = vector.load %arg3[%c0_86, %c1152] : memref<1x1536xf32, #tpu.memory_space<vmem>>, vector<1x32xf32>
    %c0_87 = arith.constant 0 : index
    %c0_88 = arith.constant 0 : index
    %260 = vector.load %arg5[%c0_87, %c0_88] : memref<64x512xbf16, #tpu.memory_space<vmem>>, vector<64x512xbf16>
    %261 = arith.truncf %258 : vector<64x64xf32> to vector<64x64xbf16>
    %cst_89 = arith.constant dense<0.000000e+00> : vector<64x512xf32>
    %262 = tpu.matmul %261, %260, %cst_89 {dimension_numbers = #tpu.dot_dimension_numbers<[1], [0], [0], [1], [0, 0, 1, 1], [], []>} : vector<64x64xbf16>, vector<64x512xbf16>, vector<64x512xf32> -> vector<64x512xf32>
    %263 = tpu.iota {dimensions = array<i32: 0>} : vector<64x1xi32>
    %c8_i32 = arith.constant 8 : i32
    %c0_i32_90 = arith.constant 0 : i32
    %264 = arith.cmpi eq, %c8_i32, %c0_i32_90 : i32
    %c1_i32_91 = arith.constant 1 : i32
    %265 = arith.select %264, %c1_i32_91, %c8_i32 : i32
    %266 = vector.broadcast %265 : i32 to vector<64x1xi32>
    %267 = arith.remsi %263, %266 : vector<64x1xi32>
    %c0_i32_92 = arith.constant 0 : i32
    %268 = vector.broadcast %c0_i32_92 : i32 to vector<64x1xi32>
    %269 = arith.cmpi ne, %267, %268 : vector<64x1xi32>
    %c0_i32_93 = arith.constant 0 : i32
    %270 = vector.broadcast %c0_i32_93 : i32 to vector<64x1xi32>
    %271 = arith.cmpi slt, %267, %270 : vector<64x1xi32>
    %c0_i32_94 = arith.constant 0 : i32
    %272 = arith.cmpi slt, %265, %c0_i32_94 : i32
    %273 = vector.broadcast %272 : i1 to vector<64x1xi1>
    %274 = vector.broadcast %273 : vector<64x1xi1> to vector<64x1xi1>
    %275 = arith.xori %271, %274 : vector<64x1xi1>
    %276 = arith.andi %275, %269 : vector<64x1xi1>
    %277 = vector.broadcast %265 : i32 to vector<64x1xi32>
    %278 = arith.addi %267, %277 : vector<64x1xi32>
    %279 = arith.select %276, %278, %267 : vector<64x1xi1>, vector<64x1xi32>
    %c0_i32_95 = arith.constant 0 : i32
    %280 = vector.broadcast %c0_i32_95 : i32 to vector<64x1xi32>
    %281 = arith.cmpi ne, %279, %280 : vector<64x1xi32>
    %282 = arith.extui %281 : vector<64x1xi1> to vector<64x1xi32>
    %283 = arith.sitofp %282 : vector<64x1xi32> to vector<64x1xf32>
    %c7_i32 = arith.constant 7 : i32
    %284 = vector.broadcast %c7_i32 : i32 to vector<64x1xi32>
    %285 = arith.cmpi ne, %279, %284 : vector<64x1xi32>
    %286 = arith.extui %285 : vector<64x1xi1> to vector<64x1xi32>
    %287 = arith.sitofp %286 : vector<64x1xi32> to vector<64x1xf32>
    %288 = vector.extract_strided_slice %262 {offsets = [0, 160], sizes = [64, 32], strides = [1, 1]} : vector<64x512xf32> to vector<64x32xf32>
    %289 = vector.extract_strided_slice %262 {offsets = [0, 224], sizes = [64, 32], strides = [1, 1]} : vector<64x512xf32> to vector<64x32xf32>
    %cst_96 = arith.constant 0.000000e+00 : f32
    %290 = vector.broadcast %cst_96 : f32 to vector<1x32xf32>
    %291 = vector.extract_strided_slice %289 {offsets = [0, 0], sizes = [63, 32], strides = [1, 1]} : vector<64x32xf32> to vector<63x32xf32>
    %292 = tpu.concatenate %290, %291 in 0 : vector<1x32xf32>, vector<63x32xf32> -> vector<64x32xf32>
    %293 = vector.broadcast %283 : vector<64x1xf32> to vector<64x32xf32>
    %294 = arith.mulf %292, %293 : vector<64x32xf32>
    %295 = arith.addf %288, %294 : vector<64x32xf32>
    %296 = vector.extract_strided_slice %262 {offsets = [0, 416], sizes = [64, 32], strides = [1, 1]} : vector<64x512xf32> to vector<64x32xf32>
    %297 = vector.extract_strided_slice %262 {offsets = [0, 480], sizes = [64, 32], strides = [1, 1]} : vector<64x512xf32> to vector<64x32xf32>
    %cst_97 = arith.constant 0.000000e+00 : f32
    %298 = vector.broadcast %cst_97 : f32 to vector<1x32xf32>
    %299 = vector.extract_strided_slice %297 {offsets = [0, 0], sizes = [63, 32], strides = [1, 1]} : vector<64x32xf32> to vector<63x32xf32>
    %300 = tpu.concatenate %298, %299 in 0 : vector<1x32xf32>, vector<63x32xf32> -> vector<64x32xf32>
    %301 = vector.broadcast %283 : vector<64x1xf32> to vector<64x32xf32>
    %302 = arith.mulf %300, %301 : vector<64x32xf32>
    %303 = arith.addf %296, %302 : vector<64x32xf32>
    %cst_98 = arith.constant 0.000000e+00 : f32
    %304 = vector.broadcast %cst_98 : f32 to vector<8x32xf32>
    %305 = vector.extract_strided_slice %303 {offsets = [0, 0], sizes = [56, 32], strides = [1, 1]} : vector<64x32xf32> to vector<56x32xf32>
    %306 = tpu.concatenate %304, %305 in 0 : vector<8x32xf32>, vector<56x32xf32> -> vector<64x32xf32>
    %307 = arith.addf %295, %306 : vector<64x32xf32>
    %308 = vector.extract_strided_slice %262 {offsets = [0, 192], sizes = [64, 32], strides = [1, 1]} : vector<64x512xf32> to vector<64x32xf32>
    %309 = vector.extract_strided_slice %262 {offsets = [0, 128], sizes = [64, 32], strides = [1, 1]} : vector<64x512xf32> to vector<64x32xf32>
    %cst_99 = arith.constant 0.000000e+00 : f32
    %310 = vector.broadcast %cst_99 : f32 to vector<1x32xf32>
    %311 = vector.extract_strided_slice %309 {offsets = [1, 0], sizes = [63, 32], strides = [1, 1]} : vector<64x32xf32> to vector<63x32xf32>
    %312 = tpu.concatenate %311, %310 in 0 : vector<63x32xf32>, vector<1x32xf32> -> vector<64x32xf32>
    %313 = vector.broadcast %287 : vector<64x1xf32> to vector<64x32xf32>
    %314 = arith.mulf %312, %313 : vector<64x32xf32>
    %315 = arith.addf %308, %314 : vector<64x32xf32>
    %316 = vector.extract_strided_slice %262 {offsets = [0, 448], sizes = [64, 32], strides = [1, 1]} : vector<64x512xf32> to vector<64x32xf32>
    %317 = vector.extract_strided_slice %262 {offsets = [0, 384], sizes = [64, 32], strides = [1, 1]} : vector<64x512xf32> to vector<64x32xf32>
    %cst_100 = arith.constant 0.000000e+00 : f32
    %318 = vector.broadcast %cst_100 : f32 to vector<1x32xf32>
    %319 = vector.extract_strided_slice %317 {offsets = [1, 0], sizes = [63, 32], strides = [1, 1]} : vector<64x32xf32> to vector<63x32xf32>
    %320 = tpu.concatenate %319, %318 in 0 : vector<63x32xf32>, vector<1x32xf32> -> vector<64x32xf32>
    %321 = vector.broadcast %287 : vector<64x1xf32> to vector<64x32xf32>
    %322 = arith.mulf %320, %321 : vector<64x32xf32>
    %323 = arith.addf %316, %322 : vector<64x32xf32>
    %cst_101 = arith.constant 0.000000e+00 : f32
    %324 = vector.broadcast %cst_101 : f32 to vector<8x32xf32>
    %325 = vector.extract_strided_slice %323 {offsets = [0, 0], sizes = [56, 32], strides = [1, 1]} : vector<64x32xf32> to vector<56x32xf32>
    %326 = tpu.concatenate %324, %325 in 0 : vector<8x32xf32>, vector<56x32xf32> -> vector<64x32xf32>
    %327 = arith.addf %315, %326 : vector<64x32xf32>
    %328 = vector.extract_strided_slice %262 {offsets = [0, 288], sizes = [64, 32], strides = [1, 1]} : vector<64x512xf32> to vector<64x32xf32>
    %329 = vector.extract_strided_slice %262 {offsets = [0, 352], sizes = [64, 32], strides = [1, 1]} : vector<64x512xf32> to vector<64x32xf32>
    %cst_102 = arith.constant 0.000000e+00 : f32
    %330 = vector.broadcast %cst_102 : f32 to vector<1x32xf32>
    %331 = vector.extract_strided_slice %329 {offsets = [0, 0], sizes = [63, 32], strides = [1, 1]} : vector<64x32xf32> to vector<63x32xf32>
    %332 = tpu.concatenate %330, %331 in 0 : vector<1x32xf32>, vector<63x32xf32> -> vector<64x32xf32>
    %333 = vector.broadcast %283 : vector<64x1xf32> to vector<64x32xf32>
    %334 = arith.mulf %332, %333 : vector<64x32xf32>
    %335 = arith.addf %328, %334 : vector<64x32xf32>
    %336 = vector.extract_strided_slice %262 {offsets = [0, 32], sizes = [64, 32], strides = [1, 1]} : vector<64x512xf32> to vector<64x32xf32>
    %337 = vector.extract_strided_slice %262 {offsets = [0, 96], sizes = [64, 32], strides = [1, 1]} : vector<64x512xf32> to vector<64x32xf32>
    %cst_103 = arith.constant 0.000000e+00 : f32
    %338 = vector.broadcast %cst_103 : f32 to vector<1x32xf32>
    %339 = vector.extract_strided_slice %337 {offsets = [0, 0], sizes = [63, 32], strides = [1, 1]} : vector<64x32xf32> to vector<63x32xf32>
    %340 = tpu.concatenate %338, %339 in 0 : vector<1x32xf32>, vector<63x32xf32> -> vector<64x32xf32>
    %341 = vector.broadcast %283 : vector<64x1xf32> to vector<64x32xf32>
    %342 = arith.mulf %340, %341 : vector<64x32xf32>
    %343 = arith.addf %336, %342 : vector<64x32xf32>
    %cst_104 = arith.constant 0.000000e+00 : f32
    %344 = vector.broadcast %cst_104 : f32 to vector<8x32xf32>
    %345 = vector.extract_strided_slice %343 {offsets = [8, 0], sizes = [56, 32], strides = [1, 1]} : vector<64x32xf32> to vector<56x32xf32>
    %346 = tpu.concatenate %345, %344 in 0 : vector<56x32xf32>, vector<8x32xf32> -> vector<64x32xf32>
    %347 = arith.addf %335, %346 : vector<64x32xf32>
    %348 = vector.extract_strided_slice %262 {offsets = [0, 320], sizes = [64, 32], strides = [1, 1]} : vector<64x512xf32> to vector<64x32xf32>
    %349 = vector.extract_strided_slice %262 {offsets = [0, 256], sizes = [64, 32], strides = [1, 1]} : vector<64x512xf32> to vector<64x32xf32>
    %cst_105 = arith.constant 0.000000e+00 : f32
    %350 = vector.broadcast %cst_105 : f32 to vector<1x32xf32>
    %351 = vector.extract_strided_slice %349 {offsets = [1, 0], sizes = [63, 32], strides = [1, 1]} : vector<64x32xf32> to vector<63x32xf32>
    %352 = tpu.concatenate %351, %350 in 0 : vector<63x32xf32>, vector<1x32xf32> -> vector<64x32xf32>
    %353 = vector.broadcast %287 : vector<64x1xf32> to vector<64x32xf32>
    %354 = arith.mulf %352, %353 : vector<64x32xf32>
    %355 = arith.addf %348, %354 : vector<64x32xf32>
    %356 = vector.extract_strided_slice %262 {offsets = [0, 64], sizes = [64, 32], strides = [1, 1]} : vector<64x512xf32> to vector<64x32xf32>
    %357 = vector.extract_strided_slice %262 {offsets = [0, 0], sizes = [64, 32], strides = [1, 1]} : vector<64x512xf32> to vector<64x32xf32>
    %cst_106 = arith.constant 0.000000e+00 : f32
    %358 = vector.broadcast %cst_106 : f32 to vector<1x32xf32>
    %359 = vector.extract_strided_slice %357 {offsets = [1, 0], sizes = [63, 32], strides = [1, 1]} : vector<64x32xf32> to vector<63x32xf32>
    %360 = tpu.concatenate %359, %358 in 0 : vector<63x32xf32>, vector<1x32xf32> -> vector<64x32xf32>
    %361 = vector.broadcast %287 : vector<64x1xf32> to vector<64x32xf32>
    %362 = arith.mulf %360, %361 : vector<64x32xf32>
    %363 = arith.addf %356, %362 : vector<64x32xf32>
    %cst_107 = arith.constant 0.000000e+00 : f32
    %364 = vector.broadcast %cst_107 : f32 to vector<8x32xf32>
    %365 = vector.extract_strided_slice %363 {offsets = [8, 0], sizes = [56, 32], strides = [1, 1]} : vector<64x32xf32> to vector<56x32xf32>
    %366 = tpu.concatenate %365, %364 in 0 : vector<56x32xf32>, vector<8x32xf32> -> vector<64x32xf32>
    %367 = arith.addf %355, %366 : vector<64x32xf32>
    %368 = tpu.concatenate %307, %327, %347, %367 in 0 : vector<64x32xf32>, vector<64x32xf32>, vector<64x32xf32>, vector<64x32xf32> -> vector<256x32xf32>
    %c0_108 = arith.constant 0 : index
    %c0_109 = arith.constant 0 : index
    %369 = vector.load %arg7[%c0_108, %c0_109] : memref<256x256xbf16, #tpu.memory_space<vmem>>, vector<256x256xbf16>
    %370 = arith.truncf %368 : vector<256x32xf32> to vector<256x32xbf16>
    %cst_110 = arith.constant dense<0.000000e+00> : vector<256x32xf32>
    %371 = tpu.matmul %369, %370, %cst_110 {dimension_numbers = #tpu.dot_dimension_numbers<[1], [0], [0], [1], [0, 0, 1, 1], [], []>} : vector<256x256xbf16>, vector<256x32xbf16>, vector<256x32xf32> -> vector<256x32xf32>
    %372 = vector.broadcast %259 : vector<1x32xf32> to vector<256x32xf32>
    %373 = arith.addf %371, %372 : vector<256x32xf32>
    %374 = arith.addf %373, %44 : vector<256x32xf32>
    %c384_111 = arith.constant 384 : index
    %c0_112 = arith.constant 0 : index
    %375 = vector.load %arg2[%c384_111, %c0_112] : memref<424x128xbf16, #tpu.memory_space<vmem>>, vector<32x32xbf16>
    %c0_113 = arith.constant 0 : index
    %c1280 = arith.constant 1280 : index
    %376 = vector.load %arg3[%c0_113, %c1280] : memref<1x1536xf32, #tpu.memory_space<vmem>>, vector<1x32xf32>
    %377 = arith.truncf %374 : vector<256x32xf32> to vector<256x32xbf16>
    %cst_114 = arith.constant dense<0.000000e+00> : vector<256x32xf32>
    %378 = tpu.matmul %377, %375, %cst_114 {dimension_numbers = #tpu.dot_dimension_numbers<[1], [0], [0], [1], [0, 0, 1, 1], [], []>} : vector<256x32xbf16>, vector<32x32xbf16>, vector<256x32xf32> -> vector<256x32xf32>
    %379 = vector.broadcast %376 : vector<1x32xf32> to vector<256x32xf32>
    %380 = arith.addf %378, %379 : vector<256x32xf32>
    %cst_115 = arith.constant 0.000000e+00 : f32
    %381 = vector.broadcast %cst_115 : f32 to vector<256x32xf32>
    %382 = arith.maximumf %380, %381 : vector<256x32xf32>
    %383 = arith.truncf %382 : vector<256x32xf32> to vector<256x32xbf16>
    %cst_116 = arith.constant dense<0.000000e+00> : vector<256x32xf32>
    %384 = tpu.matmul %383, %375, %cst_116 {dimension_numbers = #tpu.dot_dimension_numbers<[1], [0], [0], [1], [0, 0, 1, 1], [], []>} : vector<256x32xbf16>, vector<32x32xbf16>, vector<256x32xf32> -> vector<256x32xf32>
    %385 = vector.broadcast %376 : vector<1x32xf32> to vector<256x32xf32>
    %386 = arith.addf %384, %385 : vector<256x32xf32>
    %cst_117 = arith.constant 0.000000e+00 : f32
    %387 = vector.broadcast %cst_117 : f32 to vector<256x32xf32>
    %388 = arith.maximumf %386, %387 : vector<256x32xf32>
    %389 = arith.addf %380, %388 : vector<256x32xf32>
    %c416 = arith.constant 416 : index
    %c0_118 = arith.constant 0 : index
    %390 = vector.load %arg2[%c416, %c0_118] : memref<424x128xbf16, #tpu.memory_space<vmem>>, vector<1x32xbf16>
    %391 = arith.truncf %389 : vector<256x32xf32> to vector<256x32xbf16>
    %cst_119 = arith.constant dense<0.000000e+00> : vector<1x256xf32>
    %392 = tpu.matmul %390, %391, %cst_119 {dimension_numbers = #tpu.dot_dimension_numbers<[1], [1], [0], [0], [0, 0, 1, 0], [], []>} : vector<1x32xbf16>, vector<256x32xbf16>, vector<1x256xf32> -> vector<1x256xf32>
    %c0_120 = arith.constant 0 : index
    %c1408 = arith.constant 1408 : index
    %393 = vector.load %arg3[%c0_120, %c1408] : memref<1x1536xf32, #tpu.memory_space<vmem>>, vector<1x1xf32>
    %394 = vector.broadcast %393 : vector<1x1xf32> to vector<1x256xf32>
    %395 = arith.addf %392, %394 : vector<1x256xf32>
    %c0_121 = arith.constant 0 : index
    %c0_122 = arith.constant 0 : index
    %c0_123 = arith.constant 0 : index
    %396 = vector.load %arg10[%c0_121, %c0_122, %c0_123] : memref<1x1x256xf32, #tpu.memory_space<vmem>>, vector<1x1x256xf32>
    %397 = vector.shape_cast %396 : vector<1x1x256xf32> to vector<1x256xf32>
    %398 = vector.shape_cast %395 : vector<1x256xf32> to vector<1x1x256xf32>
    tpu.vector_store %arg10[%c0_121, %c0_122, %c0_123], %398 {strides = array<i32>} : memref<1x1x256xf32, #tpu.memory_space<vmem>>, vector<1x1x256xf32>,
    return
  }
  func.func @transform_0(%arg0: i32) -> (i32, i32, i32) {
    %c0_i32 = arith.constant 0 : i32
    %c0_i32_0 = arith.constant 0 : i32
    %c0_i32_1 = arith.constant 0 : i32
    return %arg0, %c0_i32, %c0_i32_0 : i32, i32, i32
  }
  func.func @transform_1(%arg0: i32) -> (i32, i32) {
    %c0_i32 = arith.constant 0 : i32
    %c0_i32_0 = arith.constant 0 : i32
    %c0_i32_1 = arith.constant 0 : i32
    return %c0_i32, %c0_i32_0 : i32, i32
  }
  func.func @transform_2(%arg0: i32) -> (i32, i32) {
    %c0_i32 = arith.constant 0 : i32
    %c0_i32_0 = arith.constant 0 : i32
    %c0_i32_1 = arith.constant 0 : i32
    return %c0_i32, %c0_i32_0 : i32, i32
  }
  func.func @transform_3(%arg0: i32) -> (i32, i32) {
    %c0_i32 = arith.constant 0 : i32
    %c0_i32_0 = arith.constant 0 : i32
    %c0_i32_1 = arith.constant 0 : i32
    return %c0_i32, %c0_i32_0 : i32, i32
  }
  func.func @transform_4(%arg0: i32) -> (i32, i32) {
    %c0_i32 = arith.constant 0 : i32
    %c0_i32_0 = arith.constant 0 : i32
    %c0_i32_1 = arith.constant 0 : i32
    return %c0_i32, %c0_i32_0 : i32, i32
  }
  func.func @transform_5(%arg0: i32) -> (i32, i32) {
    %c0_i32 = arith.constant 0 : i32
    %c0_i32_0 = arith.constant 0 : i32
    %c0_i32_1 = arith.constant 0 : i32
    return %c0_i32, %c0_i32_0 : i32, i32
  }
  func.func @transform_6(%arg0: i32) -> (i32, i32) {
    %c0_i32 = arith.constant 0 : i32
    %c0_i32_0 = arith.constant 0 : i32
    %c0_i32_1 = arith.constant 0 : i32
    return %c0_i32, %c0_i32_0 : i32, i32
  }
  func.func @transform_7(%arg0: i32) -> (i32, i32) {
    %c0_i32 = arith.constant 0 : i32
    %c0_i32_0 = arith.constant 0 : i32
    %c0_i32_1 = arith.constant 0 : i32
    return %c0_i32, %c0_i32_0 : i32, i32
  }
  func.func @transform_8(%arg0: i32) -> (i32, i32) {
    %c0_i32 = arith.constant 0 : i32
    %c0_i32_0 = arith.constant 0 : i32
    %c0_i32_1 = arith.constant 0 : i32
    return %c0_i32, %c0_i32_0 : i32, i32
  }
  func.func @transform_9(%arg0: i32) -> (i32, i32, i32) {
    %c0_i32 = arith.constant 0 : i32
    %c0_i32_0 = arith.constant 0 : i32
    %c0_i32_1 = arith.constant 0 : i32
    return %arg0, %c0_i32, %c0_i32_0 : i32, i32, i32
  }
}

</mosaic_0001>

<bundles_post_ra>
// kernel: refnet_forward.1
= control target key start
LH: loop header
LB: loop body
LE: loop exit
PB: predicated region body
PF: predicated region fallthrough
CT: control target
= control target key end

     0   :  { %s7756_s30 = smov 0   ;;  %s10635_s0 = inlined_call_operand.vmem [shape: f32[2,256,4], index: 0, kind: input, shape index: {}]   ;;  %s10636_s1 = inlined_call_operand.vmem [shape: bf16[424,128], index: 1, kind: input, shape index: {}]   ;;  %s10637_s2 = inlined_call_operand.vmem [shape: f32[1,1536], index: 2, kind: input, shape index: {}]   ;;  %s10638_s3 = inlined_call_operand.vmem [shape: bf16[128,1024], index: 3, kind: input, shape index: {}]   ;;  %s10639_s4 = inlined_call_operand.vmem [shape: bf16[64,512], index: 4, kind: input, shape index: {}]   ;;  %s10640_s5 = inlined_call_operand.vmem [shape: bf16[64,64], index: 5, kind: input, shape index: {}]   ;;  %s10641_s6 = inlined_call_operand.vmem [shape: bf16[256,256], index: 6, kind: input, shape index: {}]   ;;  %s10642_s7 = inlined_call_operand.vmem [shape: bf16[256,256], index: 7, kind: input, shape index: {}]   ;;  %s10643_s8 = inlined_call_operand.vmem [shape: bf16[64,64], index: 8, kind: input, shape index: {}]   ;;  %s10644_s9 = inlined_call_operand.vmem [shape: f32[2,1,256], index: 9, kind: output, shape index: {}]  }
   0x1 LB: > { %s6346_s10 = sadd.s32 4294967295, %s7696_s30   ;;  %p6350_p0 = scmp.ge.s32.totalorder %s7696_s30, 1  ;;  %s7696_s30 = sphi %s7756_s30, %s19_s30  }
   0x2   : > { %p287_p1 = scmp.lt.s32.totalorder %s7696_s30, 3 }
   0x4   : > { %p288_p2 = pnand %p6350_p0, %p287_p1 }
   0x6   : > { %291 = sbr.rel (%p288_p2) target bundleno = 6393 (0x18f9), region = 56 }
   0xd   : > { %v364_v0 = vld [vmem:[%s10636_s1] sm:$0x3]  ;;  %vm438_vm0 = vcmask 1041408   ;;  %p322_p3 = scmp.lt.s32.totalorder %s6346_s10, 1  ;;  %vm389_vm1 = vcmask 31744   ;;  %vm700_vm2 = vcmask 1043456  }
   0xe   : > { %7451 = vmatprep.subr.msk.bf16.mxu0 %vm438_vm0, %v364_v0  ;;  %v440_v1 = vsel %vm438_vm0, %v364_v0, 0  ;;  %v365_v50 = vld [vmem:[%s10636_s1 + $0x4] sm:$0xf]  ;;  %v7833_v52 = vld [vmem:[%s10637_s2] ss:$0 sm:$0xff]  ;;  %vm651_vm3 = vcmask 64512  }
   0xf   : > { %7094 = vmatpush3.bf16.msra.mxu0 %v440_v1  ;;  %s10904_s10 = smov (!%p322_p3, %s6346_s10), 1  ;;  %7452 = vmatprep.subr.msk.bf16.mxu1 %vm700_vm2, %v365_v50  ;;  %v702_v51 = vsel %vm700_vm2, %v365_v50, 0  ;;  %vm7699_vm4 = vmmov 0   ;;  %vm1057_vm5 = vcmask 1040384   ;;  %s7700_s25 = smov 124   ;;  %vm1053_vm6 = vcmask 15360  }
  0x10   : > { %s6689_s13 = sshll.u32 %s10904_s10, 8  ;;  %7128 = vmatpush3.bf16.msra.mxu1 %v702_v51  ;;  %vm1960_vm7 = vcmask 261120   ;;  %vm2074_vm8 = vcmask 523264   ;;  %s7701_s21 = smov 96   ;;  %vm2266_vm9 = vcmask 130048   ;;  %vm3376_vm12 = vcmask 1046528  }
  0x11   : > { %s7775_s16 = scalar_lea.vmem %s10635_s0, %s6689_s13  ;;  %s7703_s17 = smov 64  }
  0x12   : > { %v332_v2 = vld [vmem:[%s7775_s16] sm:$0xff]  ;;  %v333_v3 = vld [vmem:[%s7775_s16 + $0x8] sm:$0xff]  ;;  %v334_v4 = vld [vmem:[%s7775_s16 + $0x10] sm:$0xff]  ;;  %s7704_s22 = smov 32  }
  0x13   : > { %v367_v5 = vpack.c.bf16 %v333_v3, %v332_v2  ;;  %v335_v6 = vld [vmem:[%s7775_s16 + $0x18] sm:$0xff]  ;;  %v336_v7 = vld [vmem:[%s7775_s16 + $0x20] sm:$0xff]  ;;  %v337_v8 = vld [vmem:[%s7775_s16 + $0x28] sm:$0xff] }
  0x14   : > { %v368_v9 = vpack.c.bf16 %v335_v6, %v334_v4  ;;  %v369_v10 = vpack.c.bf16 %v337_v8, %v336_v7  ;;  %v338_v11 = vld [vmem:[%s7775_s16 + $0x30] sm:$0xff]  ;;  %v339_v12 = vld [vmem:[%s7775_s16 + $0x38] sm:$0xff]  ;;  %v340_v13 = vld [vmem:[%s7775_s16 + $0x40] sm:$0xff] }
  0x15   : > { %7095 = vmatprep.mubr.msk.bf16.mxu0 %vm389_vm1, %v367_v5  ;;  %v341_v14 = vld [vmem:[%s7775_s16 + $0x48] sm:$0xff]  ;;  %v370_v15 = vpack.c.bf16 %v339_v12, %v338_v11  ;;  %v342_v17 = vld [vmem:[%s7775_s16 + $0x50] sm:$0xff]  ;;  %v343_v18 = vld [vmem:[%s7775_s16 + $0x58] sm:$0xff] }
  0x16   : > { %7096 = vmatmul.mubr.msk.bf16.vlgmr.msra.gmra.mrb[0].mxu0 %vm389_vm1, %v368_v9  ;;  %v371_v16 = vpack.c.bf16 %v341_v14, %v340_v13  ;;  %v344_v19 = vld [vmem:[%s7775_s16 + $0x60] sm:$0xff]  ;;  %v345_v20 = vld [vmem:[%s7775_s16 + $0x68] sm:$0xff]  ;;  %v372_v21 = vpack.c.bf16 %v343_v18, %v342_v17  ;;  %v346_v23 = vld [vmem:[%s7775_s16 + $0x70] sm:$0xff] }
  0x17   : > { %7099 = vmatprep.mubr.msk.bf16.mxu0 %vm389_vm1, %v369_v10  ;;  %v373_v22 = vpack.c.bf16 %v345_v20, %v344_v19  ;;  %v347_v24 = vld [vmem:[%s7775_s16 + $0x78] sm:$0xff]  ;;  %v348_v25 = vld [vmem:[%s7775_s16 + $0x80] sm:$0xff]  ;;  %v349_v26 = vld [vmem:[%s7775_s16 + $0x88] sm:$0xff] }
  0x18   : > { %v374_v27 = vpack.c.bf16 %v347_v24, %v346_v23  ;;  %v375_v28 = vpack.c.bf16 %v349_v26, %v348_v25  ;;  %v350_v29 = vld [vmem:[%s7775_s16 + $0x90] sm:$0xff]  ;;  %v351_v30 = vld [vmem:[%s7775_s16 + $0x98] sm:$0xff]  ;;  %v352_v31 = vld [vmem:[%s7775_s16 + $0xa0] sm:$0xff] }
  0x19   : > { %v353_v32 = vld [vmem:[%s7775_s16 + $0xa8] sm:$0xff]  ;;  %v376_v33 = vpack.c.bf16 %v351_v30, %v350_v29  ;;  %v354_v35 = vld [vmem:[%s7775_s16 + $0xb0] sm:$0xff]  ;;  %v355_v36 = vld [vmem:[%s7775_s16 + $0xb8] sm:$0xff] }
  0x1a   : > { %v377_v34 = vpack.c.bf16 %v353_v32, %v352_v31  ;;  %v356_v37 = vld [vmem:[%s7775_s16 + $0xc0] sm:$0xff]  ;;  %v357_v38 = vld [vmem:[%s7775_s16 + $0xc8] sm:$0xff]  ;;  %v378_v39 = vpack.c.bf16 %v355_v36, %v354_v35  ;;  %v358_v41 = vld [vmem:[%s7775_s16 + $0xd0] sm:$0xff] }
  0x1b   : > { %v379_v40 = vpack.c.bf16 %v357_v38, %v356_v37  ;;  %v359_v42 = vld [vmem:[%s7775_s16 + $0xd8] sm:$0xff]  ;;  %v360_v43 = vld [vmem:[%s7775_s16 + $0xe0] sm:$0xff]  ;;  %v361_v44 = vld [vmem:[%s7775_s16 + $0xe8] sm:$0xff] }
  0x1c   : > { %v380_v45 = vpack.c.bf16 %v359_v42, %v358_v41  ;;  %v381_v46 = vpack.c.bf16 %v361_v44, %v360_v43  ;;  %v362_v47 = vld [vmem:[%s7775_s16 + $0xf0] sm:$0xff]  ;;  %v363_v48 = vld [vmem:[%s7775_s16 + $0xf8] sm:$0xff] }
  0x1d   : > { %v382_v49 = vpack.c.bf16 %v363_v48, %v362_v47 }
  0x1e   : > { %7100 = vmatmul.mubr.msk.bf16.gmra.mrb[4].mxu0 %vm389_vm1, %v370_v15 }
  0x1f   : > { %7103 = vmatprep.mubr.msk.bf16.mxu0 %vm389_vm1, %v371_v16 }
  0x26   : > { %7104 = vmatmul.mubr.msk.bf16.gmra.mrb[8].mxu0 %vm389_vm1, %v372_v21 }
  0x27   : > { %7107 = vmatprep.mubr.msk.bf16.mxu0 %vm389_vm1, %v373_v22 }
  0x2e   : > { %7108 = vmatmul.mubr.msk.bf16.gmra.mrb[12].mxu0 %vm389_vm1, %v374_v27 }
  0x2f   : > { %7111 = vmatprep.mubr.msk.bf16.mxu0 %vm389_vm1, %v375_v28 }
  0x36   : > { %7112 = vmatmul.mubr.msk.bf16.gmra.mrb[16].mxu0 %vm389_vm1, %v376_v33 }
  0x37   : > { %7115 = vmatprep.mubr.msk.bf16.mxu0 %vm389_vm1, %v377_v34 }
  0x3e   : > { %7116 = vmatmul.mubr.msk.bf16.gmra.mrb[20].mxu0 %vm389_vm1, %v378_v39 }
  0x3f   : > { %7119 = vmatprep.mubr.msk.bf16.mxu0 %vm389_vm1, %v379_v40 }
  0x46   : > { %7120 = vmatmul.mubr.msk.bf16.gmra.mrb[24].mxu0 %vm389_vm1, %v380_v45 }
  0x47   : > { %7123 = vmatprep.mubr.msk.bf16.mxu0 %vm389_vm1, %v381_v46 }
  0x4e   : > { %7124 = vmatmul.mubr.msk.bf16.gmra.mrb[28].mxu0 %vm389_vm1, %v382_v49 }
  0xe9   : > { %v7097_v53 = vpop.f32.mrb[0].mxu0 }
  0xea   : > { %v476_v54 = vpop.f32.mrb[1].mxu0  ;;  %v7839_v57 = vadd.f32 %v7097_v53, %v7833_v52 }
  0xeb   : > { %v7836_v55 = vadd.f32 %v7833_v52, %v476_v54  ;;  %v7098_v56 = vpop.f32.mrb[2].mxu0 }
  0xec   : > { %v7842_v58 = vadd.f32 %v7098_v56, %v7833_v52  ;;  %v479_v59 = vpop.f32.mrb[3].mxu0  ;;  %v605_v0 = vmax.f32 %v7839_v57, 0.0 }
  0xed   : > { %v7845_v60 = vadd.f32 %v7833_v52, %v479_v59  ;;  %v603_v62 = vmax.f32 %v7836_v55, 0.0 }
  0xee   : > { %v606_v61 = vmax.f32 %v7842_v58, 0.0 }
  0xef   : > { %v604_v63 = vmax.f32 %v7845_v60, 0.0 }
  0xf0   : > { %v636_v3 = vpack.c.bf16 %v606_v61, %v605_v0 }
  0xf1   : > { %v7101_v1 = vpop.f32.mrb[4].mxu0  ;;  %v635_v2 = vpack.c.bf16 %v604_v63, %v603_v62 }
  0xf2   : > { %v492_v4 = vpop.f32.mrb[5].mxu0  ;;  %v7856_v7 = vadd.f32 %v7101_v1, %v7833_v52 }
  0xf3   : > { %v7852_v5 = vadd.f32 %v7833_v52, %v492_v4  ;;  %v7102_v6 = vpop.f32.mrb[6].mxu0  ;;  %7129 = vmatprep.mubr.msk.bf16.mxu1 %vm651_vm3, %v635_v2 }
  0xf4   : > { %v7859_v8 = vadd.f32 %v7102_v6, %v7833_v52  ;;  %v495_v9 = vpop.f32.mrb[7].mxu0  ;;  %7130 = vmatmul.mubr.msk.bf16.vlgmr.msra.gmra.mrb[0].mxu1 %vm651_vm3, %v636_v3  ;;  %v609_v14 = vmax.f32 %v7856_v7, 0.0 }
  0xf5   : > { %v7863_v10 = vadd.f32 %v7833_v52, %v495_v9  ;;  %v607_v12 = vmax.f32 %v7852_v5, 0.0 }
  0xf6   : > { %v610_v11 = vmax.f32 %v7859_v8, 0.0 }
  0xf7   : > { %v608_v13 = vmax.f32 %v7863_v10, 0.0 }
  0xf8   : > { %v638_v17 = vpack.c.bf16 %v610_v11, %v609_v14 }
  0xf9   : > { %v637_v15 = vpack.c.bf16 %v608_v13, %v607_v12  ;;  %v7105_v16 = vpop.f32.mrb[8].mxu0 }
  0xfa   : > { %v508_v18 = vpop.f32.mrb[9].mxu0  ;;  %v7874_v21 = vadd.f32 %v7105_v16, %v7833_v52 }
  0xfb   : > { %v7870_v19 = vadd.f32 %v7833_v52, %v508_v18  ;;  %v7106_v20 = vpop.f32.mrb[10].mxu0  ;;  %7133 = vmatprep.mubr.msk.bf16.mxu1 %vm651_vm3, %v637_v15 }
  0xfc   : > { %v7877_v22 = vadd.f32 %v7106_v20, %v7833_v52  ;;  %v511_v23 = vpop.f32.mrb[11].mxu0  ;;  %7134 = vmatmul.mubr.msk.bf16.gmra.mrb[4].mxu1 %vm651_vm3, %v638_v17  ;;  %v613_v28 = vmax.f32 %v7874_v21, 0.0 }
  0xfd   : > { %v7881_v24 = vadd.f32 %v7833_v52, %v511_v23  ;;  %v611_v26 = vmax.f32 %v7870_v19, 0.0 }
  0xfe   : > { %v614_v25 = vmax.f32 %v7877_v22, 0.0 }
  0xff   : > { %v612_v27 = vmax.f32 %v7881_v24, 0.0 }
 0x100   : > { %v640_v31 = vpack.c.bf16 %v614_v25, %v613_v28 }
 0x101   : > { %v639_v29 = vpack.c.bf16 %v612_v27, %v611_v26  ;;  %v7109_v30 = vpop.f32.mrb[12].mxu0 }
 0x102   : > { %v524_v32 = vpop.f32.mrb[13].mxu0  ;;  %v7892_v35 = vadd.f32 %v7109_v30, %v7833_v52 }
 0x103   : > { %v7888_v33 = vadd.f32 %v7833_v52, %v524_v32  ;;  %v7110_v34 = vpop.f32.mrb[14].mxu0  ;;  %7137 = vmatprep.mubr.msk.bf16.mxu1 %vm651_vm3, %v639_v29 }
 0x104   : > { %v7895_v36 = vadd.f32 %v7110_v34, %v7833_v52  ;;  %v527_v37 = vpop.f32.mrb[15].mxu0  ;;  %7138 = vmatmul.mubr.msk.bf16.gmra.mrb[8].mxu1 %vm651_vm3, %v640_v31  ;;  %v617_v42 = vmax.f32 %v7892_v35, 0.0 }
 0x105   : > { %v7899_v38 = vadd.f32 %v7833_v52, %v527_v37  ;;  %v615_v40 = vmax.f32 %v7888_v33, 0.0 }
 0x106   : > { %v618_v39 = vmax.f32 %v7895_v36, 0.0 }
 0x107   : > { %v616_v41 = vmax.f32 %v7899_v38, 0.0 }
 0x108   : > { %v642_v45 = vpack.c.bf16 %v618_v39, %v617_v42 }
 0x109   : > { %v641_v43 = vpack.c.bf16 %v616_v41, %v615_v40  ;;  %v7113_v44 = vpop.f32.mrb[16].mxu0 }
 0x10a   : > { %v540_v46 = vpop.f32.mrb[17].mxu0  ;;  %v7910_v49 = vadd.f32 %v7113_v44, %v7833_v52 }
 0x10b   : > { %v7906_v47 = vadd.f32 %v7833_v52, %v540_v46  ;;  %v7114_v48 = vpop.f32.mrb[18].mxu0  ;;  %7141 = vmatprep.mubr.msk.bf16.mxu1 %vm651_vm3, %v641_v43 }
 0x10c   : > { %v7913_v50 = vadd.f32 %v7114_v48, %v7833_v52  ;;  %v543_v51 = vpop.f32.mrb[19].mxu0  ;;  %7142 = vmatmul.mubr.msk.bf16.gmra.mrb[12].mxu1 %vm651_vm3, %v642_v45  ;;  %v621_v61 = vmax.f32 %v7910_v49, 0.0 }
 0x10d   : > { %v7917_v53 = vadd.f32 %v7833_v52, %v543_v51  ;;  %v619_v56 = vmax.f32 %v7906_v47, 0.0 }
 0x10e   : > { %v622_v54 = vmax.f32 %v7913_v50, 0.0 }
 0x10f   : > { %v620_v59 = vmax.f32 %v7917_v53, 0.0 }
 0x110   : > { %v644_v0 = vpack.c.bf16 %v622_v54, %v621_v61 }
 0x111   : > { %v643_v62 = vpack.c.bf16 %v620_v59, %v619_v56  ;;  %v7117_v63 = vpop.f32.mrb[20].mxu0 }
 0x112   : > { %v556_v1 = vpop.f32.mrb[21].mxu0  ;;  %v7928_v4 = vadd.f32 %v7117_v63, %v7833_v52  ;;  %v929_v63 = vld [vmem:[%s10636_s1 + $0x8] sm:$0x3] }
 0x113   : > { %v7924_v2 = vadd.f32 %v7833_v52, %v556_v1  ;;  %v7118_v3 = vpop.f32.mrb[22].mxu0  ;;  %7145 = vmatprep.mubr.msk.bf16.mxu1 %vm651_vm3, %v643_v62  ;;  %v1009_v1 = vsel %vm438_vm0, %v929_v63, 0 }
 0x114   : > { %v7931_v6 = vadd.f32 %v7118_v3, %v7833_v52  ;;  %v559_v9 = vpop.f32.mrb[23].mxu0  ;;  %7146 = vmatmul.mubr.msk.bf16.gmra.mrb[16].mxu1 %vm651_vm3, %v644_v0  ;;  %v625_v15 = vmax.f32 %v7928_v4, 0.0  ;;  %v10649_v0 = vmov 0.0  }
 0x115   : > { %v7935_v11 = vadd.f32 %v7833_v52, %v559_v9  ;;  %v623_v13 = vmax.f32 %v7924_v2, 0.0  ;;  %7161 = vmatprep.subr.bf16.mxu0 %v10649_v0  ;;  %7163 = vmatprep.mubr.msk.bf16.mxu0 %vm7699_vm4, %v10649_v0 }
 0x116   : > { %v626_v12 = vmax.f32 %v7931_v6, 0.0  ;;  %7162 = vmatpush3.bf16.msra.mxu0 %v1009_v1  ;;  %7167 = vmatprep.subr.bf16.mxu1 %v10649_v0 }
 0x117   : > { %v624_v14 = vmax.f32 %v7935_v11, 0.0 }
 0x118   : > { %v646_v18 = vpack.c.bf16 %v626_v12, %v625_v15 }
 0x119   : > { %v645_v16 = vpack.c.bf16 %v624_v14, %v623_v13  ;;  %v7121_v17 = vpop.f32.mrb[24].mxu0 }
 0x11a   : > { %v572_v20 = vpop.f32.mrb[25].mxu0  ;;  %v7946_v26 = vadd.f32 %v7121_v17, %v7833_v52 }
 0x11b   : > { %v7942_v23 = vadd.f32 %v7833_v52, %v572_v20  ;;  %v7122_v25 = vpop.f32.mrb[26].mxu0  ;;  %7149 = vmatprep.mubr.msk.bf16.mxu1 %vm651_vm3, %v645_v16 }
 0x11c   : > { %v7949_v27 = vadd.f32 %v7122_v25, %v7833_v52  ;;  %v575_v28 = vpop.f32.mrb[27].mxu0  ;;  %7150 = vmatmul.mubr.msk.bf16.gmra.mrb[20].mxu1 %vm651_vm3, %v646_v18  ;;  %v629_v34 = vmax.f32 %v7946_v26, 0.0 }
 0x11d   : > { %v7953_v29 = vadd.f32 %v7833_v52, %v575_v28  ;;  %v627_v31 = vmax.f32 %v7942_v23, 0.0 }
 0x11e   : > { %v630_v30 = vmax.f32 %v7949_v27, 0.0 }
 0x11f   : > { %v628_v32 = vmax.f32 %v7953_v29, 0.0 }
 0x120   : > { %v648_v40 = vpack.c.bf16 %v630_v30, %v629_v34 }
 0x121   : > { %v647_v37 = vpack.c.bf16 %v628_v32, %v627_v31  ;;  %v7125_v39 = vpop.f32.mrb[28].mxu0 }
 0x122   : > { %v588_v41 = vpop.f32.mrb[29].mxu0  ;;  %v7964_v44 = vadd.f32 %v7125_v39, %v7833_v52 }
 0x123   : > { %v7960_v42 = vadd.f32 %v7833_v52, %v588_v41  ;;  %v7126_v43 = vpop.f32.mrb[30].mxu0  ;;  %7153 = vmatprep.mubr.msk.bf16.mxu1 %vm651_vm3, %v647_v37 }
 0x124   : > { %v7967_v45 = vadd.f32 %v7126_v43, %v7833_v52  ;;  %v591_v46 = vpop.f32.mrb[31].mxu0  ;;  %7154 = vmatmul.mubr.msk.bf16.gmra.mrb[24].mxu1 %vm651_vm3, %v648_v40  ;;  %v633_v59 = vmax.f32 %v7964_v44, 0.0 }
 0x125   : > { %v7971_v48 = vadd.f32 %v7833_v52, %v591_v46  ;;  %v631_v54 = vmax.f32 %v7960_v42, 0.0 }
 0x126   : > { %v634_v51 = vmax.f32 %v7967_v45, 0.0 }
 0x127   : > { %v632_v56 = vmax.f32 %v7971_v48, 0.0 }
 0x128   : > { %v650_v62 = vpack.c.bf16 %v634_v51, %v633_v59 }
 0x129   : > { %v649_v61 = vpack.c.bf16 %v632_v56, %v631_v54 }
 0x12b   : > { %7157 = vmatprep.mubr.msk.bf16.mxu1 %vm651_vm3, %v649_v61 }
 0x12c   : > { %7158 = vmatmul.mubr.msk.bf16.gmra.mrb[28].mxu1 %vm651_vm3, %v650_v62 }
 0x12d   : > { %7169 = vmatprep.mubr.msk.bf16.mxu1 %vm7699_vm4, %v10649_v0 }
 0x1c7   : > { %v7131_v3 = vpop.f32.mrb[0].mxu1 }
 0x1c8   : > { %v747_v9 = vadd.f32 %v7131_v3, %v7833_v52  ;;  %v738_v12 = vpop.f32.mrb[1].mxu1 }
 0x1c9   : > { %v739_v13 = vadd.f32 %v7833_v52, %v738_v12  ;;  %v7132_v14 = vpop.f32.mrb[2].mxu1 }
 0x1ca   : > { %v750_v15 = vadd.f32 %v7132_v14, %v7833_v52  ;;  %v741_v16 = vpop.f32.mrb[3].mxu1  ;;  %v867_v17 = vmax.f32 %v747_v9, 0.0 }
 0x1cb   : > { %v865_v18 = vmax.f32 %v739_v13, 0.0  ;;  %v742_v20 = vadd.f32 %v7833_v52, %v741_v16 }
 0x1cc   : > { %v868_v28 = vmax.f32 %v750_v15, 0.0  ;;  %v7997_v31 = vadd.f32 %v867_v17, %v7839_v57 }
 0x1cd   : > { %v7994_v25 = vadd.f32 %v865_v18, %v7836_v55  ;;  %v866_v30 = vmax.f32 %v742_v20, 0.0 }
 0x1ce   : > { %v8006_v41 = vadd.f32 %v868_v28, %v7842_v58  ;;  %v936_v54 = vsel %vm389_vm1, %v7997_v31, 0.0 }
 0x1cf   : > { %v8000_v32 = vadd.f32 %v866_v30, %v7845_v60  ;;  %v7135_v34 = vpop.f32.mrb[4].mxu1  ;;  %v933_v40 = vsel %vm389_vm1, %v7994_v25, 0.0 }
 0x1d0   : > { %v763_v37 = vadd.f32 %v7135_v34, %v7833_v52  ;;  %v754_v39 = vpop.f32.mrb[5].mxu1  ;;  %v938_v58 = vsel %vm389_vm1, %v8006_v41, 0.0 }
 0x1d1   : > { %v934_v55 = vsel %vm389_vm1, %v8000_v32, 0.0  ;;  %v755_v43 = vadd.f32 %v7833_v52, %v754_v39  ;;  %v7136_v57 = vpop.f32.mrb[6].mxu1 }
 0x1d2   : > { %v935_v46 = vadd.f32 %v934_v55, %v933_v40  ;;  %v766_v60 = vadd.f32 %v7136_v57, %v7833_v52  ;;  %v757_v51 = vpop.f32.mrb[7].mxu1  ;;  %v871_v56 = vmax.f32 %v763_v37, 0.0 }
 0x1d3   : > { %v869_v59 = vmax.f32 %v755_v43, 0.0  ;;  %v758_v61 = vadd.f32 %v7833_v52, %v757_v51 }
 0x1d4   : > { %v937_v62 = vadd.f32 %v936_v54, %v935_v46  ;;  %v872_v1 = vmax.f32 %v766_v60, 0.0  ;;  %v8021_v12 = vadd.f32 %v871_v56, %v7856_v7 }
 0x1d5   : > { %v8018_v63 = vadd.f32 %v869_v59, %v7852_v5  ;;  %v870_v3 = vmax.f32 %v758_v61, 0.0 }
 0x1d6   : > { %v939_v9 = vadd.f32 %v938_v58, %v937_v62  ;;  %v8030_v5 = vadd.f32 %v872_v1, %v7859_v8  ;;  %v944_v39 = vsel %vm389_vm1, %v8021_v12, 0.0 }
 0x1d7   : > { %v940_v13 = vsel %vm389_vm1, %v8018_v63, 0.0  ;;  %v8026_v14 = vadd.f32 %v870_v3, %v7863_v10  ;;  %v7139_v15 = vpop.f32.mrb[8].mxu1 }
 0x1d8   : > { %v941_v16 = vadd.f32 %v940_v13, %v939_v9  ;;  %v779_v17 = vadd.f32 %v7139_v15, %v7833_v52  ;;  %v770_v18 = vpop.f32.mrb[9].mxu1  ;;  %v946_v8 = vsel %vm389_vm1, %v8030_v5, 0.0 }
 0x1d9   : > { %v942_v20 = vsel %vm389_vm1, %v8026_v14, 0.0  ;;  %v771_v7 = vadd.f32 %v7833_v52, %v770_v18  ;;  %v7140_v28 = vpop.f32.mrb[10].mxu1 }
 0x1da   : > { %v943_v30 = vadd.f32 %v942_v20, %v941_v16  ;;  %v875_v34 = vmax.f32 %v779_v17, 0.0  ;;  %v782_v37 = vadd.f32 %v7140_v28, %v7833_v52  ;;  %v773_v10 = vpop.f32.mrb[11].mxu1 }
 0x1db   : > { %v873_v40 = vmax.f32 %v771_v7, 0.0  ;;  %v774_v55 = vadd.f32 %v7833_v52, %v773_v10 }
 0x1dc   : > { %v945_v43 = vadd.f32 %v944_v39, %v943_v30  ;;  %v876_v46 = vmax.f32 %v782_v37, 0.0  ;;  %v8045_v51 = vadd.f32 %v875_v34, %v7874_v21 }
 0x1dd   : > { %v8042_v57 = vadd.f32 %v873_v40, %v7870_v19  ;;  %v874_v60 = vmax.f32 %v774_v55, 0.0 }
 0x1de   : > { %v947_v54 = vadd.f32 %v946_v8, %v945_v43  ;;  %v8054_v19 = vadd.f32 %v876_v46, %v7877_v22  ;;  %v952_v13 = vsel %vm389_vm1, %v8045_v51, 0.0  ;;  %v930_v22 = vld [vmem:[%s10636_s1 + $0xc] sm:$0x1] }
 0x1df   : > { %v948_v56 = vsel %vm389_vm1, %v8042_v57, 0.0  ;;  %v8050_v59 = vadd.f32 %v874_v60, %v7881_v24  ;;  %v7143_v61 = vpop.f32.mrb[12].mxu1  ;;  %v1059_v28 = vsel %vm1057_vm5, %v930_v22, 0 }
 0x1e0   : > { %v949_v62 = vadd.f32 %v948_v56, %v947_v54  ;;  %v795_v58 = vadd.f32 %v7143_v61, %v7833_v52  ;;  %v786_v1 = vpop.f32.mrb[13].mxu1  ;;  %v954_v30 = vsel %vm389_vm1, %v8054_v19, 0.0  ;;  %7168 = vmatpush3.bf16.msra.mxu1 %v1059_v28 }
 0x1e1   : > { %v950_v3 = vsel %vm389_vm1, %v8050_v59, 0.0  ;;  %v787_v21 = vadd.f32 %v7833_v52, %v786_v1  ;;  %v7144_v9 = vpop.f32.mrb[14].mxu1 }
 0x1e2   : > { %v951_v15 = vadd.f32 %v950_v3, %v949_v62  ;;  %v798_v24 = vadd.f32 %v7144_v9, %v7833_v52  ;;  %v789_v16 = vpop.f32.mrb[15].mxu1  ;;  %v879_v17 = vmax.f32 %v795_v58, 0.0 }
 0x1e3   : > { %v877_v18 = vmax.f32 %v787_v21, 0.0  ;;  %v790_v20 = vadd.f32 %v7833_v52, %v789_v16 }
 0x1e4   : > { %v953_v7 = vadd.f32 %v952_v13, %v951_v15  ;;  %v880_v37 = vmax.f32 %v798_v24, 0.0  ;;  %v8073_v40 = vadd.f32 %v879_v17, %v7892_v35 }
 0x1e5   : > { %v8070_v34 = vadd.f32 %v877_v18, %v7888_v33  ;;  %v878_v10 = vmax.f32 %v790_v20, 0.0 }
 0x1e6   : > { %v955_v39 = vadd.f32 %v954_v30, %v953_v7  ;;  %v8082_v33 = vadd.f32 %v880_v37, %v7895_v36  ;;  %v960_v3 = vsel %vm389_vm1, %v8073_v40, 0.0 }
 0x1e7   : > { %v956_v55 = vsel %vm389_vm1, %v8070_v34, 0.0  ;;  %v8078_v43 = vadd.f32 %v878_v10, %v7899_v38  ;;  %v7147_v8 = vpop.f32.mrb[16].mxu1 }
 0x1e8   : > { %v957_v46 = vadd.f32 %v956_v55, %v955_v39  ;;  %v811_v60 = vadd.f32 %v7147_v8, %v7833_v52  ;;  %v802_v54 = vpop.f32.mrb[17].mxu1  ;;  %v962_v15 = vsel %vm389_vm1, %v8082_v33, 0.0 }
 0x1e9   : > { %v958_v56 = vsel %vm389_vm1, %v8078_v43, 0.0  ;;  %v803_v35 = vadd.f32 %v7833_v52, %v802_v54  ;;  %v7148_v61 = vpop.f32.mrb[18].mxu1 }
 0x1ea   : > { %v959_v62 = vadd.f32 %v958_v56, %v957_v46  ;;  %v883_v58 = vmax.f32 %v811_v60, 0.0  ;;  %v814_v1 = vadd.f32 %v7148_v61, %v7833_v52  ;;  %v805_v38 = vpop.f32.mrb[19].mxu1 }
 0x1eb   : > { %v881_v21 = vmax.f32 %v803_v35, 0.0  ;;  %v806_v9 = vadd.f32 %v7833_v52, %v805_v38 }
 0x1ec   : > { %v961_v13 = vadd.f32 %v960_v3, %v959_v62  ;;  %v884_v36 = vmax.f32 %v814_v1, 0.0  ;;  %v8097_v17 = vadd.f32 %v883_v58, %v7910_v49  ;;  %v1409_v62 = vpack.c.bf16 %v8006_v41, %v7997_v31 }
 0x1ed   : > { %v8094_v24 = vadd.f32 %v881_v21, %v7906_v47  ;;  %v882_v16 = vmax.f32 %v806_v9, 0.0  ;;  %v1408_v58 = vpack.c.bf16 %v8000_v32, %v7994_v25 }
 0x1ee   : > { %v963_v18 = vadd.f32 %v962_v15, %v961_v13  ;;  %v8100_v20 = vadd.f32 %v884_v36, %v7913_v50  ;;  %v968_v60 = vsel %vm389_vm1, %v8097_v17, 0.0 }
 0x1ef   : > { %v964_v22 = vsel %vm389_vm1, %v8094_v24, 0.0  ;;  %v8105_v7 = vadd.f32 %v882_v16, %v7917_v53  ;;  %v7151_v28 = vpop.f32.mrb[20].mxu1 }
 0x1f0   : > { %v965_v30 = vadd.f32 %v964_v22, %v963_v18  ;;  %v827_v37 = vadd.f32 %v7151_v28, %v7833_v52  ;;  %v818_v47 = vpop.f32.mrb[21].mxu1  ;;  %v1417_v10 = vpack.c.bf16 %v8100_v20, %v8097_v17  ;;  %v970_v1 = vsel %vm389_vm1, %v8100_v20, 0.0 }
 0x1f1   : > { %v966_v49 = vsel %vm389_vm1, %v8105_v7, 0.0  ;;  %v819_v50 = vadd.f32 %v7833_v52, %v818_v47  ;;  %v7152_v39 = vpop.f32.mrb[22].mxu1  ;;  %v1416_v55 = vpack.c.bf16 %v8105_v7, %v8094_v24  ;;  %v1410_v28 = vpack.c.bf16 %v8026_v14, %v8018_v63 }
 0x1f2   : > { %v967_v8 = vadd.f32 %v966_v49, %v965_v30  ;;  %v830_v53 = vadd.f32 %v7152_v39, %v7833_v52  ;;  %1618 = vrot.lane.b32.xlu1 %v1417_v10, %s7700_s25  ;;  %v821_v46 = vpop.f32.mrb[23].mxu1  ;;  %v887_v54 = vmax.f32 %v827_v37, 0.0 }
 0x1f3   : > { %v885_v56 = vmax.f32 %v819_v50, 0.0  ;;  %v822_v35 = vadd.f32 %v7833_v52, %v821_v46  ;;  %1616 = vrot.lane.b32.xlu0 %v1416_v55, %s7700_s25 }
 0x1f4   : > { %v969_v61 = vadd.f32 %v968_v60, %v967_v8  ;;  %v888_v3 = vmax.f32 %v830_v53, 0.0  ;;  %v8132_v13 = vadd.f32 %v887_v54, %v7928_v4  ;;  %v1411_v60 = vpack.c.bf16 %v8030_v5, %v8021_v12 }
 0x1f5   : > { %v8128_v38 = vadd.f32 %v885_v56, %v7924_v2  ;;  %v886_v21 = vmax.f32 %v822_v35, 0.0 }
 0x1f6   : > { %v971_v9 = vadd.f32 %v970_v1, %v969_v61  ;;  %1602 = vrot.lane.b32.xlu1 %v1409_v62, %s7700_s25  ;;  %v8144_v30 = vadd.f32 %v888_v3, %v7931_v6  ;;  %v976_v39 = vsel %vm389_vm1, %v8132_v13, 0.0 }
 0x1f7   : > { %v972_v36 = vsel %vm389_vm1, %v8128_v38, 0.0  ;;  %v8137_v15 = vadd.f32 %v886_v21, %v7935_v11  ;;  %v7155_v16 = vpop.f32.mrb[24].mxu1  ;;  %1600 = vrot.lane.b32.xlu0 %v1408_v58, %s7700_s25 }
 0x1f8   : > { %v973_v18 = vadd.f32 %v972_v36, %v971_v9  ;;  %v843_v2 = vadd.f32 %v7155_v16, %v7833_v52  ;;  %v834_v22 = vpop.f32.mrb[25].mxu1  ;;  %v978_v54 = vsel %vm389_vm1, %v8144_v30, 0.0  ;;  %v1419_v61 = vpack.c.bf16 %v8144_v30, %v8132_v13 }
 0x1f9   : > { %v974_v4 = vsel %vm389_vm1, %v8137_v15, 0.0  ;;  %v835_v37 = vadd.f32 %v7833_v52, %v834_v22  ;;  %v7156_v11 = vpop.f32.mrb[26].mxu1  ;;  %v1418_v47 = vpack.c.bf16 %v8137_v15, %v8128_v38 }
 0x1fa   : > { %v975_v10 = vadd.f32 %v974_v4, %v973_v18  ;;  %v846_v49 = vadd.f32 %v7156_v11, %v7833_v52  ;;  %v837_v50 = vpop.f32.mrb[27].mxu1  ;;  %1604 = vrot.lane.b32.xlu1 %v1410_v28, %s7700_s25  ;;  %v891_v6 = vmax.f32 %v843_v2, 0.0 }
 0x1fb   : > { %v889_v55 = vmax.f32 %v835_v37, 0.0  ;;  %v838_v8 = vadd.f32 %v7833_v52, %v837_v50  ;;  %1620 = vrot.lane.b32.xlu0 %v1418_v47, %s7700_s25 }
 0x1fc   : > { %v977_v53 = vadd.f32 %v976_v39, %v975_v10  ;;  %v892_v46 = vmax.f32 %v846_v49, 0.0  ;;  %v8168_v58 = vadd.f32 %v891_v6, %v7946_v26  ;;  %v1412_v26 = vpack.c.bf16 %v8050_v59, %v8042_v57 }
 0x1fd   : > { %v8162_v56 = vadd.f32 %v889_v55, %v7942_v23  ;;  %v890_v35 = vmax.f32 %v838_v8, 0.0  ;;  %v1413_v39 = vpack.c.bf16 %v8054_v19, %v8045_v51 }
 0x1fe   : > { %v979_v62 = vadd.f32 %v978_v54, %v977_v53  ;;  %1606 = vrot.lane.b32.xlu1 %v1411_v60, %s7700_s25  ;;  %v8177_v9 = vadd.f32 %v892_v46, %v7949_v27  ;;  %v984_v37 = vsel %vm389_vm1, %v8168_v58, 0.0 }
 0x1ff   : > { %v980_v1 = vsel %vm389_vm1, %v8162_v56, 0.0  ;;  %v8173_v3 = vadd.f32 %v890_v35, %v7953_v29  ;;  %v7159_v21 = vpop.f32.mrb[28].mxu1  ;;  %1622 = vrot.lane.b32.xlu0 %v1419_v61, %s7700_s25  ;;  %v1414_v35 = vpack.c.bf16 %v8078_v43, %v8070_v34 }
 0x200   : > { %v981_v23 = vadd.f32 %v980_v1, %v979_v62  ;;  %v859_v36 = vadd.f32 %v7159_v21, %v7833_v52  ;;  %v850_v16 = vpop.f32.mrb[29].mxu1  ;;  %v986_v49 = vsel %vm389_vm1, %v8177_v9, 0.0  ;;  %v1421_v53 = vpack.c.bf16 %v8177_v9, %v8168_v58 }
 0x201   : > { %v982_v18 = vsel %vm389_vm1, %v8173_v3, 0.0  ;;  %v851_v2 = vadd.f32 %v7833_v52, %v850_v16  ;;  %v7160_v29 = vpop.f32.mrb[30].mxu1  ;;  %v1420_v22 = vpack.c.bf16 %v8173_v3, %v8162_v56 }
 0x202   : > { %v983_v28 = vadd.f32 %v982_v18, %v981_v23  ;;  %v862_v4 = vadd.f32 %v7160_v29, %v7833_v52  ;;  %v853_v27 = vpop.f32.mrb[31].mxu1  ;;  %1608 = vrot.lane.b32.xlu1 %v1412_v26, %s7700_s25  ;;  %v895_v11 = vmax.f32 %v859_v36, 0.0  ;;  %v1415_v23 = vpack.c.bf16 %v8082_v33, %v8073_v40 }
 0x203   : > { %v893_v47 = vmax.f32 %v851_v2, 0.0  ;;  %v854_v10 = vadd.f32 %v7833_v52, %v853_v27  ;;  %1624 = vrot.lane.b32.xlu0 %v1420_v22, %s7700_s25 }
 0x204   : > { %v985_v50 = vadd.f32 %v984_v37, %v983_v28  ;;  %v896_v55 = vmax.f32 %v862_v4, 0.0  ;;  %v8204_v52 = vadd.f32 %v895_v11, %v7964_v44 }
 0x205   : > { %v8198_v6 = vadd.f32 %v893_v47, %v7960_v42  ;;  %v894_v8 = vmax.f32 %v854_v10, 0.0 }
 0x206   : > { %v987_v46 = vadd.f32 %v986_v49, %v985_v50  ;;  %1610 = vrot.lane.b32.xlu1 %v1413_v39, %s7700_s25  ;;  %v8215_v61 = vadd.f32 %v896_v55, %v7967_v45 }
 0x207   : > { %v988_v60 = vsel %vm389_vm1, %v8198_v6, 0.0  ;;  %v8209_v54 = vadd.f32 %v894_v8, %v7971_v48  ;;  %1626 = vrot.lane.b32.xlu0 %v1421_v53, %s7700_s25  ;;  %v992_v48 = vsel %vm389_vm1, %v8204_v52, 0.0  ;;  %v7532_v53 = vld [vmem:[%s10642_s7 + $0x4] ss:$8 sps:$4 sm:$0xff]  }
 0x208   : > { %v989_v42 = vadd.f32 %v988_v60, %v987_v46  ;;  %v994_v45 = vsel %vm389_vm1, %v8215_v61, 0.0  ;;  %v1423_v36 = vpack.c.bf16 %v8215_v61, %v8204_v52 }
 0x209   : > { %v990_v62 = vsel %vm389_vm1, %v8209_v54, 0.0  ;;  %v1422_v44 = vpack.c.bf16 %v8209_v54, %v8198_v6 }
 0x20a   : > { %v991_v1 = vadd.f32 %v990_v62, %v989_v42  ;;  %1612 = vrot.lane.b32.xlu1 %v1414_v35, %s7700_s25 }
 0x20b   : > { %1628 = vrot.lane.b32.xlu0 %v1422_v44, %s7700_s25 }
 0x20c   : > { %v993_v21 = vadd.f32 %v992_v48, %v991_v1 }
 0x20e   : > { %v995_v16 = vadd.f32 %v994_v45, %v993_v21  ;;  %1614 = vrot.lane.b32.xlu1 %v1415_v23, %s7700_s25 }
 0x20f   : > { %1630 = vrot.lane.b32.xlu0 %v1423_v36, %s7700_s25 }
 0x210   : > { %v996_v26 = vrot.slane %v995_v16, 4 }
 0x212   : > { %v997_v18 = vadd.f32 %v996_v26, %v995_v16  ;;  %v7530_v26 = vld [vmem:[%s10642_s7] ss:$8 sps:$4 sm:$0xff]  }
 0x214   : > { %v998_v2 = vrot.slane %v997_v18, 2 }
 0x216   : > { %v999_v29 = vadd.f32 %v998_v2, %v997_v18  ;;  %v7533_v18 = vld [vmem:[%s10642_s7 + $0x14] ss:$8 sps:$4 sm:$0xff]   ;;  %v7535_v2 = vld [vmem:[%s10642_s7 + $0x10] ss:$8 sps:$4 sm:$0xff]  }
 0x218   : > { %v1000_v22 = vrot.slane %v999_v29, 1 }
 0x21a   : > { %v1001_v28 = vadd.f32 %v1000_v22, %v999_v29  ;;  %v7536_v29 = vld [vmem:[%s10642_s7 + $0x24] ss:$8 sps:$4 sm:$0xff]   ;;  %v7538_v22 = vld [vmem:[%s10642_s7 + $0x20] ss:$8 sps:$4 sm:$0xff]  }
 0x21c   : > { %v1003_v4 = vmul.f32 0.00390625, %v1001_v28  ;;  %v7539_v28 = vld [vmem:[%s10642_s7 + $0x34] ss:$8 sps:$4 sm:$0xff]  }
 0x21e   : > { %v1004_v27 = vpack.c.bf16 %v1003_v4, %v1003_v4  ;;  %v7541_v4 = vld [vmem:[%s10642_s7 + $0x30] ss:$8 sps:$4 sm:$0xff]  }
 0x220   : > { %7164 = vmatmul.mubr.msk.bf16.vlgmr.msra.gmra.mrb[32].mxu0 %vm389_vm1, %v1004_v27  ;;  %v7542_v27 = vld [vmem:[%s10642_s7 + $0x44] ss:$8 sps:$4 sm:$0xff]  }
 0x264   : > { %v1619_v11 = vpop.permute.xlu1 %1618 }
 0x265   : > { %v1617_v37 = vpop.permute.xlu0 %1616 }
 0x266   : > { %6745 = vmatprep.subr.bf16.mxu1 %v1617_v37  ;;  %v7544_v37 = vld [vmem:[%s10642_s7 + $0x40] ss:$8 sps:$4 sm:$0xff]  }
 0x268   : > { %v1603_v10 = vpop.permute.xlu1 %1602 }
 0x269   : > { %v1601_v47 = vpop.permute.xlu0 %1600 }
 0x26c   : > { %v1605_v46 = vpop.permute.xlu1 %1604 }
 0x26d   : > { %v1621_v49 = vpop.permute.xlu0 %1620 }
 0x270   : > { %v1607_v62 = vpop.permute.xlu1 %1606 }
 0x271   : > { %v1623_v35 = vpop.permute.xlu0 %1622 }
 0x274   : > { %v1609_v1 = vpop.permute.xlu1 %1608 }
 0x275   : > { %v1625_v44 = vpop.permute.xlu0 %1624 }
 0x278   : > { %v1611_v21 = vpop.permute.xlu1 %1610 }
 0x279   : > { %v1627_v48 = vpop.permute.xlu0 %1626 }
 0x27c   : > { %v1613_v45 = vpop.permute.xlu1 %1612 }
 0x27d   : > { %v1629_v23 = vpop.permute.xlu0 %1628 }
 0x280   : > { %v1615_v16 = vpop.permute.xlu1 %1614 }
 0x281   : > { %v1631_v36 = vpop.permute.xlu0 %1630 }
 0x2f3   : > { %v1045_v50 = vpop.f32.mrb[32].mxu0 }
 0x2f4   : > { %v1051_v39 = vmax.f32 %v1045_v50, 0.0  ;;  %v7165_v55 = vpop.f32.mrb[33].mxu0  ;;  %v7551_v50 = vld [vmem:[%s10642_s7 + $0x74] ss:$8 sps:$4 sm:$0xff]  }
 0x2f5   : > { %v1048_v8 = vpop.f32.mrb[34].mxu0  ;;  %v7554_v55 = vld [vmem:[%s10642_s7 + $0x84] ss:$8 sps:$4 sm:$0xff]  }
 0x2f6   : > { %v1052_v60 = vpack.c.bf16 %v1051_v39, %v1051_v39  ;;  %v7166_v42 = vpop.f32.mrb[35].mxu0  ;;  %v7553_v39 = vld [vmem:[%s10642_s7 + $0x70] ss:$8 sps:$4 sm:$0xff]   ;;  %v7556_v8 = vld [vmem:[%s10642_s7 + $0x80] ss:$8 sps:$4 sm:$0xff]  }
 0x2f7   : > { %v7562_v42 = vld [vmem:[%s10642_s7 + $0xa0] ss:$8 sps:$4 sm:$0xff]  }
 0x2f8   : > { %7170 = vmatmul.mubr.msk.bf16.vlgmr.msra.gmra.mrb[32].mxu1 %vm1053_vm6, %v1052_v60  ;;  %v7560_v60 = vld [vmem:[%s10642_s7 + $0xa4] ss:$8 sps:$4 sm:$0xff]  }
 0x2f9   : > { %6746 = vmatpush3.bf16.msra.mxu1 %v1601_v47  ;;  %1680 = vmatprep.mubr.bf16.mxu1 %v7532_v53  ;;  %v7547_v47 = vld [vmem:[%s10642_s7 + $0x50] ss:$8 sps:$4 sm:$0xff]   ;;  %v7557_v53 = vld [vmem:[%s10642_s7 + $0x94] ss:$8 sps:$4 sm:$0xff]  }
 0x2fa   : > { %6747 = vmatprep.subr.bf16.mxu1 %v1619_v11  ;;  %v7545_v11 = vld [vmem:[%s10642_s7 + $0x54] ss:$8 sps:$4 sm:$0xff]  }
 0x2fd   : > { %6748 = vmatpush3.bf16.msra.mxu1 %v1603_v10  ;;  %v7548_v10 = vld [vmem:[%s10642_s7 + $0x64] ss:$8 sps:$4 sm:$0xff]  }
 0x2fe   : > { %6749 = vmatprep.subr.bf16.mxu1 %v1621_v49  ;;  %v7550_v49 = vld [vmem:[%s10642_s7 + $0x60] ss:$8 sps:$4 sm:$0xff]  }
 0x301   : > { %6750 = vmatpush3.bf16.msra.mxu1 %v1605_v46  ;;  %v7559_v46 = vld [vmem:[%s10642_s7 + $0x90] ss:$8 sps:$4 sm:$0xff]  }
 0x302   : > { %6751 = vmatprep.subr.bf16.mxu1 %v1623_v35  ;;  %v7563_v35 = vld [vmem:[%s10642_s7 + $0xb4] ss:$8 sps:$4 sm:$0xff]  }
 0x305   : > { %6752 = vmatpush3.bf16.msra.mxu1 %v1607_v62  ;;  %v7565_v62 = vld [vmem:[%s10642_s7 + $0xb0] ss:$8 sps:$4 sm:$0xff]  }
 0x306   : > { %6753 = vmatprep.subr.bf16.mxu1 %v1625_v44  ;;  %v7566_v44 = vld [vmem:[%s10642_s7 + $0xc4] ss:$8 sps:$4 sm:$0xff]  }
 0x309   : > { %6754 = vmatpush3.bf16.msra.mxu1 %v1609_v1  ;;  %v931_v1 = vld [vmem:[%s10636_s1 + $0x10] sm:$0x3] }
 0x30a   : > { %6755 = vmatprep.subr.bf16.mxu1 %v1627_v48  ;;  %7453 = vmatprep.subr.msk.bf16.mxu0 %vm438_vm0, %v931_v1  ;;  %v1213_v48 = vsel %vm438_vm0, %v931_v1, 0 }
 0x30b   : > { %7174 = vmatpush3.bf16.msra.mxu0 %v1213_v48 }
 0x30d   : > { %6756 = vmatpush3.bf16.msra.mxu1 %v1611_v21  ;;  %v7568_v21 = vld [vmem:[%s10642_s7 + $0xc0] ss:$8 sps:$4 sm:$0xff]  }
 0x30e   : > { %6757 = vmatprep.subr.bf16.mxu1 %v1629_v23  ;;  %v7569_v23 = vld [vmem:[%s10642_s7 + $0xd4] ss:$8 sps:$4 sm:$0xff]  }
 0x311   : > { %6758 = vmatpush3.bf16.msra.mxu1 %v1613_v45  ;;  %v7571_v45 = vld [vmem:[%s10642_s7 + $0xd0] ss:$8 sps:$4 sm:$0xff]  }
 0x312   : > { %6759 = vmatprep.subr.bf16.mxu1 %v1631_v36  ;;  %v7572_v36 = vld [vmem:[%s10642_s7 + $0xe4] ss:$8 sps:$4 sm:$0xff]  }
 0x315   : > { %6760 = vmatpush3.bf16.msra.mxu1 %v1615_v16  ;;  %v7574_v16 = vld [vmem:[%s10642_s7 + $0xe0] ss:$8 sps:$4 sm:$0xff]  }
 0x316   : > { %7287 = vmatprep.subr.bf16.mxu1 %v10649_v0 }
 0x318   : > { %1681 = vmatmul.mubr.bf16.vlgmr.msra.gmra.mrb[36].mxu1 %v7530_v26  ;;  %v7575_v26 = vld [vmem:[%s10642_s7 + $0xf4] ss:$8 sps:$4 sm:$0xff]  }
 0x319   : > { %1688 = vmatprep.mubr.bf16.mxu1 %v7533_v18  ;;  %v7577_v18 = vld [vmem:[%s10642_s7 + $0xf0] ss:$8 sps:$4 sm:$0xff]  }
 0x320   : > { %1689 = vmatmul.mubr.bf16.gmra.mrb[40].mxu1 %v7535_v2 }
 0x321   : > { %1696 = vmatprep.mubr.bf16.mxu1 %v7536_v29 }
 0x328   : > { %1697 = vmatmul.mubr.bf16.gmra.mrb[44].mxu1 %v7538_v22 }
 0x329   : > { %1704 = vmatprep.mubr.bf16.mxu1 %v7539_v28 }
 0x330   : > { %1705 = vmatmul.mubr.bf16.gmra.mrb[48].mxu1 %v7541_v4 }
 0x331   : > { %1712 = vmatprep.mubr.bf16.mxu1 %v7542_v27 }
 0x338   : > { %1713 = vmatmul.mubr.bf16.gmra.mrb[52].mxu1 %v7544_v37 }
 0x339   : > { %1720 = vmatprep.mubr.bf16.mxu1 %v7545_v11 }
 0x340   : > { %1721 = vmatmul.mubr.bf16.gmra.mrb[56].mxu1 %v7547_v47  ;;  %v1833_v47 = vld [vmem:[%s10636_s1 + $0x14] sm:$0x3] }
 0x341   : > { %1728 = vmatprep.mubr.bf16.mxu1 %v7548_v10  ;;  %v10645_v10 = vlaneseq  ;;  %7454 = vmatprep.subr.msk.bf16.mxu0 %vm438_vm0, %v1833_v47 }
 0x348   : > { %1729 = vmatmul.mubr.bf16.gmra.mrb[60].mxu1 %v7550_v49  ;;  %v8343_v49 = vshrl.u32 %v10645_v10, 7 }
 0x349   : > { %1736 = vmatprep.mubr.bf16.mxu1 %v7551_v50 }
 0x34a   : > { %10707 = vst [vmem:[#allocation2_spill] sm:$0xff] %v8343_v49  ;;  %v8346_v50 = vsub.s32 0, %v8343_v49 }
 0x34c   : > { %10708 = vst [vmem:[#allocation3_spill] sm:$0xff] %v8346_v50 }
 0x350   : > { %1737 = vmatmul.mubr.bf16.gmra.mrb[64].mxu1 %v7553_v39 }
 0x351   : > { %1744 = vmatprep.mubr.bf16.mxu1 %v7554_v55 }
 0x358   : > { %1745 = vmatmul.mubr.bf16.gmra.mrb[68].mxu1 %v7556_v8 }
 0x359   : > { %1752 = vmatprep.mubr.bf16.mxu1 %v7557_v53 }
 0x360   : > { %1753 = vmatmul.mubr.bf16.gmra.mrb[72].mxu1 %v7559_v46 }
 0x361   : > { %1760 = vmatprep.mubr.bf16.mxu1 %v7560_v60 }
 0x368   : > { %1761 = vmatmul.mubr.bf16.gmra.mrb[76].mxu1 %v7562_v42 }
 0x369   : > { %1768 = vmatprep.mubr.bf16.mxu1 %v7563_v35 }
 0x370   : > { %1769 = vmatmul.mubr.bf16.gmra.mrb[80].mxu1 %v7565_v62 }
 0x371   : > { %1776 = vmatprep.mubr.bf16.mxu1 %v7566_v44 }
 0x378   : > { %1777 = vmatmul.mubr.bf16.gmra.mrb[84].mxu1 %v7568_v21 }
 0x379   : > { %1784 = vmatprep.mubr.bf16.mxu1 %v7569_v23 }
 0x380   : > { %1785 = vmatmul.mubr.bf16.gmra.mrb[88].mxu1 %v7571_v45 }
 0x381   : > { %1792 = vmatprep.mubr.bf16.mxu1 %v7572_v36  ;;  %v1858_v36 = vsel %vm438_vm0, %v1833_v47, 0 }
 0x388   : > { %1793 = vmatmul.mubr.bf16.gmra.mrb[92].mxu1 %v7574_v16 }
 0x389   : > { %1800 = vmatprep.mubr.bf16.mxu1 %v7575_v26 }
 0x390   : > { %1801 = vmatmul.mubr.bf16.gmra.mrb[96].mxu1 %v7577_v18 }
 0x391   : > { %7291 = vmatprep.mubr.msk.bf16.mxu1 %vm7699_vm4, %v10649_v0 }
 0x3cb   : > { %v1095_v2 = vpop.f32.mrb[32].mxu1 }
 0x3cc   : > { %v1101_v29 = vsub.f32 0.0, %v1095_v2  ;;  %v7171_v22 = vpop.f32.mrb[33].mxu1 }
 0x3cd   : > { %v1098_v28 = vpop.f32.mrb[34].mxu1 }
 0x3ce   : > { %v1102_v4 = vmul.f32 1.442695, %v1101_v29  ;;  %v7172_v27 = vpop.f32.mrb[35].mxu1 }
 0x3d0   : > { %7681 = vpow2.f32 %v1102_v4 }
 0x3da   : > { %v7682_v37 = vpop.eup %7681 }
 0x3db   : > { %v1104_v11 = vadd.f32 1.0, %v7682_v37 }
 0x3dd   : > { %7683 = vrcp.f32 %v1104_v11 }
 0x3e7   : > { %v7684_v39 = vpop.eup %7683 }
 0x3e8   : > { %v8349_v55 = vrot.slane %v7684_v39, %v8346_v50 }
 0x3ea   : > { %v1110_v60 = vmul.f32 %v8349_v55, %v7994_v25  ;;  %v1111_v42 = vmul.f32 %v8349_v55, %v8000_v32  ;;  %v1112_v35 = vmul.f32 %v8349_v55, %v7997_v31  ;;  %v1113_v62 = vmul.f32 %v8349_v55, %v8006_v41 }
 0x3eb   : > { %v6761_v8 = vpop.f32.mrb[36].mxu1  ;;  %v1114_v1 = vmul.f32 %v8349_v55, %v8018_v63  ;;  %v1115_v48 = vmul.f32 %v8349_v55, %v8026_v14  ;;  %v1116_v26 = vmul.f32 %v8349_v55, %v8021_v12  ;;  %v1117_v18 = vmul.f32 %v8349_v55, %v8030_v5 }
 0x3ec   : > { %v6762_v53 = vpop.f32.mrb[37].mxu1  ;;  %v1143_v21 = vpack.c.bf16 %v1113_v62, %v1112_v35  ;;  %v1142_v45 = vpack.c.bf16 %v1111_v42, %v1110_v60  ;;  %v1118_v29 = vmul.f32 %v8349_v55, %v8042_v57  ;;  %v1119_v22 = vmul.f32 %v8349_v55, %v8050_v59 }
 0x3ed   : > { %v6764_v46 = vpop.f32.mrb[38].mxu1  ;;  %v8363_v23 = vadd.f32 %v6762_v53, %v6761_v8  ;;  %v1144_v31 = vpack.c.bf16 %v1115_v48, %v1114_v1  ;;  %v1145_v28 = vpack.c.bf16 %v1117_v18, %v1116_v26  ;;  %v1120_v47 = vmul.f32 %v8349_v55, %v8045_v51 }
 0x3ee   : > { %v6765_v44 = vpop.f32.mrb[39].mxu1  ;;  %7175 = vmatprep.mubr.msk.bf16.mxu0 %vm389_vm1, %v1142_v45  ;;  %v1146_v27 = vpack.c.bf16 %v1119_v22, %v1118_v29  ;;  %v1121_v57 = vmul.f32 %v8349_v55, %v8054_v19  ;;  %v1122_v59 = vmul.f32 %v8349_v55, %v8070_v34  ;;  %v1123_v8 = vmul.f32 %v8349_v55, %v8078_v43 }
 0x3ef   : > { %v8365_v25 = vadd.f32 %v6765_v44, %v6764_v46  ;;  %7176 = vmatmul.mubr.msk.bf16.vlgmr.msra.gmra.mrb[36].mxu0 %vm389_vm1, %v1143_v21  ;;  %v1124_v62 = vmul.f32 %v8349_v55, %v8073_v40  ;;  %v1125_v34 = vmul.f32 %v8349_v55, %v8082_v33  ;;  %v1126_v43 = vmul.f32 %v8349_v55, %v8094_v24 }
 0x3f0   : > { %7179 = vmatprep.mubr.msk.bf16.mxu0 %vm389_vm1, %v1144_v31  ;;  %7208 = vmatpush3.bf16.msra.mxu0 %v1858_v36  ;;  %v1147_v53 = vpack.c.bf16 %v1121_v57, %v1120_v47  ;;  %v1148_v60 = vpack.c.bf16 %v1123_v8, %v1122_v59  ;;  %v1127_v1 = vmul.f32 %v8349_v55, %v8105_v7 }
 0x3f1   : > { %v1149_v48 = vpack.c.bf16 %v1125_v34, %v1124_v62  ;;  %v1128_v31 = vmul.f32 %v8349_v55, %v8097_v17  ;;  %v1129_v24 = vmul.f32 %v8349_v55, %v8100_v20 }
 0x3f2   : > { %v1150_v45 = vpack.c.bf16 %v1127_v1, %v1126_v43 }
 0x3f3   : > { %v6767_v32 = vpop.f32.mrb[40].mxu1  ;;  %v1151_v18 = vpack.c.bf16 %v1129_v24, %v1128_v31 }
 0x3f4   : > { %v6768_v41 = vpop.f32.mrb[41].mxu1 }
 0x3f5   : > { %v8370_v16 = vadd.f32 %v6768_v41, %v6767_v32  ;;  %v6770_v63 = vpop.f32.mrb[42].mxu1 }
 0x3f6   : > { %v6771_v14 = vpop.f32.mrb[43].mxu1 }
 0x3f7   : > { %v8377_v2 = vadd.f32 %v6771_v14, %v6770_v63  ;;  %7180 = vmatmul.mubr.msk.bf16.gmra.mrb[40].mxu0 %vm389_vm1, %v1145_v28  ;;  %v1130_v63 = vmul.f32 %v8349_v55, %v8128_v38  ;;  %v1131_v14 = vmul.f32 %v8349_v55, %v8137_v15  ;;  %v1132_v38 = vmul.f32 %v8349_v55, %v8132_v13 }
 0x3f8   : > { %7183 = vmatprep.mubr.msk.bf16.mxu0 %vm389_vm1, %v1146_v27  ;;  %v1133_v15 = vmul.f32 %v8349_v55, %v8144_v30 }
 0x3f9   : > { %v1152_v17 = vpack.c.bf16 %v1131_v14, %v1130_v63 }
 0x3fa   : > { %v1153_v57 = vpack.c.bf16 %v1133_v15, %v1132_v38 }
 0x3fb   : > { %v6773_v4 = vpop.f32.mrb[44].mxu1 }
 0x3fc   : > { %v6774_v37 = vpop.f32.mrb[45].mxu1 }
 0x3fd   : > { %v8384_v11 = vadd.f32 %v6774_v37, %v6773_v4  ;;  %v6776_v12 = vpop.f32.mrb[46].mxu1 }
 0x3fe   : > { %v6777_v5 = vpop.f32.mrb[47].mxu1 }
 0x3ff   : > { %v8391_v39 = vadd.f32 %v6777_v5, %v6776_v12  ;;  %7184 = vmatmul.mubr.msk.bf16.gmra.mrb[44].mxu0 %vm389_vm1, %v1147_v53  ;;  %v1134_v12 = vmul.f32 %v8349_v55, %v8162_v56  ;;  %v1135_v5 = vmul.f32 %v8349_v55, %v8173_v3  ;;  %v1136_v56 = vmul.f32 %v8349_v55, %v8168_v58 }
 0x400   : > { %7187 = vmatprep.mubr.msk.bf16.mxu0 %vm389_vm1, %v1148_v60  ;;  %v1137_v3 = vmul.f32 %v8349_v55, %v8177_v9 }
 0x401   : > { %v1154_v13 = vpack.c.bf16 %v1135_v5, %v1134_v12 }
 0x402   : > { %v1155_v34 = vpack.c.bf16 %v1137_v3, %v1136_v56 }
 0x403   : > { %v6779_v46 = vpop.f32.mrb[48].mxu1 }
 0x404   : > { %v6780_v42 = vpop.f32.mrb[49].mxu1 }
 0x405   : > { %v8398_v35 = vadd.f32 %v6780_v42, %v6779_v46  ;;  %v6782_v51 = vpop.f32.mrb[50].mxu1 }
 0x406   : > { %v6783_v19 = vpop.f32.mrb[51].mxu1 }
 0x407   : > { %v8405_v44 = vadd.f32 %v6783_v19, %v6782_v51  ;;  %7188 = vmatmul.mubr.msk.bf16.gmra.mrb[48].mxu0 %vm389_vm1, %v1149_v48  ;;  %v1138_v51 = vmul.f32 %v8349_v55, %v8198_v6  ;;  %v1139_v19 = vmul.f32 %v8349_v55, %v8209_v54  ;;  %v1140_v6 = vmul.f32 %v8349_v55, %v8204_v52 }
 0x408   : > { %7191 = vmatprep.mubr.msk.bf16.mxu0 %vm389_vm1, %v1150_v45  ;;  %v1141_v54 = vmul.f32 %v8349_v55, %v8215_v61 }
 0x409   : > { %v1156_v58 = vpack.c.bf16 %v1139_v19, %v1138_v51 }
 0x40b   : > { %v6785_v21 = vpop.f32.mrb[52].mxu1 }
 0x40c   : > { %v6786_v32 = vpop.f32.mrb[53].mxu1 }
 0x40d   : > { %v8412_v36 = vadd.f32 %v6786_v32, %v6785_v21  ;;  %v6788_v40 = vpop.f32.mrb[54].mxu1 }
 0x40e   : > { %v6789_v33 = vpop.f32.mrb[55].mxu1 }
 0x40f   : > { %v1809_v7 = vmax.f32 %v8363_v23, %v8412_v36  ;;  %v8421_v41 = vadd.f32 %v6789_v33, %v6788_v40  ;;  %7192 = vmatmul.mubr.msk.bf16.gmra.mrb[52].mxu0 %vm389_vm1, %v1151_v18  ;;  %v1157_v33 = vpack.c.bf16 %v1141_v54, %v1140_v6 }
 0x410   : > { %7195 = vmatprep.mubr.msk.bf16.mxu0 %vm389_vm1, %v1152_v17 }
 0x411   : > { %v1810_v26 = vmax.f32 %v8365_v25, %v8421_v41 }
 0x413   : > { %v6791_v29 = vpop.f32.mrb[56].mxu1 }
 0x414   : > { %v6792_v22 = vpop.f32.mrb[57].mxu1 }
 0x415   : > { %v8430_v20 = vadd.f32 %v6792_v22, %v6791_v29  ;;  %v6794_v28 = vpop.f32.mrb[58].mxu1 }
 0x416   : > { %v6795_v4 = vpop.f32.mrb[59].mxu1 }
 0x417   : > { %v1811_v27 = vmax.f32 %v8370_v16, %v8430_v20  ;;  %v8439_v37 = vadd.f32 %v6795_v4, %v6794_v28  ;;  %7196 = vmatmul.mubr.msk.bf16.gmra.mrb[56].mxu0 %vm389_vm1, %v1153_v57 }
 0x418   : > { %7199 = vmatprep.mubr.msk.bf16.mxu0 %vm389_vm1, %v1154_v13 }
 0x419   : > { %v1812_v47 = vmax.f32 %v8377_v2, %v8439_v37 }
 0x41b   : > { %v6797_v59 = vpop.f32.mrb[60].mxu1 }
 0x41c   : > { %v6798_v8 = vpop.f32.mrb[61].mxu1 }
 0x41d   : > { %v8448_v30 = vadd.f32 %v6798_v8, %v6797_v59  ;;  %v6800_v53 = vpop.f32.mrb[62].mxu1 }
 0x41e   : > { %v6801_v46 = vpop.f32.mrb[63].mxu1 }
 0x41f   : > { %v1813_v60 = vmax.f32 %v8384_v11, %v8448_v30  ;;  %v8457_v42 = vadd.f32 %v6801_v46, %v6800_v53  ;;  %7200 = vmatmul.mubr.msk.bf16.gmra.mrb[60].mxu0 %vm389_vm1, %v1155_v34 }
 0x420   : > { %7203 = vmatprep.mubr.msk.bf16.mxu0 %vm389_vm1, %v1156_v58 }
 0x421   : > { %v1814_v62 = vmax.f32 %v8391_v39, %v8457_v42  ;;  %v7578_v42 = vld [vmem:[%s10636_s1 + $0x18] sm:$0xff]  }
 0x422   : > { %7217 = vmatprep.subr.bf16.mxu0 %v7578_v42 }
 0x423   : > { %v6803_v43 = vpop.f32.mrb[64].mxu1 }
 0x424   : > { %v6804_v1 = vpop.f32.mrb[65].mxu1 }
 0x425   : > { %v8466_v9 = vadd.f32 %v6804_v1, %v6803_v43  ;;  %v6806_v48 = vpop.f32.mrb[66].mxu1 }
 0x426   : > { %v6807_v21 = vpop.f32.mrb[67].mxu1 }
 0x427   : > { %v1815_v45 = vmax.f32 %v8398_v35, %v8466_v9  ;;  %v8475_v32 = vadd.f32 %v6807_v21, %v6806_v48  ;;  %7204 = vmatmul.mubr.msk.bf16.gmra.mrb[64].mxu0 %vm389_vm1, %v1157_v33 }
 0x429   : > { %v1816_v40 = vmax.f32 %v8405_v44, %v8475_v32  ;;  %v7580_v32 = vld [vmem:[%s10636_s1 + $0x28] sm:$0xff]  }
 0x42b   : > { %v6809_v31 = vpop.f32.mrb[68].mxu1 }
 0x42c   : > { %v6810_v24 = vpop.f32.mrb[69].mxu1 }
 0x42d   : > { %v6811_v63 = vadd.f32 %v6810_v24, %v6809_v31  ;;  %v6812_v14 = vpop.f32.mrb[70].mxu1 }
 0x42e   : > { %v6813_v18 = vpop.f32.mrb[71].mxu1 }
 0x42f   : > { %v6814_v52 = vadd.f32 %v6813_v18, %v6812_v14 }
 0x433   : > { %v6815_v29 = vpop.f32.mrb[72].mxu1 }
 0x434   : > { %v6816_v17 = vpop.f32.mrb[73].mxu1 }
 0x435   : > { %v6817_v61 = vadd.f32 %v6816_v17, %v6815_v29  ;;  %v6818_v55 = vpop.f32.mrb[74].mxu1 }
 0x436   : > { %v6819_v22 = vpop.f32.mrb[75].mxu1 }
 0x437   : > { %v6820_v28 = vadd.f32 %v6819_v22, %v6818_v55 }
 0x43b   : > { %v6821_v4 = vpop.f32.mrb[76].mxu1 }
 0x43c   : > { %v6822_v38 = vpop.f32.mrb[77].mxu1 }
 0x43d   : > { %v6823_v15 = vadd.f32 %v6822_v38, %v6821_v4  ;;  %v6824_v12 = vpop.f32.mrb[78].mxu1 }
 0x43e   : > { %v6825_v5 = vpop.f32.mrb[79].mxu1 }
 0x43f   : > { %v6826_v57 = vadd.f32 %v6825_v5, %v6824_v12 }
 0x443   : > { %v6827_v59 = vpop.f32.mrb[80].mxu1 }
 0x444   : > { %v6828_v13 = vpop.f32.mrb[81].mxu1 }
 0x445   : > { %v6829_v8 = vadd.f32 %v6828_v13, %v6827_v59  ;;  %v6830_v53 = vpop.f32.mrb[82].mxu1 }
 0x446   : > { %v6831_v46 = vpop.f32.mrb[83].mxu1 }
 0x447   : > { %v6832_v56 = vadd.f32 %v6831_v46, %v6830_v53 }
 0x44b   : > { %v6833_v3 = vpop.f32.mrb[84].mxu1 }
 0x44c   : > { %v6834_v51 = vpop.f32.mrb[85].mxu1 }
 0x44d   : > { %v6835_v19 = vadd.f32 %v6834_v51, %v6833_v3  ;;  %v6836_v34 = vpop.f32.mrb[86].mxu1 }
 0x44e   : > { %v6837_v43 = vpop.f32.mrb[87].mxu1 }
 0x44f   : > { %v1817_v58 = vmax.f32 %v6811_v63, %v6835_v19  ;;  %v6838_v1 = vadd.f32 %v6837_v43, %v6836_v34  ;;  %v6389_v34 = vld [vmem:[%s10637_s2 + $0x1] ss:$0 sm:$0xff] }
 0x451   : > { %v1825_v48 = vmax.f32 %v1809_v7, %v1817_v58  ;;  %v1818_v21 = vmax.f32 %v6814_v52, %v6838_v1 }
 0x453   : > { %v1826_v6 = vmax.f32 %v1810_v26, %v1818_v21  ;;  %v6839_v54 = vpop.f32.mrb[88].mxu1 }
 0x454   : > { %v6840_v33 = vpop.f32.mrb[89].mxu1 }
 0x455   : > { %v1834_v31 = vpack.c.bf16 %v1826_v6, %v1825_v48  ;;  %v6841_v24 = vadd.f32 %v6840_v33, %v6839_v54  ;;  %v6842_v14 = vpop.f32.mrb[90].mxu1 }
 0x456   : > { %v6843_v18 = vpop.f32.mrb[91].mxu1 }
 0x457   : > { %v1819_v29 = vmax.f32 %v6817_v61, %v6841_v24  ;;  %v6844_v17 = vadd.f32 %v6843_v18, %v6842_v14  ;;  %7209 = vmatprep.mubr.msk.bf16.mxu0 %vm389_vm1, %v1834_v31 }
 0x459   : > { %v1827_v23 = vmax.f32 %v1811_v27, %v1819_v29  ;;  %v1820_v36 = vmax.f32 %v6820_v28, %v6844_v17 }
 0x45b   : > { %v1828_v25 = vmax.f32 %v1812_v47, %v1820_v36  ;;  %v6845_v7 = vpop.f32.mrb[92].mxu1 }
 0x45c   : > { %v6846_v41 = vpop.f32.mrb[93].mxu1 }
 0x45d   : > { %v1835_v26 = vpack.c.bf16 %v1828_v25, %v1827_v23  ;;  %v6847_v63 = vadd.f32 %v6846_v41, %v6845_v7  ;;  %v6848_v52 = vpop.f32.mrb[94].mxu1 }
 0x45e   : > { %v6849_v55 = vpop.f32.mrb[95].mxu1 }
 0x45f   : > { %v1821_v22 = vmax.f32 %v6823_v15, %v6847_v63  ;;  %v6850_v61 = vadd.f32 %v6849_v55, %v6848_v52  ;;  %7210 = vmatmul.mubr.msk.bf16.vlgmr.msra.gmra.mrb[68].mxu0 %vm389_vm1, %v1835_v26 }
 0x460   : > { %7218 = vmatpush3.bf16.msra.mxu0 %v7578_v42 }
 0x461   : > { %v1829_v16 = vmax.f32 %v1813_v60, %v1821_v22  ;;  %v1822_v20 = vmax.f32 %v6826_v57, %v6850_v61 }
 0x463   : > { %v1830_v2 = vmax.f32 %v1814_v62, %v1822_v20  ;;  %v6851_v27 = vpop.f32.mrb[96].mxu1  ;;  %v7579_v62 = vld [vmem:[%s10636_s1 + $0x20] sm:$0xff]  }
 0x464   : > { %v6852_v37 = vpop.f32.mrb[97].mxu1  ;;  %7219 = vmatprep.subr.bf16.mxu0 %v7579_v62 }
 0x465   : > { %v1836_v47 = vpack.c.bf16 %v1830_v2, %v1829_v16  ;;  %v6853_v28 = vadd.f32 %v6852_v37, %v6851_v27  ;;  %v6854_v4 = vpop.f32.mrb[98].mxu1  ;;  %7220 = vmatpush3.bf16.msra.mxu0 %v7579_v62 }
 0x466   : > { %v6855_v38 = vpop.f32.mrb[99].mxu1  ;;  %7229 = vmatprep.subr.bf16.mxu0 %v7580_v32 }
 0x467   : > { %v1823_v12 = vmax.f32 %v6829_v8, %v6853_v28  ;;  %v6856_v15 = vadd.f32 %v6855_v38, %v6854_v4  ;;  %7213 = vmatprep.mubr.msk.bf16.mxu0 %vm389_vm1, %v1836_v47  ;;  %v6438_v38 = vld [vmem:[%s10637_s2 + $0x2] ss:$0 sm:$0xff] }
 0x469   : > { %v1831_v11 = vmax.f32 %v1815_v45, %v1823_v12  ;;  %v1824_v30 = vmax.f32 %v6832_v56, %v6856_v15 }
 0x46b   : > { %v1832_v39 = vmax.f32 %v1816_v40, %v1824_v30 }
 0x46d   : > { %v1837_v60 = vpack.c.bf16 %v1832_v39, %v1831_v11 }
 0x46f   : > { %7214 = vmatmul.mubr.msk.bf16.gmra.mrb[72].mxu0 %vm389_vm1, %v1837_v60 }
 0x4c2   : > { %v8514_v35 = vpop.f32.mrb[36].mxu0 }
 0x4c3   : > { %10709 = vst [vmem:[#allocation4_spill] sm:$0xff] %v8514_v35  ;;  %v8516_v9 = vpop.f32.mrb[37].mxu0 }
 0x4c4   : > { %10710 = vst [vmem:[#allocation5_spill] sm:$0xff] %v8516_v9  ;;  %v8518_v44 = vpop.f32.mrb[38].mxu0 }
 0x4c5   : > { %10711 = vst [vmem:[#allocation6_spill] sm:$0xff] %v8518_v44  ;;  %v8520_v45 = vpop.f32.mrb[39].mxu0 }
 0x4c6   : > { %10712 = vst [vmem:[#allocation7_spill] sm:$0xff] %v8520_v45 }
 0x4ca   : > { %v8525_v40 = vpop.f32.mrb[40].mxu0 }
 0x4cb   : > { %10713 = vst [vmem:[#allocation8_spill] sm:$0xff] %v8525_v40  ;;  %v8527_v5 = vpop.f32.mrb[41].mxu0 }
 0x4cc   : > { %10714 = vst [vmem:[#allocation9_spill] sm:$0xff] %v8527_v5  ;;  %v8529_v57 = vpop.f32.mrb[42].mxu0 }
 0x4cd   : > { %10715 = vst [vmem:[#allocation10_spill] sm:$0xff] %v8529_v57  ;;  %v8531_v59 = vpop.f32.mrb[43].mxu0 }
 0x4ce   : > { %10716 = vst [vmem:[#allocation11_spill] sm:$0xff] %v8531_v59 }
 0x4d2   : > { %v8533_v13 = vpop.f32.mrb[44].mxu0 }
 0x4d3   : > { %10717 = vst [vmem:[#allocation12_spill] sm:$0xff] %v8533_v13  ;;  %v8535_v8 = vpop.f32.mrb[45].mxu0 }
 0x4d4   : > { %10718 = vst [vmem:[#allocation13_spill] sm:$0xff] %v8535_v8  ;;  %v8537_v53 = vpop.f32.mrb[46].mxu0 }
 0x4d5   : > { %10719 = vst [vmem:[#allocation14_spill] sm:$0xff] %v8537_v53  ;;  %v8539_v46 = vpop.f32.mrb[47].mxu0 }
 0x4d6   : > { %10720 = vst [vmem:[#allocation15_spill] sm:$0xff] %v8539_v46 }
 0x4da   : > { %v8541_v56 = vpop.f32.mrb[48].mxu0 }
 0x4db   : > { %10721 = vst [vmem:[#allocation16_spill] sm:$0xff] %v8541_v56  ;;  %v8543_v3 = vpop.f32.mrb[49].mxu0 }
 0x4dc   : > { %10722 = vst [vmem:[#allocation17_spill] sm:$0xff] %v8543_v3  ;;  %v8545_v51 = vpop.f32.mrb[50].mxu0 }
 0x4dd   : > { %10723 = vst [vmem:[#allocation18_spill] sm:$0xff] %v8545_v51  ;;  %v8547_v19 = vpop.f32.mrb[51].mxu0 }
 0x4de   : > { %10724 = vst [vmem:[#allocation19_spill] sm:$0xff] %v8547_v19 }
 0x4e2   : > { %v7193_v43 = vpop.f32.mrb[52].mxu0 }
 0x4e3   : > { %v8552_v58 = vadd.f32 %v7193_v43, %v6389_v34  ;;  %v1313_v1 = vpop.f32.mrb[53].mxu0 }
 0x4e4   : > { %v8554_v48 = vadd.f32 %v6389_v34, %v1313_v1  ;;  %v7194_v21 = vpop.f32.mrb[54].mxu0 }
 0x4e5   : > { %10725 = vst [vmem:[#allocation20_spill] sm:$0xff] %v8552_v58  ;;  %v8556_v6 = vadd.f32 %v7194_v21, %v6389_v34  ;;  %v1316_v54 = vpop.f32.mrb[55].mxu0 }
 0x4e6   : > { %10726 = vst [vmem:[#allocation21_spill] sm:$0xff] %v8554_v48  ;;  %v8558_v33 = vadd.f32 %v6389_v34, %v1316_v54 }
 0x4e7   : > { %10727 = vst [vmem:[#allocation22_spill] sm:$0xff] %v8556_v6 }
 0x4e8   : > { %10728 = vst [vmem:[#allocation23_spill] sm:$0xff] %v8558_v33 }
 0x4ea   : > { %v7197_v31 = vpop.f32.mrb[56].mxu0 }
 0x4eb   : > { %v8560_v24 = vadd.f32 %v7197_v31, %v6389_v34  ;;  %v1329_v14 = vpop.f32.mrb[57].mxu0 }
 0x4ec   : > { %v8562_v18 = vadd.f32 %v6389_v34, %v1329_v14  ;;  %v7198_v29 = vpop.f32.mrb[58].mxu0 }
 0x4ed   : > { %10729 = vst [vmem:[#allocation24_spill] sm:$0xff] %v8560_v24  ;;  %v8564_v17 = vadd.f32 %v7198_v29, %v6389_v34  ;;  %v1332_v23 = vpop.f32.mrb[59].mxu0 }
 0x4ee   : > { %10730 = vst [vmem:[#allocation25_spill] sm:$0xff] %v8562_v18  ;;  %v8566_v36 = vadd.f32 %v6389_v34, %v1332_v23 }
 0x4ef   : > { %10731 = vst [vmem:[#allocation26_spill] sm:$0xff] %v8564_v17 }
 0x4f0   : > { %10732 = vst [vmem:[#allocation27_spill] sm:$0xff] %v8566_v36 }
 0x4f2   : > { %v7201_v25 = vpop.f32.mrb[60].mxu0 }
 0x4f3   : > { %v8568_v7 = vadd.f32 %v7201_v25, %v6389_v34  ;;  %v1345_v41 = vpop.f32.mrb[61].mxu0 }
 0x4f4   : > { %v8570_v26 = vadd.f32 %v6389_v34, %v1345_v41  ;;  %v7202_v63 = vpop.f32.mrb[62].mxu0 }
 0x4f5   : > { %10733 = vst [vmem:[#allocation28_spill] sm:$0xff] %v8568_v7  ;;  %v8572_v52 = vadd.f32 %v7202_v63, %v6389_v34  ;;  %v1348_v55 = vpop.f32.mrb[63].mxu0 }
 0x4f6   : > { %10734 = vst [vmem:[#allocation29_spill] sm:$0xff] %v8570_v26  ;;  %v8574_v22 = vadd.f32 %v6389_v34, %v1348_v55  ;;  %v7583_v55 = vld [vmem:[%s10636_s1 + $0x40] sm:$0xff]  }
 0x4f7   : > { %10735 = vst [vmem:[#allocation30_spill] sm:$0xff] %v8572_v52 }
 0x4f8   : > { %10736 = vst [vmem:[#allocation31_spill] sm:$0xff] %v8574_v22 }
 0x4fa   : > { %v7205_v61 = vpop.f32.mrb[64].mxu0 }
 0x4fb   : > { %v8576_v16 = vadd.f32 %v7205_v61, %v6389_v34  ;;  %v1361_v20 = vpop.f32.mrb[65].mxu0  ;;  %v8604_v61 = vld [vmem:[%s10637_s2 + $0x3] ss:$0 sm:$0xff] }
 0x4fc   : > { %v8578_v2 = vadd.f32 %v6389_v34, %v1361_v20  ;;  %v7206_v27 = vpop.f32.mrb[66].mxu0 }
 0x4fd   : > { %10737 = vst [vmem:[#allocation32_spill] sm:$0xff] %v8576_v16  ;;  %v8580_v37 = vadd.f32 %v7206_v27, %v6389_v34  ;;  %v1364_v47 = vpop.f32.mrb[67].mxu0 }
 0x4fe   : > { %10738 = vst [vmem:[#allocation33_spill] sm:$0xff] %v8578_v2  ;;  %v8582_v28 = vadd.f32 %v6389_v34, %v1364_v47  ;;  %v7581_v34 = vld [vmem:[%s10636_s1 + $0x30] sm:$0xff]  }
 0x4ff   : > { %10739 = vst [vmem:[#allocation34_spill] sm:$0xff] %v8580_v37 }
 0x500   : > { %10740 = vst [vmem:[#allocation35_spill] sm:$0xff] %v8582_v28 }
 0x532   : > { %v7211_v4 = vpop.f32.mrb[68].mxu0 }
 0x533   : > { %v1894_v12 = vpop.f32.mrb[69].mxu0  ;;  %v1903_v11 = vadd.f32 %v7211_v4, %v6438_v38 }
 0x534   : > { %v7212_v15 = vpop.f32.mrb[70].mxu0  ;;  %v1895_v60 = vadd.f32 %v6438_v38, %v1894_v12 }
 0x535   : > { %v1906_v30 = vadd.f32 %v7212_v15, %v6438_v38  ;;  %v1897_v39 = vpop.f32.mrb[71].mxu0 }
 0x536   : > { %v1898_v42 = vadd.f32 %v6438_v38, %v1897_v39 }
 0x537   : > { %v1939_v62 = vpack.c.bf16 %v1906_v30, %v1903_v11 }
 0x538   : > { %v1938_v43 = vpack.c.bf16 %v1898_v42, %v1895_v60 }
 0x53a   : > { %7221 = vmatprep.mubr.msk.bf16.mxu0 %vm1960_vm7, %v1938_v43 }
 0x53b   : > { %7222 = vmatmul.mubr.msk.bf16.vlgmr.msra.gmra.mrb[76].mxu0 %vm1960_vm7, %v1939_v62 }
 0x53c   : > { %7230 = vmatpush3.bf16.msra.mxu0 %v7580_v32  ;;  %v7582_v32 = vld [vmem:[%s10636_s1 + $0x38] sm:$0xff]  }
 0x53d   : > { %7231 = vmatprep.subr.bf16.mxu0 %v7581_v34 }
 0x540   : > { %7232 = vmatpush3.bf16.msra.mxu0 %v7581_v34 }
 0x541   : > { %7233 = vmatprep.subr.bf16.mxu0 %v7582_v32 }
 0x542   : > { %v7215_v1 = vpop.f32.mrb[72].mxu0 }
 0x543   : > { %v1910_v21 = vpop.f32.mrb[73].mxu0  ;;  %v1919_v31 = vadd.f32 %v7215_v1, %v6438_v38 }
 0x544   : > { %v7216_v54 = vpop.f32.mrb[74].mxu0  ;;  %v1911_v23 = vadd.f32 %v6438_v38, %v1910_v21  ;;  %7234 = vmatpush3.bf16.msra.mxu0 %v7582_v32 }
 0x545   : > { %v1922_v14 = vadd.f32 %v7216_v54, %v6438_v38  ;;  %v1913_v29 = vpop.f32.mrb[75].mxu0  ;;  %7235 = vmatprep.subr.bf16.mxu0 %v7583_v55 }
 0x546   : > { %v1914_v25 = vadd.f32 %v6438_v38, %v1913_v29 }
 0x547   : > { %v1941_v41 = vpack.c.bf16 %v1922_v14, %v1919_v31 }
 0x548   : > { %v1940_v63 = vpack.c.bf16 %v1914_v25, %v1911_v23  ;;  %7236 = vmatpush3.bf16.msra.mxu0 %v7583_v55 }
 0x549   : > { %7245 = vmatprep.subr.bf16.mxu0 %v10649_v0 }
 0x54a   : > { %7225 = vmatprep.mubr.msk.bf16.mxu0 %vm1960_vm7, %v1940_v63 }
 0x54b   : > { %7226 = vmatmul.mubr.msk.bf16.gmra.mrb[80].mxu0 %vm1960_vm7, %v1941_v41 }
 0x60e   : > { %v7223_v20 = vpop.f32.mrb[76].mxu0 }
 0x60f   : > { %v2007_v27 = vpop.f32.mrb[77].mxu0  ;;  %v2016_v38 = vadd.f32 %v7223_v20, %v8604_v61 }
 0x610   : > { %v2008_v47 = vadd.f32 %v8604_v61, %v2007_v27  ;;  %v7224_v4 = vpop.f32.mrb[78].mxu0  ;;  %v7584_v27 = vld [vmem:[%s10636_s1 + $0x48] sm:$0xff]  }
 0x611   : > { %v2019_v12 = vadd.f32 %v7224_v4, %v8604_v61  ;;  %v2010_v15 = vpop.f32.mrb[79].mxu0  ;;  %v2040_v42 = vmax.f32 %v2016_v38, 0.0  ;;  %v7585_v4 = vld [vmem:[%s10636_s1 + $0x50] sm:$0xff]  }
 0x612   : > { %v2011_v11 = vadd.f32 %v8604_v61, %v2010_v15  ;;  %v2038_v39 = vmax.f32 %v2008_v47, 0.0 }
 0x613   : > { %v2041_v30 = vmax.f32 %v2019_v12, 0.0 }
 0x614   : > { %v2039_v60 = vmax.f32 %v2011_v11, 0.0 }
 0x615   : > { %v2047_v43 = vpack.c.bf16 %v2041_v30, %v2040_v42 }
 0x616   : > { %v2046_v62 = vpack.c.bf16 %v2039_v60, %v2038_v39 }
 0x618   : > { %7237 = vmatprep.mubr.msk.bf16.mxu0 %vm2074_vm8, %v2046_v62 }
 0x619   : > { %7238 = vmatmul.mubr.msk.bf16.vlgmr.msra.gmra.mrb[84].mxu0 %vm2074_vm8, %v2047_v43 }
 0x61a   : > { %7246 = vmatpush3.bf16.msra.mxu0 %v7584_v27 }
 0x61b   : > { %7247 = vmatprep.subr.bf16.mxu0 %v10649_v0 }
 0x61e   : > { %v7227_v34 = vpop.f32.mrb[80].mxu0  ;;  %7248 = vmatpush3.bf16.msra.mxu0 %v7585_v4 }
 0x61f   : > { %v2023_v1 = vpop.f32.mrb[81].mxu0  ;;  %v2032_v31 = vadd.f32 %v7227_v34, %v8604_v61  ;;  %7253 = vmatprep.subr.bf16.mxu0 %v10649_v0 }
 0x620   : > { %v2024_v21 = vadd.f32 %v8604_v61, %v2023_v1  ;;  %v7228_v54 = vpop.f32.mrb[82].mxu0 }
 0x621   : > { %v2035_v14 = vadd.f32 %v7228_v54, %v8604_v61  ;;  %v2026_v29 = vpop.f32.mrb[83].mxu0  ;;  %v2044_v32 = vmax.f32 %v2032_v31, 0.0 }
 0x622   : > { %v2027_v23 = vadd.f32 %v8604_v61, %v2026_v29  ;;  %v2042_v41 = vmax.f32 %v2024_v21, 0.0 }
 0x623   : > { %v2045_v25 = vmax.f32 %v2035_v14, 0.0 }
 0x624   : > { %v2043_v63 = vmax.f32 %v2027_v23, 0.0 }
 0x625   : > { %v2049_v20 = vpack.c.bf16 %v2045_v25, %v2044_v32 }
 0x626   : > { %v2048_v55 = vpack.c.bf16 %v2043_v63, %v2042_v41 }
 0x628   : > { %7241 = vmatprep.mubr.msk.bf16.mxu0 %vm2074_vm8, %v2048_v55 }
 0x629   : > { %7242 = vmatmul.mubr.msk.bf16.gmra.mrb[88].mxu0 %vm2074_vm8, %v2049_v20 }
 0x62a   : > { %7249 = vmatprep.mubr.msk.bf16.mxu0 %vm7699_vm4, %v10649_v0 }
 0x6ec   : > { %v7239_v15 = vpop.f32.mrb[84].mxu0 }
 0x6ed   : > { %v2130_v30 = vadd.f32 %v7239_v15, %v8604_v61  ;;  %v2121_v39 = vpop.f32.mrb[85].mxu0 }
 0x6ee   : > { %v2122_v60 = vadd.f32 %v8604_v61, %v2121_v39  ;;  %v7240_v42 = vpop.f32.mrb[86].mxu0 }
 0x6ef   : > { %v2154_v62 = vmax.f32 %v2130_v30, 0.0  ;;  %v2133_v43 = vadd.f32 %v7240_v42, %v8604_v61  ;;  %v2124_v34 = vpop.f32.mrb[87].mxu0 }
 0x6f0   : > { %v2152_v1 = vmax.f32 %v2122_v60, 0.0  ;;  %v2125_v54 = vadd.f32 %v8604_v61, %v2124_v34 }
 0x6f1   : > { %v2155_v29 = vmax.f32 %v2133_v43, 0.0  ;;  %v8632_v41 = vadd.f32 %v2154_v62, %v2016_v38 }
 0x6f2   : > { %v2153_v25 = vmax.f32 %v2125_v54, 0.0  ;;  %v8636_v32 = vadd.f32 %v2152_v1, %v2008_v47 }
 0x6f3   : > { %v8634_v63 = vadd.f32 %v2155_v29, %v2019_v12  ;;  %v2182_v30 = vsel %vm1960_vm7, %v8632_v41, 0.0 }
 0x6f4   : > { %v8638_v55 = vadd.f32 %v2153_v25, %v2011_v11  ;;  %v2179_v47 = vsel %vm1960_vm7, %v8636_v32, 0.0 }
 0x6f5   : > { %v2435_v20 = vpack.c.bf16 %v8634_v63, %v8632_v41  ;;  %v2184_v25 = vsel %vm1960_vm7, %v8634_v63, 0.0 }
 0x6f6   : > { %v2434_v27 = vpack.c.bf16 %v8638_v55, %v8636_v32  ;;  %v2180_v4 = vsel %vm1960_vm7, %v8638_v55, 0.0 }
 0x6f7   : > { %2464 = vrot.lane.b32.xlu1 %v2435_v20, %s7701_s21  ;;  %v2181_v38 = vadd.f32 %v2180_v4, %v2179_v47 }
 0x6f8   : > { %2462 = vrot.lane.b32.xlu0 %v2434_v27, %s7701_s21 }
 0x6f9   : > { %v2183_v42 = vadd.f32 %v2182_v30, %v2181_v38 }
 0x6fb   : > { %v2185_v47 = vadd.f32 %v2184_v25, %v2183_v42 }
 0x6fc   : > { %v7243_v12 = vpop.f32.mrb[88].mxu0 }
 0x6fd   : > { %v2146_v11 = vadd.f32 %v7243_v12, %v8604_v61  ;;  %v2137_v15 = vpop.f32.mrb[89].mxu0 }
 0x6fe   : > { %v2138_v39 = vadd.f32 %v8604_v61, %v2137_v15  ;;  %v7244_v60 = vpop.f32.mrb[90].mxu0 }
 0x6ff   : > { %v2158_v62 = vmax.f32 %v2146_v11, 0.0  ;;  %v2149_v43 = vadd.f32 %v7244_v60, %v8604_v61  ;;  %v2140_v34 = vpop.f32.mrb[91].mxu0 }
 0x700   : > { %v2156_v1 = vmax.f32 %v2138_v39, 0.0  ;;  %v2141_v54 = vadd.f32 %v8604_v61, %v2140_v34 }
 0x701   : > { %v2159_v29 = vmax.f32 %v2149_v43, 0.0  ;;  %v8660_v4 = vadd.f32 %v2158_v62, %v2032_v31 }
 0x702   : > { %v8658_v20 = vadd.f32 %v2156_v1, %v2024_v21  ;;  %v2157_v27 = vmax.f32 %v2141_v54, 0.0 }
 0x703   : > { %v8662_v12 = vadd.f32 %v2159_v29, %v2035_v14  ;;  %v2190_v31 = vsel %vm1960_vm7, %v8660_v4, 0.0 }
 0x704   : > { %v2186_v38 = vsel %vm1960_vm7, %v8658_v20, 0.0  ;;  %v2165_v11 = vadd.f32 %v2157_v27, %v2027_v23  ;;  %v7586_v27 = vld [vmem:[%s10636_s1 + $0x58] sm:$0xff]  }
 0x705   : > { %v2187_v15 = vadd.f32 %v2186_v38, %v2185_v47  ;;  %v2437_v61 = vpack.c.bf16 %v8662_v12, %v8660_v4  ;;  %v2192_v23 = vsel %vm1960_vm7, %v8662_v12, 0.0  ;;  %v7587_v47 = vld [vmem:[%s10636_s1 + $0x60] sm:$0xff]  }
 0x706   : > { %v2188_v30 = vsel %vm1960_vm7, %v2165_v11, 0.0  ;;  %v2436_v39 = vpack.c.bf16 %v2165_v11, %v8658_v20 }
 0x707   : > { %v2189_v21 = vadd.f32 %v2188_v30, %v2187_v15  ;;  %2468 = vrot.lane.b32.xlu1 %v2437_v61, %s7701_s21 }
 0x708   : > { %2466 = vrot.lane.b32.xlu0 %v2436_v39, %s7701_s21 }
 0x709   : > { %v2191_v14 = vadd.f32 %v2190_v31, %v2189_v21  ;;  %v7588_v31 = vld [vmem:[%s10636_s1 + $0x68] sm:$0xff]  }
 0x70b   : > { %v2193_v60 = vadd.f32 %v2192_v23, %v2191_v14  ;;  %v7593_v23 = vld [vmem:[%s10636_s1 + $0x70] sm:$0xff]  }
 0x70c   : > { %7288 = vmatpush3.bf16.msra.mxu1 %v7593_v23 }
 0x70d   : > { %v2194_v42 = vrot.slane %v2193_v60, 4  ;;  %7289 = vmatprep.subr.bf16.mxu1 %v10649_v0 }
 0x70f   : > { %v2195_v62 = vadd.f32 %v2194_v42, %v2193_v60 }
 0x711   : > { %v2196_v43 = vrot.slane %v2195_v62, 2 }
 0x713   : > { %v2197_v34 = vadd.f32 %v2196_v43, %v2195_v62 }
 0x715   : > { %v2198_v1 = vrot.slane %v2197_v34, 1 }
 0x717   : > { %v2199_v54 = vadd.f32 %v2198_v1, %v2197_v34 }
 0x719   : > { %v2201_v29 = vmul.f32 0.015625, %v2199_v54 }
 0x71b   : > { %v2202_v25 = vpack.c.bf16 %v2201_v29, %v2201_v29 }
 0x71d   : > { %7250 = vmatmul.mubr.msk.bf16.vlgmr.msra.gmra.mrb[92].mxu0 %vm1960_vm7, %v2202_v25 }
 0x71e   : > { %7255 = vmatprep.mubr.msk.bf16.mxu0 %vm7699_vm4, %v10649_v0  ;;  %7254 = vmatpush3.bf16.msra.mxu0 %v7586_v27 }
 0x71f   : > { %7259 = vmatprep.subr.bf16.mxu0 %v7587_v47 }
 0x76a   : > { %v2463_v14 = vpop.permute.xlu0 %2462 }
 0x7f0   : > { %v2252_v38 = vpop.f32.mrb[92].mxu0 }
 0x7f1   : > { %v2258_v15 = vmax.f32 %v2252_v38, 0.0  ;;  %v7251_v61 = vpop.f32.mrb[93].mxu0 }
 0x7f2   : > { %v2255_v30 = vpop.f32.mrb[94].mxu0 }
 0x7f3   : > { %v2259_v39 = vpack.c.bf16 %v2258_v15, %v2258_v15  ;;  %v7252_v21 = vpop.f32.mrb[95].mxu0 }
 0x7f5   : > { %7256 = vmatmul.mubr.msk.bf16.vlgmr.msra.gmra.mrb[96].mxu0 %vm2266_vm9, %v2259_v39 }
 0x7f6   : > { %7260 = vmatpush3.bf16.msra.mxu0 %v7587_v47 }
 0x7f7   : > { %7261 = vmatprep.subr.bf16.mxu0 %v7588_v31 }
 0x7fa   : > { %7262 = vmatpush3.bf16.msra.mxu0 %v7588_v31 }
 0x7fb   : > { %7271 = vmatprep.subr.bf16.mxu0 %v2463_v14 }
 0x8c8   : > { %v2304_v60 = vpop.f32.mrb[96].mxu0 }
 0x8c9   : > { %v2310_v42 = vsub.f32 0.0, %v2304_v60  ;;  %v7257_v62 = vpop.f32.mrb[97].mxu0  ;;  %v2465_v60 = vpop.permute.xlu1 %2464 }
 0x8ca   : > { %v2307_v43 = vpop.f32.mrb[98].mxu0  ;;  %v7595_v62 = vld [vmem:[%s10636_s1 + $0x80] sm:$0xff]  }
 0x8cb   : > { %v2311_v34 = vmul.f32 1.442695, %v2310_v42  ;;  %v7258_v1 = vpop.f32.mrb[99].mxu0  ;;  %v7594_v42 = vld [vmem:[%s10636_s1 + $0x78] sm:$0xff]   ;;  %v7596_v43 = vld [vmem:[%s10636_s1 + $0x88] sm:$0xff]  }
 0x8cc   : > { %7290 = vmatpush3.bf16.msra.mxu1 %v7594_v42 }
 0x8cd   : > { %7685 = vpow2.f32 %v2311_v34 }
 0x8d7   : > { %v7686_v54 = vpop.eup %7685 }
 0x8d8   : > { %v2313_v29 = vadd.f32 1.0, %v7686_v54 }
 0x8da   : > { %7687 = vrcp.f32 %v2313_v29 }
 0x8e4   : > { %v7688_v25 = vpop.eup %7687 }
 0x8e5   : > { %v2318_v27 = vrot.slane %v7688_v25, %v8346_v50 }
 0x8e7   : > { %v2319_v47 = vmul.f32 %v2318_v27, %v8636_v32  ;;  %v2320_v38 = vmul.f32 %v2318_v27, %v8638_v55  ;;  %v2321_v15 = vmul.f32 %v2318_v27, %v8632_v41  ;;  %v2322_v61 = vmul.f32 %v2318_v27, %v8634_v63  ;;  %v2467_v63 = vpop.permute.xlu0 %2466  ;;  %v7589_v55 = vld [vmem:[%s10643_s8] sm:$0xff]  }
 0x8e8   : > { %v2323_v30 = vmul.f32 %v2318_v27, %v8658_v20  ;;  %v2324_v39 = vmul.f32 %v2318_v27, %v2165_v11  ;;  %v2325_v32 = vmul.f32 %v2318_v27, %v8660_v4  ;;  %v2326_v41 = vmul.f32 %v2318_v27, %v8662_v12  ;;  %v2469_v11 = vpop.permute.xlu1 %2468  ;;  %v7590_v4 = vld [vmem:[%s10643_s8 + $0x8] sm:$0xff]   ;;  %v7591_v12 = vld [vmem:[%s10643_s8 + $0x10] sm:$0xff]  }
 0x8e9   : > { %v2327_v21 = vpack.c.bf16 %v2320_v38, %v2319_v47  ;;  %v2328_v31 = vpack.c.bf16 %v2322_v61, %v2321_v15 }
 0x8ea   : > { %v2329_v23 = vpack.c.bf16 %v2324_v39, %v2323_v30  ;;  %v2330_v20 = vpack.c.bf16 %v2326_v41, %v2325_v32  ;;  %v7598_v32 = vld [vmem:[%s10636_s1 + $0x98] sm:$0xff]   ;;  %v2710_v41 = vld [vmem:[%s10638_s3] sm:$0xff] }
 0x8eb   : > { %7263 = vmatprep.mubr.msk.bf16.mxu0 %vm1960_vm7, %v2327_v21 }
 0x8ec   : > { %7264 = vmatmul.mubr.msk.bf16.vlgmr.msra.gmra.mrb[100].mxu0 %vm1960_vm7, %v2328_v31 }
 0x8ed   : > { %7272 = vmatpush3.bf16.msra.mxu0 %v2463_v14  ;;  %7267 = vmatprep.mubr.msk.bf16.mxu0 %vm1960_vm7, %v2329_v23  ;;  %v7592_v14 = vld [vmem:[%s10643_s8 + $0x18] sm:$0xff]  }
 0x8ee   : > { %7273 = vmatprep.subr.bf16.mxu0 %v2465_v60 }
 0x8f1   : > { %7274 = vmatpush3.bf16.msra.mxu0 %v2465_v60  ;;  %v7597_v60 = vld [vmem:[%s10636_s1 + $0x90] sm:$0xff]  }
 0x8f2   : > { %7275 = vmatprep.subr.bf16.mxu0 %v2467_v63 }
 0x8f4   : > { %7268 = vmatmul.mubr.msk.bf16.gmra.mrb[104].mxu0 %vm1960_vm7, %v2330_v20 }
 0x8f5   : > { %7276 = vmatpush3.bf16.msra.mxu0 %v2467_v63  ;;  %7279 = vmatprep.mubr.msk.bf16.mxu0 %vm2074_vm8, %v7589_v55  ;;  %v2714_v63 = vld [vmem:[%s10638_s3 + $0x20] sm:$0xff]  ;;  %v2711_v55 = vld [vmem:[%s10638_s3 + $0x8] sm:$0xff] }
 0x8f6   : > { %7277 = vmatprep.subr.bf16.mxu0 %v2469_v11  ;;  %v6488_v20 = vcombine.low %v2710_v41, %v2714_v63 }
 0x8f9   : > { %7278 = vmatpush3.bf16.msra.mxu0 %v2469_v11  ;;  %v6489_v11 = vcombine.high %v2710_v41, %v2714_v63  ;;  %v2758_v41 = vld [vmem:[%s10638_s3 + $0x180] sm:$0xff] }
 0x8fa   : > { %7295 = vmatprep.subr.bf16.mxu0 %v10649_v0  ;;  %v2762_v63 = vld [vmem:[%s10638_s3 + $0x1a0] sm:$0xff] }
 0x8fb   : > { %3095 = vmatprep.subr.bf16.mxu1 %v6489_v11  ;;  %v6478_v11 = vld [vmem:[%s10637_s2 + $0x5] ss:$0 sm:$0xff] }
 0x8fc   : > { %7280 = vmatmul.mubr.msk.bf16.vlgmr.msra.gmra.mrb[108].mxu0 %vm2074_vm8, %v7590_v4  ;;  %v2715_v4 = vld [vmem:[%s10638_s3 + $0x28] sm:$0xff] }
 0x8fd   : > { %7283 = vmatprep.mubr.msk.bf16.mxu0 %vm2074_vm8, %v7591_v12  ;;  %7296 = vmatpush3.bf16.msra.mxu0 %v7595_v62  ;;  %v2718_v12 = vld [vmem:[%s10638_s3 + $0x40] sm:$0xff]  ;;  %v6490_v42 = vcombine.low %v2711_v55, %v2715_v4  ;;  %v6491_v62 = vcombine.high %v2711_v55, %v2715_v4  ;;  %v6537_v55 = vcombine.high %v2758_v41, %v2762_v63 }
 0x8fe   : > { %7297 = vmatprep.subr.bf16.mxu0 %v10649_v0 }
 0x901   : > { %7298 = vmatpush3.bf16.msra.mxu0 %v7596_v43 }
 0x902   : > { %7299 = vmatprep.subr.bf16.mxu0 %v10649_v0 }
 0x904   : > { %7284 = vmatmul.mubr.msk.bf16.gmra.mrb[112].mxu0 %vm2074_vm8, %v7592_v14  ;;  %v2722_v14 = vld [vmem:[%s10638_s3 + $0x60] sm:$0xff] }
 0x905   : > { %7303 = vmatprep.mubr.msk.bf16.mxu0 %vm7699_vm4, %v10649_v0  ;;  %7300 = vmatpush3.bf16.msra.mxu0 %v7597_v60  ;;  %v6497_v43 = vcombine.high %v2718_v12, %v2722_v14 }
 0x906   : > { %7301 = vmatprep.subr.bf16.mxu0 %v10649_v0 }
 0x909   : > { %7302 = vmatpush3.bf16.msra.mxu0 %v7598_v32 }
 0x90a   : > { %3138 = vmatprep.subr.bf16.mxu0 %v6491_v62  ;;  %v2719_v62 = vld [vmem:[%s10638_s3 + $0x48] sm:$0xff] }
 0x9cf   : > { %v7281_v34 = vpop.f32.mrb[108].mxu0 }
 0x9d0   : > { %v2520_v1 = vpop.f32.mrb[109].mxu0 }
 0x9d1   : > { %v2551_v54 = vmax.f32 %v2520_v1, %v7281_v34  ;;  %v7282_v29 = vpop.f32.mrb[110].mxu0  ;;  %v6496_v34 = vcombine.low %v2718_v12, %v2722_v14  ;;  %v2726_v1 = vld [vmem:[%s10638_s3 + $0x80] sm:$0xff] }
 0x9d2   : > { %v2523_v25 = vpop.f32.mrb[111].mxu0 }
 0x9d3   : > { %v2552_v27 = vmax.f32 %v2523_v25, %v7282_v29 }
 0x9d7   : > { %v7285_v47 = vpop.f32.mrb[112].mxu0 }
 0x9d8   : > { %v2536_v38 = vpop.f32.mrb[113].mxu0 }
 0x9d9   : > { %v2553_v15 = vmax.f32 %v2536_v38, %v7285_v47  ;;  %v7286_v61 = vpop.f32.mrb[114].mxu0  ;;  %v2738_v47 = vld [vmem:[%s10638_s3 + $0xe0] sm:$0xff] }
 0x9da   : > { %v2539_v30 = vpop.f32.mrb[115].mxu0 }
 0x9db   : > { %v2555_v39 = vmax.f32 %v2551_v54, %v2553_v15  ;;  %v2554_v21 = vmax.f32 %v2539_v30, %v7286_v61  ;;  %v2730_v54 = vld [vmem:[%s10638_s3 + $0xa0] sm:$0xff] }
 0x9dc   : > { %v6505_v29 = vcombine.high %v2726_v1, %v2730_v54  ;;  %v6504_v25 = vcombine.low %v2726_v1, %v2730_v54  ;;  %v2742_v61 = vld [vmem:[%s10638_s3 + $0x100] sm:$0xff] }
 0x9dd   : > { %v2556_v31 = vmax.f32 %v2552_v27, %v2554_v21  ;;  %v2734_v27 = vld [vmem:[%s10638_s3 + $0xc0] sm:$0xff] }
 0x9de   : > { %v6513_v38 = vcombine.high %v2734_v27, %v2738_v47  ;;  %v6512_v15 = vcombine.low %v2734_v27, %v2738_v47  ;;  %v2746_v30 = vld [vmem:[%s10638_s3 + $0x120] sm:$0xff]  ;;  %v2727_v27 = vld [vmem:[%s10638_s3 + $0x88] sm:$0xff] }
 0x9df   : > { %v2561_v23 = vpack.c.bf16 %v2556_v31, %v2555_v39  ;;  %v6521_v39 = vcombine.high %v2742_v61, %v2746_v30  ;;  %v6520_v21 = vcombine.low %v2742_v61, %v2746_v30  ;;  %v2750_v31 = vld [vmem:[%s10638_s3 + $0x140] sm:$0xff]  ;;  %v2731_v47 = vld [vmem:[%s10638_s3 + $0xa8] sm:$0xff] }
 0x9e0   : > { %v2735_v61 = vld [vmem:[%s10638_s3 + $0xc8] sm:$0xff] }
 0x9e1   : > { %7292 = vmatmul.mubr.msk.bf16.vlgmr.msra.gmra.mrb[100].mxu1 %vm1960_vm7, %v2561_v23  ;;  %v2754_v23 = vld [vmem:[%s10638_s3 + $0x160] sm:$0xff]  ;;  %v2739_v30 = vld [vmem:[%s10638_s3 + $0xe8] sm:$0xff] }
 0x9e2   : > { %3096 = vmatpush1.bf16.msra.mxu1 %v6488_v20  ;;  %v6529_v60 = vcombine.high %v2750_v31, %v2754_v23  ;;  %v6528_v32 = vcombine.low %v2750_v31, %v2754_v23  ;;  %v6536_v20 = vcombine.low %v2758_v41, %v2762_v63  ;;  %v2743_v31 = vld [vmem:[%s10638_s3 + $0x108] sm:$0xff]  ;;  %v6514_v23 = vcombine.low %v2735_v61, %v2739_v30 }
 0x9e3   : > { %3097 = vmatprep.subr.bf16.mxu1 %v6497_v43  ;;  %v2723_v43 = vld [vmem:[%s10638_s3 + $0x68] sm:$0xff] }
 0x9e4   : > { %v2755_v41 = vld [vmem:[%s10638_s3 + $0x168] sm:$0xff] }
 0x9e6   : > { %3098 = vmatpush1.bf16.msra.mxu1 %v6496_v34 }
 0x9e7   : > { %3099 = vmatprep.subr.bf16.mxu1 %v6505_v29 }
 0x9ea   : > { %3100 = vmatpush1.bf16.msra.mxu1 %v6504_v25  ;;  %v6499_v25 = vcombine.high %v2719_v62, %v2723_v43 }
 0x9eb   : > { %3101 = vmatprep.subr.bf16.mxu1 %v6513_v38  ;;  %v6498_v38 = vcombine.low %v2719_v62, %v2723_v43  ;;  %v2766_v62 = vld [vmem:[%s10638_s3 + $0x1c0] sm:$0xff] }
 0x9ec   : > { %v2770_v43 = vld [vmem:[%s10638_s3 + $0x1e0] sm:$0xff] }
 0x9ee   : > { %3102 = vmatpush1.bf16.msra.mxu1 %v6512_v15  ;;  %v6507_v15 = vcombine.high %v2727_v27, %v2731_v47 }
 0x9ef   : > { %3103 = vmatprep.subr.bf16.mxu1 %v6521_v39  ;;  %v6506_v39 = vcombine.low %v2727_v27, %v2731_v47  ;;  %v2712_v27 = vld [vmem:[%s10638_s3 + $0x10] sm:$0xff] }
 0x9f0   : > { %v2716_v47 = vld [vmem:[%s10638_s3 + $0x30] sm:$0xff] }
 0x9f2   : > { %3104 = vmatpush1.bf16.msra.mxu1 %v6520_v21  ;;  %v6515_v21 = vcombine.high %v2735_v61, %v2739_v30  ;;  %v6492_v61 = vcombine.low %v2712_v27, %v2716_v47  ;;  %v6493_v30 = vcombine.high %v2712_v27, %v2716_v47  ;;  %v2733_v27 = vld [vmem:[%s10638_s3 + $0xb8] sm:$0xff] }
 0x9f3   : > { %3105 = vmatprep.subr.bf16.mxu1 %v6529_v60 }
 0x9f6   : > { %3106 = vmatpush1.bf16.msra.mxu1 %v6528_v32  ;;  %v2751_v32 = vld [vmem:[%s10638_s3 + $0x148] sm:$0xff] }
 0x9f7   : > { %3107 = vmatprep.subr.bf16.mxu1 %v6537_v55  ;;  %v6531_v55 = vcombine.high %v2751_v32, %v2755_v41 }
 0x9fa   : > { %3108 = vmatpush1.bf16.msra.mxu1 %v6536_v20  ;;  %v2759_v20 = vld [vmem:[%s10638_s3 + $0x188] sm:$0xff] }
 0xab4   : > { %v2618_v4 = vpop.f32.mrb[100].mxu1 }
 0xab5   : > { %v7293_v12 = vpop.f32.mrb[101].mxu1  ;;  %v2619_v34 = vadd.f32 %v6478_v11, %v2618_v4  ;;  %v6530_v4 = vcombine.low %v2751_v32, %v2755_v41  ;;  %v2720_v41 = vld [vmem:[%s10638_s3 + $0x50] sm:$0xff] }
 0xab6   : > { %v2621_v14 = vpop.f32.mrb[102].mxu1 }
 0xab7   : > { %v2622_v1 = vadd.f32 %v6478_v11, %v2621_v14  ;;  %v7294_v54 = vpop.f32.mrb[103].mxu1  ;;  %v2763_v11 = vld [vmem:[%s10638_s3 + $0x1a8] sm:$0xff] }
 0xab8   : > { %v6539_v12 = vcombine.high %v2759_v20, %v2763_v11  ;;  %v6538_v14 = vcombine.low %v2759_v20, %v2763_v11  ;;  %v6545_v54 = vcombine.high %v2766_v62, %v2770_v43  ;;  %v2721_v20 = vld [vmem:[%s10638_s3 + $0x58] sm:$0xff] }
 0xab9   : > { %v2633_v29 = vpack.c.bf16 %v2622_v1, %v2619_v34  ;;  %v2767_v34 = vld [vmem:[%s10638_s3 + $0x1c8] sm:$0xff]  ;;  %v6544_v1 = vcombine.low %v2766_v62, %v2770_v43  ;;  %v2725_v11 = vld [vmem:[%s10638_s3 + $0x78] sm:$0xff] }
 0xaba   : > { %3109 = vmatprep.subr.bf16.mxu1 %v6545_v54  ;;  %v2732_v54 = vld [vmem:[%s10638_s3 + $0xb0] sm:$0xff] }
 0xabb   : > { %7304 = vmatmul.mubr.msk.bf16.vlgmr.msra.gmra.mrb[116].mxu0 %vm2074_vm8, %v2633_v29  ;;  %v2771_v29 = vld [vmem:[%s10638_s3 + $0x1e8] sm:$0xff]  ;;  %3110 = vmatpush1.bf16.msra.mxu1 %v6544_v1  ;;  %v2728_v1 = vld [vmem:[%s10638_s3 + $0x90] sm:$0xff] }
 0xabc   : > { %3139 = vmatpush1.bf16.msra.mxu0 %v6490_v42  ;;  %v2747_v42 = vld [vmem:[%s10638_s3 + $0x128] sm:$0xff]  ;;  %3181 = vmatprep.subr.bf16.mxu1 %v6493_v30 }
 0xabd   : > { %3140 = vmatprep.subr.bf16.mxu0 %v6499_v25  ;;  %v6523_v60 = vcombine.high %v2743_v31, %v2747_v42  ;;  %v6522_v63 = vcombine.low %v2743_v31, %v2747_v42  ;;  %v10646_v25 = vmov 0  }
 0xabe   : > { %3127 = vmatprep.mubr.bf16.mxu1 %v10646_v25  ;;  %3170 = vmatprep.mubr.bf16.mxu0 %v10646_v25 }
 0xabf   : > { %7529 = vset.pattern.permute.xlu0 %v10646_v25 }
 0xac0   : > { %3141 = vmatpush1.bf16.msra.mxu0 %v6498_v38  ;;  %v6546_v38 = vcombine.low %v2767_v34, %v2771_v29 }
 0xac1   : > { %3142 = vmatprep.subr.bf16.mxu0 %v6507_v15  ;;  %v6547_v15 = vcombine.high %v2767_v34, %v2771_v29  ;;  %v6503_v34 = vcombine.high %v2721_v20, %v2725_v11  ;;  %v2729_v29 = vld [vmem:[%s10638_s3 + $0x98] sm:$0xff] }
 0xac2   : > { %v6511_v30 = vcombine.high %v2729_v29, %v2733_v27 }
 0xac4   : > { %3143 = vmatpush1.bf16.msra.mxu0 %v6506_v39  ;;  %v2713_v39 = vld [vmem:[%s10638_s3 + $0x18] sm:$0xff] }
 0xac5   : > { %3144 = vmatprep.subr.bf16.mxu0 %v6515_v21  ;;  %v2717_v21 = vld [vmem:[%s10638_s3 + $0x38] sm:$0xff] }
 0xac6   : > { %v6494_v31 = vcombine.low %v2713_v39, %v2717_v21  ;;  %v6495_v42 = vcombine.high %v2713_v39, %v2717_v21  ;;  %v2736_v39 = vld [vmem:[%s10638_s3 + $0xd0] sm:$0xff] }
 0xac7   : > { %v2740_v21 = vld [vmem:[%s10638_s3 + $0xf0] sm:$0xff] }
 0xac8   : > { %3145 = vmatpush1.bf16.msra.mxu0 %v6514_v23  ;;  %v6482_v23 = vld [vmem:[%s10637_s2 + $0x6] ss:$0 sm:$0xff] }
 0xac9   : > { %3146 = vmatprep.subr.bf16.mxu0 %v6523_v60 }
 0xacc   : > { %3147 = vmatpush1.bf16.msra.mxu0 %v6522_v63 }
 0xacd   : > { %3148 = vmatprep.subr.bf16.mxu0 %v6531_v55  ;;  %v2724_v55 = vld [vmem:[%s10638_s3 + $0x70] sm:$0xff] }
 0xace   : > { %v6501_v43 = vcombine.high %v2720_v41, %v2724_v55  ;;  %v6500_v47 = vcombine.low %v2720_v41, %v2724_v55  ;;  %v2744_v41 = vld [vmem:[%s10638_s3 + $0x110] sm:$0xff]  ;;  %v2745_v55 = vld [vmem:[%s10638_s3 + $0x118] sm:$0xff] }
 0xad0   : > { %3149 = vmatpush1.bf16.msra.mxu0 %v6530_v4 }
 0xad1   : > { %3150 = vmatprep.subr.bf16.mxu0 %v6539_v12 }
 0xad4   : > { %3151 = vmatpush1.bf16.msra.mxu0 %v6538_v14 }
 0xad5   : > { %3152 = vmatprep.subr.bf16.mxu0 %v6547_v15  ;;  %v6509_v15 = vcombine.high %v2728_v1, %v2732_v54 }
 0xad8   : > { %3153 = vmatpush1.bf16.msra.mxu0 %v6546_v38  ;;  %v6502_v38 = vcombine.low %v2721_v20, %v2725_v11  ;;  %v2749_v20 = vld [vmem:[%s10638_s3 + $0x138] sm:$0xff]  ;;  %v6516_v11 = vcombine.low %v2736_v39, %v2740_v21 }
 0xad9   : > { %3224 = vmatprep.subr.bf16.mxu0 %v6495_v42  ;;  %v2737_v42 = vld [vmem:[%s10638_s3 + $0xd8] sm:$0xff] }
 0xb8e   : > { %v2702_v60 = vpop.f32.mrb[116].mxu0 }
 0xb8f   : > { %v7305_v32 = vpop.f32.mrb[117].mxu0  ;;  %v2703_v4 = vadd.f32 %v6482_v23, %v2702_v60  ;;  %v6517_v60 = vcombine.high %v2736_v39, %v2740_v21  ;;  %v2761_v39 = vld [vmem:[%s10638_s3 + $0x198] sm:$0xff] }
 0xb90   : > { %v2705_v63 = vpop.f32.mrb[118].mxu0  ;;  %v2765_v21 = vld [vmem:[%s10638_s3 + $0x1b8] sm:$0xff] }
 0xb91   : > { %v2706_v12 = vadd.f32 %v6482_v23, %v2705_v63  ;;  %v7306_v14 = vpop.f32.mrb[119].mxu0  ;;  %v6510_v23 = vcombine.low %v2729_v29, %v2733_v27  ;;  %v2748_v63 = vld [vmem:[%s10638_s3 + $0x130] sm:$0xff]  ;;  %v6526_v27 = vcombine.low %v2745_v55, %v2749_v20 }
 0xb92   : > { %v6527_v14 = vcombine.high %v2745_v55, %v2749_v20  ;;  %v6524_v29 = vcombine.low %v2744_v41, %v2748_v63  ;;  %v6542_v20 = vcombine.low %v2761_v39, %v2765_v21 }
 0xb93   : > { %v8872_v62 = vpack.c.bf16 %v2706_v12, %v2703_v4  ;;  %v6525_v12 = vcombine.high %v2744_v41, %v2748_v63  ;;  %v2769_v41 = vld [vmem:[%s10638_s3 + $0x1d8] sm:$0xff] }
 0xb94   : > { %v2773_v63 = vld [vmem:[%s10638_s3 + $0x1f8] sm:$0xff] }
 0xb95   : > { %3128 = vmatmul.mubr.bf16.vlgmr.msra.gmra.mrb[104].mxu1 %v8872_v62  ;;  %3171 = vmatmul.mubr.bf16.vlgmr.msra.gmra.mrb[120].mxu0 %v8872_v62 }
 0xb96   : > { %3182 = vmatpush1.bf16.msra.mxu1 %v6492_v61  ;;  %3225 = vmatpush1.bf16.msra.mxu0 %v6494_v31  ;;  %v2741_v61 = vld [vmem:[%s10638_s3 + $0xf8] sm:$0xff]  ;;  %v6508_v31 = vcombine.low %v2728_v1, %v2732_v54 }
 0xb97   : > { %3183 = vmatprep.subr.bf16.mxu1 %v6501_v43  ;;  %3226 = vmatprep.subr.bf16.mxu0 %v6503_v34  ;;  %v6519_v32 = vcombine.high %v2737_v42, %v2741_v61  ;;  %v6518_v4 = vcombine.low %v2737_v42, %v2741_v61  ;;  %v2752_v43 = vld [vmem:[%s10638_s3 + $0x150] sm:$0xff]  ;;  %v2753_v1 = vld [vmem:[%s10638_s3 + $0x158] sm:$0xff] }
 0xb98   : > { %3213 = vmatprep.mubr.bf16.mxu1 %v10646_v25  ;;  %3256 = vmatprep.mubr.bf16.mxu0 %v10646_v25  ;;  %v2756_v34 = vld [vmem:[%s10638_s3 + $0x170] sm:$0xff]  ;;  %v2757_v54 = vld [vmem:[%s10638_s3 + $0x178] sm:$0xff] }
 0xb99   : > { %v6532_v42 = vcombine.low %v2752_v43, %v2756_v34  ;;  %v6534_v61 = vcombine.low %v2753_v1, %v2757_v54 }
 0xb9a   : > { %3184 = vmatpush1.bf16.msra.mxu1 %v6500_v47  ;;  %3227 = vmatpush1.bf16.msra.mxu0 %v6502_v38  ;;  %v6533_v47 = vcombine.high %v2752_v43, %v2756_v34  ;;  %v6535_v38 = vcombine.high %v2753_v1, %v2757_v54  ;;  %v8953_v43 = vadd.s32 8, %v8343_v49  ;;  %v10651_v34 = vand.u32 3, %v8343_v49 }
 0xb9b   : > { %3185 = vmatprep.subr.bf16.mxu1 %v6509_v15  ;;  %3228 = vmatprep.subr.bf16.mxu0 %v6511_v30  ;;  %v2760_v15 = vld [vmem:[%s10638_s3 + $0x190] sm:$0xff] }
 0xb9c   : > { %v2764_v30 = vld [vmem:[%s10638_s3 + $0x1b0] sm:$0xff]  ;;  %10741 = vst [vmem:[#allocation36_spill] sm:$0xff] %v8953_v43  ;;  %v10648_v1 = vand.u32 3, %v8953_v43  ;;  %vm3300_vm10 = vcmp.ne.s32.totalorder %v10651_v34, 3 }
 0xb9d   : > { %v6540_v55 = vcombine.low %v2760_v15, %v2764_v30 }
 0xb9e   : > { %3186 = vmatpush1.bf16.msra.mxu1 %v6508_v31  ;;  %3229 = vmatpush1.bf16.msra.mxu0 %v6510_v23  ;;  %v6541_v31 = vcombine.high %v2760_v15, %v2764_v30  ;;  %v6543_v23 = vcombine.high %v2761_v39, %v2765_v21  ;;  %vm3301_vm11 = vcmp.ne.s32.totalorder %v10648_v1, 3 }
 0xb9f   : > { %3187 = vmatprep.subr.bf16.mxu1 %v6517_v60  ;;  %3230 = vmatprep.subr.bf16.mxu0 %v6519_v32  ;;  %v2768_v60 = vld [vmem:[%s10638_s3 + $0x1d0] sm:$0xff]  ;;  %v6555_v30 = vsel %vm3301_vm11, 1.0, %v10649_v0 }
 0xba0   : > { %v2772_v32 = vld [vmem:[%s10638_s3 + $0x1f0] sm:$0xff] }
 0xba2   : > { %3188 = vmatpush1.bf16.msra.mxu1 %v6516_v11  ;;  %3231 = vmatpush1.bf16.msra.mxu0 %v6518_v4  ;;  %v6549_v11 = vcombine.high %v2768_v60, %v2772_v32  ;;  %v6551_v4 = vcombine.high %v2769_v41, %v2773_v63 }
 0xba3   : > { %3189 = vmatprep.subr.bf16.mxu1 %v6525_v12  ;;  %3232 = vmatprep.subr.bf16.mxu0 %v6527_v14  ;;  %v6548_v12 = vcombine.low %v2768_v60, %v2772_v32  ;;  %v6550_v14 = vcombine.low %v2769_v41, %v2773_v63 }
 0xba6   : > { %3190 = vmatpush1.bf16.msra.mxu1 %v6524_v29  ;;  %3233 = vmatpush1.bf16.msra.mxu0 %v6526_v27 }
 0xba7   : > { %3191 = vmatprep.subr.bf16.mxu1 %v6533_v47  ;;  %3234 = vmatprep.subr.bf16.mxu0 %v6535_v38  ;;  %v6554_v38 = vsel %vm3300_vm10, 1.0, %v10649_v0 }
 0xbaa   : > { %3192 = vmatpush1.bf16.msra.mxu1 %v6532_v42  ;;  %3235 = vmatpush1.bf16.msra.mxu0 %v6534_v61 }
 0xbab   : > { %3193 = vmatprep.subr.bf16.mxu1 %v6541_v31  ;;  %3236 = vmatprep.subr.bf16.mxu0 %v6543_v23 }
 0xbae   : > { %3194 = vmatpush1.bf16.msra.mxu1 %v6540_v55  ;;  %3237 = vmatpush1.bf16.msra.mxu0 %v6542_v20 }
 0xbaf   : > { %3195 = vmatprep.subr.bf16.mxu1 %v6549_v11  ;;  %3238 = vmatprep.subr.bf16.mxu0 %v6551_v4 }
 0xbb2   : > { %3196 = vmatpush1.bf16.msra.mxu1 %v6548_v12  ;;  %3239 = vmatpush1.bf16.msra.mxu0 %v6550_v14 }
 0xbb5   : > { %3214 = vmatmul.mubr.bf16.vlgmr.msra.gmra.mrb[108].mxu1 %v8872_v62  ;;  %3257 = vmatmul.mubr.bf16.vlgmr.msra.gmra.mrb[124].mxu0 %v8872_v62 }
 0xc68   : > { %v8961_v54 = vpop.f32.mrb[104].mxu1  ;;  %v8963_v29 = vpop.f32.mrb[120].mxu0 }
 0xc69   : > { %v8965_v27 = vpop.f32.mrb[105].mxu1  ;;  %v8967_v62 = vpop.f32.mrb[121].mxu0  ;;  %v3481_v39 = vrot.slane %v8961_v54, 1  ;;  %v3377_v21 = vrot.slane %v8963_v29, 1 }
 0xc6a   : > { %v8969_v47 = vpop.f32.mrb[106].mxu1  ;;  %v8972_v15 = vpop.f32.mrb[122].mxu0  ;;  %v10654_v60 = vrot.slane %v8965_v27, 7  ;;  %v10652_v32 = vrot.slane %v8967_v62, 7 }
 0xc6b   : > { %v3482_v42 = vrot.slane %v8969_v47, 1  ;;  %v3378_v61 = vrot.slane %v8972_v15, 1  ;;  %v3135_v31 = vpop.f32.mrb[107].mxu1  ;;  %v3178_v23 = vpop.f32.mrb[123].mxu0 }
 0xc6c   : > { %v3436_v41 = vrot.slane %v3135_v31, 7  ;;  %v3309_v63 = vrot.slane %v3178_v23, 7 }
 0xc6d   : > { %v3483_v55 = vsel %vm3376_vm12, %v3481_v39, %v3482_v42  ;;  %v3486_v20 = vsel %vm3376_vm12, %v3482_v42, 0.0  ;;  %v3379_v11 = vsel %vm3376_vm12, %v3377_v21, %v3378_v61  ;;  %v3382_v4 = vsel %vm3376_vm12, %v3378_v61, 0.0 }
 0xc6e   : > { %v3487_v12 = vmul.f32 %v6554_v38, %v3483_v55  ;;  %v3383_v14 = vmul.f32 %v6554_v38, %v3379_v11  ;;  %v3488_v10 = vmul.f32 %v6555_v30, %v3486_v20  ;;  %v3384_v25 = vmul.f32 %v6555_v30, %v3382_v4 }
 0xc6f   : > { %v8988_v1 = vsel %vm1057_vm5, %v10652_v32, %v3309_v63  ;;  %v8993_v0 = vsel %vm1057_vm5, %v10654_v60, %v3436_v41 }
 0xc70   : > { %v3489_v39 = vadd.f32 %v3487_v12, %v8965_v27  ;;  %v3490_v42 = vadd.f32 %v3488_v10, %v3135_v31  ;;  %v3386_v21 = vadd.f32 %v3384_v25, %v3178_v23  ;;  %v3385_v61 = vadd.f32 %v3383_v14, %v8967_v62 }
 0xc72   : > { %v3493_v55 = vrot.slane %v3489_v39, 4  ;;  %v3494_v11 = vrot.slane %v3490_v42, 4 }
 0xc74   : > { %v3495_v20 = vsel %vm700_vm2, %v3493_v55, %v3494_v11 }
 0xc88   : > { %v8998_v4 = vpop.f32.mrb[108].mxu1  ;;  %v3258_v34 = vpop.f32.mrb[124].mxu0 }
 0xc89   : > { %v9000_v63 = vpop.f32.mrb[109].mxu1  ;;  %v3260_v32 = vpop.f32.mrb[125].mxu0  ;;  %v3469_v12 = vrot.slane %v8998_v4, 1  ;;  %v3389_v10 = vrot.slane %v3258_v34, 1 }
 0xc8a   : > { %v3332_v50 = vrot.slane %v3260_v32, 7  ;;  %v9002_v37 = vpop.f32.mrb[110].mxu1  ;;  %v3262_v41 = vpop.f32.mrb[126].mxu0  ;;  %v3411_v39 = vrot.slane %v9000_v63, 7 }
 0xc8b   : > { %v3470_v25 = vrot.slane %v9002_v37, 1  ;;  %v3390_v31 = vrot.slane %v3262_v41, 1  ;;  %v3221_v23 = vpop.f32.mrb[111].mxu1  ;;  %v3264_v14 = vpop.f32.mrb[127].mxu0 }
 0xc8c   : > { %v3412_v42 = vrot.slane %v3221_v23, 7  ;;  %v3333_v55 = vrot.slane %v3264_v14, 7  ;;  %3335 = vrot.lane.b32.xlu0 %v3332_v50, %s7703_s17 }
 0xc8d   : > { %v3471_v60 = vsel %vm3376_vm12, %v3469_v12, %v3470_v25  ;;  %v3474_v16 = vsel %vm3376_vm12, %v3470_v25, 0.0  ;;  %v3391_v28 = vsel %vm3376_vm12, %v3389_v10, %v3390_v31  ;;  %v3394_v2 = vsel %vm3376_vm12, %v3390_v31, 0.0 }
 0xc8e   : > { %v3475_v52 = vmul.f32 %v6554_v38, %v3471_v60  ;;  %v3395_v7 = vmul.f32 %v6554_v38, %v3391_v28  ;;  %v3476_v22 = vmul.f32 %v6555_v30, %v3474_v16  ;;  %v3396_v26 = vmul.f32 %v6555_v30, %v3394_v2 }
 0xc8f   : > { %v3334_v17 = vsel %vm1057_vm5, %v3332_v50, %v3333_v55  ;;  %v3413_v24 = vsel %vm1057_vm5, %v3411_v39, %v3412_v42  ;;  %v3498_v25 = vsel %vm700_vm2, %v3494_v11, 0.0 }
 0xc90   : > { %v3397_v36 = vadd.f32 %v3395_v7, %v3260_v32  ;;  %v3478_v18 = vadd.f32 %v3476_v22, %v3221_v23  ;;  %v3398_v6 = vadd.f32 %v3396_v26, %v3264_v14  ;;  %3337 = vrot.lane.b32.xlu1 %v3334_v17, %s7703_s17  ;;  %v3477_v12 = vadd.f32 %v3475_v52, %v9000_v63 }
 0xc91   : > { %v10742_v26 = vand.u32 3, %v8343_v49  ;;  %v10743_v17 = vmov 0.0   ;;  %v10744_v52 = vand.u32 3, %v8953_v43 }
 0xc92   : > { %v3401_v10 = vrot.slane %v3397_v36, 4  ;;  %v3500_v58 = vadd.f32 %v3498_v25, %v3478_v18  ;;  %v3402_v31 = vrot.slane %v3398_v6, 4  ;;  %v3499_v60 = vadd.f32 %v3495_v20, %v3477_v12 }
 0xc93   : > { %vm3294_vm13 = vcmp.ne.s32.totalorder %v10742_v26, 0  ;;  %vm3295_vm14 = vcmp.ne.s32.totalorder %v10744_v52, 0 }
 0xc94   : > { %v3403_v16 = vsel %vm700_vm2, %v3401_v10, %v3402_v31  ;;  %v3406_v2 = vsel %vm700_vm2, 0.0, %v3401_v10  ;;  %v7484_v50 = vpack.i.bf16 %v3500_v58, %v3499_v60  ;;  %v6552_v22 = vsel %vm3294_vm13, 1.0, %v10743_v17 }
 0xc95   : > { %v3407_v28 = vadd.f32 %v3406_v2, %v3385_v61  ;;  %v3408_v38 = vadd.f32 %v3403_v16, %v3386_v21  ;;  %v6553_v30 = vsel %vm3295_vm14, 1.0, %v10743_v17  ;;  %v10745_v21 = vrot.slane %v8967_v62, 7 }
 0xc96   : > { %v10746_v61 = vrot.slane %v8965_v27, 7 }
 0xc97   : > { %v7479_v7 = vpack.i.bf16 %v3408_v38, %v3407_v28 }
 0xcfe   : > { %v3336_v36 = vpop.permute.xlu0 %3335 }
 0xcff   : > { %v3341_v6 = vsel %vm1057_vm5, 0.0, %v3336_v36 }
 0xd00   : > { %v3342_v18 = vmul.f32 %v6552_v22, %v3341_v6 }
 0xd02   : > { %v3338_v32 = vpop.permute.xlu1 %3337  ;;  %3346 = vrot.lane.b32.xlu0 %v3342_v18, %s7703_s17 }
 0xd03   : > { %v3343_v58 = vmul.f32 %v6553_v30, %v3338_v32 }
 0xd05   : > { %3348 = vrot.lane.b32.xlu1 %v3343_v58, %s7703_s17 }
 0xd06   : > { %3311 = vrot.lane.b32.xlu0 %v10745_v21, %s7703_s17 }
 0xd09   : > { %3313 = vrot.lane.b32.xlu1 %v8988_v1, %s7703_s17 }
 0xd0a   : > { %3438 = vrot.lane.b32.xlu0 %v10746_v61, %s7703_s17 }
 0xd0d   : > { %3440 = vrot.lane.b32.xlu1 %v8993_v0, %s7703_s17 }
 0xd74   : > { %v3347_v11 = vpop.permute.xlu0 %3346 }
 0xd75   : > { %v3352_v20 = vadd.f32 %v3347_v11, %v3258_v34 }
 0xd77   : > { %v3356_v63 = vrot.slane %v3352_v20, 4  ;;  %v3349_v23 = vpop.permute.xlu1 %3348 }
 0xd78   : > { %v3353_v14 = vadd.f32 %v3349_v23, %v3262_v41  ;;  %v3312_v42 = vpop.permute.xlu0 %3311 }
 0xd79   : > { %3359 = vrot.lane.b32.xlu0 %v3356_v63, %s7703_s17  ;;  %v3317_v55 = vsel %vm1057_vm5, 0.0, %v3312_v42 }
 0xd7a   : > { %v3357_v62 = vrot.slane %v3353_v14, 4  ;;  %v3318_v27 = vmul.f32 %v6552_v22, %v3317_v55  ;;  %v7599_v55 = vld [vmem:[%s10640_s5] sm:$0xff]  }
 0xd7b   : > { %v3314_v0 = vpop.permute.xlu1 %3313  ;;  %7315 = vmatprep.mubr.msk.bf16.mxu0 %vm2074_vm8, %v7599_v55 }
 0xd7c   : > { %v3358_v1 = vsel %vm700_vm2, %v3356_v63, %v3357_v62  ;;  %v3439_v12 = vpop.permute.xlu0 %3438  ;;  %v3319_v41 = vmul.f32 %v6553_v30, %v3314_v0 }
 0xd7d   : > { %3361 = vrot.lane.b32.xlu1 %v3358_v1, %s7703_s17  ;;  %3414 = vrot.lane.b32.xlu0 %v3411_v39, %s7703_s17  ;;  %v3444_v34 = vsel %vm1057_vm5, 0.0, %v3439_v12 }
 0xd7e   : > { %v3445_v25 = vmul.f32 %v6552_v22, %v3444_v34 }
 0xd7f   : > { %v3441_v10 = vpop.permute.xlu1 %3440 }
 0xd80   : > { %v3446_v28 = vmul.f32 %v6553_v30, %v3441_v10 }
 0xd81   : > { %3416 = vrot.lane.b32.xlu1 %v3413_v24, %s7703_s17  ;;  %3322 = vrot.lane.b32.xlu0 %v3318_v27, %s7703_s17 }
 0xd85   : > { %3324 = vrot.lane.b32.xlu1 %v3319_v41, %s7703_s17  ;;  %3449 = vrot.lane.b32.xlu0 %v3445_v25, %s7703_s17 }
 0xdeb   : > { %v3360_v31 = vpop.permute.xlu0 %3359 }
 0xdec   : > { %v3364_v60 = vsel %vm700_vm2, 0.0, %v3360_v31  ;;  %v7604_v31 = vld [vmem:[%s10636_s1 + $0xa8] sm:$0xff]  }
 0xded   : > { %3366 = vrot.lane.b32.xlu0 %v3364_v60, %s7703_s17 }
 0xdef   : > { %v3362_v39 = vpop.permute.xlu1 %3361  ;;  %v3415_v16 = vpop.permute.xlu0 %3414 }
 0xdf0   : > { %v3420_v2 = vsel %vm1057_vm5, 0.0, %v3415_v16  ;;  %3368 = vrot.lane.b32.xlu1 %v3362_v39, %s7703_s17 }
 0xdf1   : > { %v3421_v24 = vmul.f32 %v6552_v22, %v3420_v2 }
 0xdf3   : > { %v3417_v38 = vpop.permute.xlu1 %3416  ;;  %3425 = vrot.lane.b32.xlu0 %v3421_v24, %s7703_s17  ;;  %v3323_v52 = vpop.permute.xlu0 %3322  ;;  %v7600_v24 = vld [vmem:[%s10640_s5 + $0x8] sm:$0xff]  }
 0xdf4   : > { %3451 = vrot.lane.b32.xlu1 %v3446_v28, %s7703_s17  ;;  %v3422_v26 = vmul.f32 %v6553_v30, %v3417_v38  ;;  %v3328_v32 = vadd.f32 %v3323_v52, %v8963_v29  ;;  %v7601_v28 = vld [vmem:[%s10640_s5 + $0x10] sm:$0xff]   ;;  %v7602_v38 = vld [vmem:[%s10640_s5 + $0x18] sm:$0xff]  }
 0xdf5   : > { %v7605_v52 = vld [vmem:[%s10636_s1 + $0xb0] sm:$0xff]  }
 0xdf7   : > { %7480 = vrot.lane.b32.xlu0 %v7479_v7, %s7703_s17  ;;  %v3450_v36 = vpop.permute.xlu0 %3449  ;;  %v3325_v6 = vpop.permute.xlu1 %3324 }
 0xdf8   : > { %3427 = vrot.lane.b32.xlu1 %v3422_v26, %s7703_s17  ;;  %v3329_v22 = vadd.f32 %v3325_v6, %v8972_v15  ;;  %v3455_v11 = vadd.f32 %v3450_v36, %v8961_v54  ;;  %v10747_v26 = vmov 0   ;;  %v7606_v36 = vld [vmem:[%s10636_s1 + $0xb8] sm:$0xff]   ;;  %v6463_v6 = vld [vmem:[%s10637_s2 + $0x4] ss:$0 sm:$0xff] }
 0xdfc   : > { %7485 = vrot.lane.b32.xlu1 %v7484_v50, %s7703_s17  ;;  %v3459_v50 = vrot.slane %v3455_v11, 4 }
 0xe5f   : > { %v3367_v18 = vpop.permute.xlu0 %3366 }
 0xe60   : > { %v3372_v21 = vadd.f32 %v3367_v18, %v3328_v32  ;;  %v6556_v18 = vld [vmem:[%s10637_s2 + $0x7] ss:$0 sm:$0xff] }
 0xe61   : > { %v7433_v32 = vadd.f32 %v6556_v18, %v6463_v6 }
 0xe62   : > { %v3369_v58 = vpop.permute.xlu1 %3368 }
 0xe63   : > { %v3373_v61 = vadd.f32 %v3369_v58, %v3329_v22 }
 0xe65   : > { %v3525_v30 = vpack.c.bf16 %v3373_v61, %v3372_v21  ;;  %v3426_v20 = vpop.permute.xlu0 %3425 }
 0xe66   : > { %v3452_v7 = vpop.permute.xlu1 %3451  ;;  %v3431_v42 = vadd.f32 %v3426_v20, %v8998_v4 }
 0xe67   : > { %v3456_v63 = vadd.f32 %v3452_v7, %v8969_v47  ;;  %3559 = vrot.lane.b32.xlu0 %v3525_v30, %s7703_s17 }
 0xe69   : > { %v3460_v23 = vrot.slane %v3456_v63, 4  ;;  %v7481_v14 = vpop.permute.xlu0 %7480 }
 0xe6a   : > { %v7483_v29 = vunpack.i.h.bf16 %v7481_v14  ;;  %v7482_v62 = vunpack.i.l.bf16 %v7481_v14  ;;  %v3428_v15 = vpop.permute.xlu1 %3427 }
 0xe6b   : > { %v3461_v54 = vsel %vm700_vm2, %v3459_v50, %v3460_v23  ;;  %v3464_v1 = vsel %vm700_vm2, %v3460_v23, 0.0  ;;  %v3432_v47 = vadd.f32 %v3428_v15, %v9002_v37  ;;  %v7603_v37 = vld [vmem:[%s10636_s1 + $0xa0] sm:$0xff]  }
 0xe6c   : > { %v3526_v12 = vpack.c.bf16 %v7483_v29, %v7482_v62  ;;  %v3465_v27 = vadd.f32 %v3461_v54, %v3431_v42  ;;  %7323 = vmatprep.subr.bf16.mxu1 %v7603_v37 }
 0xe6d   : > { %v3466_v0 = vadd.f32 %v3464_v1, %v3432_v47  ;;  %7324 = vmatpush3.bf16.msra.mxu1 %v7603_v37 }
 0xe6e   : > { %v7486_v34 = vpop.permute.xlu1 %7485  ;;  %3561 = vrot.lane.b32.xlu1 %v3526_v12, %s7703_s17  ;;  %7325 = vmatprep.subr.bf16.mxu1 %v7604_v31 }
 0xe6f   : > { %v7488_v4 = vunpack.i.h.bf16 %v7486_v34  ;;  %v7487_v41 = vunpack.i.l.bf16 %v7486_v34  ;;  %v3527_v25 = vpack.c.bf16 %v3466_v0, %v3465_v27  ;;  %v7607_v0 = vld [vmem:[%s10639_s4] ss:$16 sps:$4 sm:$0xff]   ;;  %v7609_v34 = vld [vmem:[%s10639_s4 + $0x4] ss:$16 sps:$4 sm:$0xff]  }
 0xe71   : > { %3563 = vrot.lane.b32.xlu0 %v3527_v25, %s7703_s17  ;;  %v3528_v10 = vpack.c.bf16 %v7488_v4, %v7487_v41  ;;  %7326 = vmatpush3.bf16.msra.mxu1 %v7604_v31  ;;  %v7612_v4 = vld [vmem:[%s10639_s4 + $0xc] ss:$16 sps:$4 sm:$0xff]   ;;  %v9120_v41 = vld [vmem:[%s10637_s2 + $0x8] ss:$0 sm:$0xff] }
 0xe72   : > { %7327 = vmatprep.subr.bf16.mxu1 %v7605_v52 }
 0xe73   : > { %3565 = vrot.lane.b32.xlu1 %v3528_v10, %s7703_s17 }
 0xe75   : > { %7328 = vmatpush3.bf16.msra.mxu1 %v7605_v52 }
 0xe76   : > { %7329 = vmatprep.subr.bf16.mxu1 %v7606_v36 }
 0xe79   : > { %7330 = vmatpush3.bf16.msra.mxu1 %v7606_v36 }
 0xe7a   : > { %7339 = vmatprep.subr.bf16.mxu1 %v7603_v37 }
 0xed9   : > { %v3560_v60 = vpop.permute.xlu0 %3559 }
 0xeda   : > { %7307 = vmatprep.subr.bf16.mxu0 %v3560_v60 }
 0xedb   : > { %7308 = vmatpush3.bf16.msra.mxu0 %v3560_v60 }
 0xee0   : > { %v3562_v39 = vpop.permute.xlu1 %3561 }
 0xee1   : > { %7309 = vmatprep.subr.bf16.mxu0 %v3562_v39 }
 0xee2   : > { %7310 = vmatpush3.bf16.msra.mxu0 %v3562_v39 }
 0xee3   : > { %v3564_v16 = vpop.permute.xlu0 %3563 }
 0xee4   : > { %7311 = vmatprep.subr.bf16.mxu0 %v3564_v16 }
 0xee5   : > { %v3566_v2 = vpop.permute.xlu1 %3565 }
 0xee6   : > { %7312 = vmatpush3.bf16.msra.mxu0 %v3564_v16 }
 0xee7   : > { %7313 = vmatprep.subr.bf16.mxu0 %v3566_v2 }
 0xeea   : > { %7314 = vmatpush3.bf16.msra.mxu0 %v3566_v2 }
 0xeeb   : > { %3994 = vmatprep.subr.bf16.mxu0 %v7609_v34  ;;  %v7628_v34 = vld [vmem:[%s10639_s4 + $0x68] ss:$16 sps:$4 sm:$0xff]  }
 0xeed   : > { %7316 = vmatmul.mubr.msk.bf16.vlgmr.msra.gmra.mrb[100].mxu0 %vm2074_vm8, %v7600_v24 }
 0xeee   : > { %7319 = vmatprep.mubr.msk.bf16.mxu0 %vm2074_vm8, %v7601_v28  ;;  %3995 = vmatpush1.bf16.msra.mxu0 %v7607_v0  ;;  %v7627_v0 = vld [vmem:[%s10639_s4 + $0x64] ss:$16 sps:$4 sm:$0xff]  }
 0xef5   : > { %7320 = vmatmul.mubr.msk.bf16.gmra.mrb[104].mxu0 %vm2074_vm8, %v7602_v38 }
 0xef6   : > { %4026 = vmatprep.mubr.bf16.mxu0 %v10747_v26 }
 0xfc0   : > { %v7317_v22 = vpop.f32.mrb[100].mxu0 }
 0xfc1   : > { %v7427_v58 = vadd.f32 %v7317_v22, %v6463_v6  ;;  %v3617_v21 = vpop.f32.mrb[101].mxu0 }
 0xfc2   : > { %v7429_v61 = vadd.f32 %v6463_v6, %v3617_v21  ;;  %v7318_v11 = vpop.f32.mrb[102].mxu0 }
 0xfc3   : > { %v7428_v30 = vadd.f32 %v7427_v58, %v6556_v18  ;;  %v7432_v20 = vadd.f32 %v7433_v32, %v7318_v11  ;;  %v3620_v7 = vpop.f32.mrb[103].mxu0 }
 0xfc4   : > { %v7430_v63 = vadd.f32 %v7429_v61, %v6556_v18  ;;  %v7434_v50 = vadd.f32 %v7433_v32, %v3620_v7  ;;  %v7610_v18 = vld [vmem:[%s10639_s4 + $0x8] ss:$16 sps:$4 sm:$0xff]  }
 0xfc5   : > { %v3666_v23 = vpack.c.bf16 %v7432_v20, %v7428_v30 }
 0xfc6   : > { %v3665_v14 = vpack.c.bf16 %v7434_v50, %v7430_v63 }
 0xfc8   : > { %v7321_v42 = vpop.f32.mrb[104].mxu0  ;;  %7331 = vmatprep.mubr.msk.bf16.mxu1 %vm2074_vm8, %v3665_v14 }
 0xfc9   : > { %v3633_v29 = vpop.f32.mrb[105].mxu0  ;;  %7332 = vmatmul.mubr.msk.bf16.vlgmr.msra.gmra.mrb[112].mxu1 %vm2074_vm8, %v3666_v23  ;;  %v7436_v15 = vadd.f32 %v7433_v32, %v7321_v42 }
 0xfca   : > { %v7322_v62 = vpop.f32.mrb[106].mxu0  ;;  %7340 = vmatpush3.bf16.msra.mxu1 %v7603_v37  ;;  %v7438_v1 = vadd.f32 %v7433_v32, %v3633_v29  ;;  %v7613_v29 = vld [vmem:[%s10639_s4 + $0x20] ss:$16 sps:$4 sm:$0xff]  }
 0xfcb   : > { %v7440_v55 = vadd.f32 %v7433_v32, %v7322_v62  ;;  %v3636_v54 = vpop.f32.mrb[107].mxu0  ;;  %7341 = vmatprep.subr.bf16.mxu1 %v7604_v31  ;;  %v7615_v62 = vld [vmem:[%s10639_s4 + $0x24] ss:$16 sps:$4 sm:$0xff]  }
 0xfcc   : > { %v7442_v47 = vadd.f32 %v7433_v32, %v3636_v54  ;;  %3996 = vmatprep.subr.bf16.mxu0 %v7615_v62  ;;  %v7619_v54 = vld [vmem:[%s10639_s4 + $0x40] ss:$16 sps:$4 sm:$0xff]  }
 0xfcd   : > { %v3668_v12 = vpack.c.bf16 %v7440_v55, %v7436_v15  ;;  %v7616_v15 = vld [vmem:[%s10639_s4 + $0x28] ss:$16 sps:$4 sm:$0xff]   ;;  %v7618_v55 = vld [vmem:[%s10639_s4 + $0x2c] ss:$16 sps:$4 sm:$0xff]   ;;  %3997 = vmatpush1.bf16.msra.mxu0 %v7613_v29 }
 0xfce   : > { %v3667_v27 = vpack.c.bf16 %v7442_v47, %v7438_v1  ;;  %7342 = vmatpush3.bf16.msra.mxu1 %v7604_v31  ;;  %v7621_v1 = vld [vmem:[%s10639_s4 + $0x44] ss:$16 sps:$4 sm:$0xff]   ;;  %v7622_v47 = vld [vmem:[%s10639_s4 + $0x48] ss:$16 sps:$4 sm:$0xff]  }
 0xfcf   : > { %7343 = vmatprep.subr.bf16.mxu1 %v7605_v52  ;;  %3998 = vmatprep.subr.bf16.mxu0 %v7621_v1 }
 0xfd0   : > { %7335 = vmatprep.mubr.msk.bf16.mxu1 %vm2074_vm8, %v3667_v27  ;;  %v7625_v27 = vld [vmem:[%s10639_s4 + $0x60] ss:$16 sps:$4 sm:$0xff]  }
 0xfd1   : > { %7336 = vmatmul.mubr.msk.bf16.gmra.mrb[116].mxu1 %vm2074_vm8, %v3668_v12  ;;  %v7624_v12 = vld [vmem:[%s10639_s4 + $0x4c] ss:$16 sps:$4 sm:$0xff]   ;;  %3999 = vmatpush1.bf16.msra.mxu0 %v7619_v54 }
 0xfd2   : > { %7344 = vmatpush3.bf16.msra.mxu1 %v7605_v52  ;;  %4000 = vmatprep.subr.bf16.mxu0 %v7627_v0 }
 0xfd3   : > { %7345 = vmatprep.subr.bf16.mxu1 %v7606_v36 }
 0xfd5   : > { %4001 = vmatpush1.bf16.msra.mxu0 %v7625_v27 }
 0xfd6   : > { %7346 = vmatpush3.bf16.msra.mxu1 %v7606_v36 }
 0xfd7   : > { %4067 = vmatprep.subr.bf16.mxu1 %v7612_v4  ;;  %v7630_v4 = vld [vmem:[%s10639_s4 + $0x6c] ss:$16 sps:$4 sm:$0xff]  }
0x109c   : > { %v7333_v25 = vpop.f32.mrb[112].mxu1 }
0x109d   : > { %v3745_v10 = vpop.f32.mrb[113].mxu1  ;;  %v9126_v60 = vadd.f32 %v7333_v25, %v9120_v41 }
0x109e   : > { %v9123_v37 = vadd.f32 %v9120_v41, %v3745_v10  ;;  %v7334_v31 = vpop.f32.mrb[114].mxu1 }
0x109f   : > { %v9129_v39 = vadd.f32 %v7334_v31, %v9120_v41  ;;  %v3748_v16 = vpop.f32.mrb[115].mxu1  ;;  %v3778_v52 = vmax.f32 %v9126_v60, 0.0 }
0x10a0   : > { %v9132_v2 = vadd.f32 %v9120_v41, %v3748_v16  ;;  %v3776_v28 = vmax.f32 %v9123_v37, 0.0 }
0x10a1   : > { %v3779_v24 = vmax.f32 %v9129_v39, 0.0 }
0x10a2   : > { %v3777_v38 = vmax.f32 %v9132_v2, 0.0 }
0x10a3   : > { %v3785_v32 = vpack.c.bf16 %v3779_v24, %v3778_v52 }
0x10a4   : > { %v3784_v36 = vpack.c.bf16 %v3777_v38, %v3776_v28  ;;  %v7337_v6 = vpop.f32.mrb[116].mxu1 }
0x10a5   : > { %v3761_v22 = vpop.f32.mrb[117].mxu1  ;;  %v9146_v61 = vadd.f32 %v7337_v6, %v9120_v41 }
0x10a6   : > { %v9142_v58 = vadd.f32 %v9120_v41, %v3761_v22  ;;  %v7338_v21 = vpop.f32.mrb[118].mxu1  ;;  %7347 = vmatprep.mubr.msk.bf16.mxu1 %vm2074_vm8, %v3784_v36 }
0x10a7   : > { %v9149_v11 = vadd.f32 %v7338_v21, %v9120_v41  ;;  %v3764_v30 = vpop.f32.mrb[119].mxu1  ;;  %7348 = vmatmul.mubr.msk.bf16.vlgmr.msra.gmra.mrb[120].mxu1 %vm2074_vm8, %v3785_v32  ;;  %v3782_v23 = vmax.f32 %v9146_v61, 0.0 }
0x10a8   : > { %v9153_v20 = vadd.f32 %v9120_v41, %v3764_v30  ;;  %4068 = vmatpush1.bf16.msra.mxu1 %v7610_v18  ;;  %v3780_v63 = vmax.f32 %v9142_v58, 0.0 }
0x10a9   : > { %v3783_v7 = vmax.f32 %v9149_v11, 0.0  ;;  %4069 = vmatprep.subr.bf16.mxu1 %v7618_v55 }
0x10aa   : > { %v3781_v50 = vmax.f32 %v9153_v20, 0.0 }
0x10ab   : > { %v3787_v42 = vpack.c.bf16 %v3783_v7, %v3782_v23 }
0x10ac   : > { %v3786_v14 = vpack.c.bf16 %v3781_v50, %v3780_v63  ;;  %4070 = vmatpush1.bf16.msra.mxu1 %v7616_v15 }
0x10ad   : > { %4071 = vmatprep.subr.bf16.mxu1 %v7624_v12 }
0x10ae   : > { %7351 = vmatprep.mubr.msk.bf16.mxu1 %vm2074_vm8, %v3786_v14 }
0x10af   : > { %7352 = vmatmul.mubr.msk.bf16.gmra.mrb[124].mxu1 %vm2074_vm8, %v3787_v42 }
0x10b0   : > { %4099 = vmatprep.mubr.bf16.mxu1 %v10747_v26  ;;  %4072 = vmatpush1.bf16.msra.mxu1 %v7622_v47 }
0x10b1   : > { %4073 = vmatprep.subr.bf16.mxu1 %v7630_v4 }
0x10b4   : > { %4074 = vmatpush1.bf16.msra.mxu1 %v7628_v34 }
0x117a   : > { %v7349_v25 = vpop.f32.mrb[120].mxu1 }
0x117b   : > { %v3843_v10 = vadd.f32 %v7349_v25, %v9120_v41  ;;  %v3834_v31 = vpop.f32.mrb[121].mxu1  ;;  %v9243_v25 = vadd.s32 16, %v8343_v49 }
0x117c   : > { %v3835_v16 = vadd.f32 %v9120_v41, %v3834_v31  ;;  %v7350_v24 = vpop.f32.mrb[122].mxu1  ;;  %v9249_v31 = vadd.s32 32, %v8343_v49 }
0x117d   : > { %v3867_v28 = vmax.f32 %v3843_v10, 0.0  ;;  %v3846_v38 = vadd.f32 %v7350_v24, %v9120_v41  ;;  %v3837_v52 = vpop.f32.mrb[123].mxu1  ;;  %10753 = vst [vmem:[#allocation40_spill] sm:$0xff] %v9243_v25  ;;  %v9246_v10 = vadd.s32 24, %v8343_v49 }
0x117e   : > { %v3865_v36 = vmax.f32 %v3835_v16, 0.0  ;;  %v3838_v6 = vadd.f32 %v9120_v41, %v3837_v52  ;;  %10755 = vst [vmem:[#allocation42_spill] sm:$0xff] %v9249_v31 }
0x117f   : > { %v3868_v18 = vmax.f32 %v3846_v38, 0.0  ;;  %v3875_v22 = vadd.f32 %v3867_v28, %v9126_v60  ;;  %10754 = vst [vmem:[#allocation41_spill] sm:$0xff] %v9246_v10 }
0x1180   : > { %v3866_v32 = vmax.f32 %v3838_v6, 0.0  ;;  %v3873_v30 = vadd.f32 %v3865_v36, %v9123_v37 }
0x1181   : > { %v3876_v21 = vadd.f32 %v3868_v18, %v9129_v39 }
0x1182   : > { %v3874_v7 = vadd.f32 %v3866_v32, %v9132_v2  ;;  %v7353_v63 = vpop.f32.mrb[124].mxu1 }
0x1183   : > { %v3899_v50 = vpack.c.bf16 %v3876_v21, %v3875_v22  ;;  %v3859_v23 = vadd.f32 %v7353_v63, %v9120_v41  ;;  %v3850_v14 = vpop.f32.mrb[125].mxu1 }
0x1184   : > { %v3898_v42 = vpack.c.bf16 %v3874_v7, %v3873_v30  ;;  %v3851_v29 = vadd.f32 %v9120_v41, %v3850_v14  ;;  %v7354_v62 = vpop.f32.mrb[126].mxu1 }
0x1185   : > { %v3871_v15 = vmax.f32 %v3859_v23, 0.0  ;;  %v3862_v55 = vadd.f32 %v7354_v62, %v9120_v41  ;;  %v3853_v54 = vpop.f32.mrb[127].mxu1 }
0x1186   : > { %v3869_v60 = vmax.f32 %v3851_v29, 0.0  ;;  %v3854_v39 = vadd.f32 %v9120_v41, %v3853_v54  ;;  %6594 = vmatmul.mubr.msk.bf16.vlgmr.msra.gmra.mrb[128].mxu0 %vm2074_vm8, %v3898_v42  ;;  %6598 = vmatmul.mubr.msk.bf16.vlgmr.msra.gmra.mrb[128].mxu1 %vm2074_vm8, %v3898_v42 }
0x1187   : > { %v3872_v37 = vmax.f32 %v3862_v55, 0.0  ;;  %4036 = vmatprep.mubr.bf16.mxu0 %v10747_v26  ;;  %4109 = vmatprep.mubr.bf16.mxu1 %v10747_v26  ;;  %v3879_v1 = vadd.f32 %v3871_v15, %v9146_v61 }
0x1188   : > { %v3870_v2 = vmax.f32 %v3854_v39, 0.0  ;;  %v3877_v12 = vadd.f32 %v3869_v60, %v9142_v58  ;;  %v10655_v58 = vand.u32 7, %v8343_v49 }
0x1189   : > { %v3880_v47 = vadd.f32 %v3872_v37, %v9149_v11 }
0x118a   : > { %v3878_v27 = vadd.f32 %v3870_v2, %v9153_v20  ;;  %vm9233_vm15 = vcmp.ne.s32.totalorder %v10655_v58, 7 }
0x118b   : > { %v3901_v0 = vpack.c.bf16 %v3880_v47, %v3879_v1  ;;  %v9299_v2 = vsel %vm9233_vm15, 1.0, %v10743_v17 }
0x118c   : > { %v3900_v41 = vpack.c.bf16 %v3878_v27, %v3877_v12 }
0x118e   : > { %6595 = vmatmul.mubr.msk.bf16.gmra.mrb[132].mxu0 %vm2074_vm8, %v3899_v50  ;;  %6599 = vmatmul.mubr.msk.bf16.gmra.mrb[132].mxu1 %vm2074_vm8, %v3899_v50 }
0x118f   : > { %4046 = vmatprep.mubr.bf16.mxu0 %v10747_v26  ;;  %4119 = vmatprep.mubr.bf16.mxu1 %v10747_v26 }
0x1196   : > { %6596 = vmatmul.mubr.msk.bf16.gmra.mrb[136].mxu0 %vm2074_vm8, %v3900_v41  ;;  %6600 = vmatmul.mubr.msk.bf16.gmra.mrb[136].mxu1 %vm2074_vm8, %v3900_v41 }
0x1197   : > { %4056 = vmatprep.mubr.bf16.mxu0 %v10747_v26  ;;  %4129 = vmatprep.mubr.bf16.mxu1 %v10747_v26 }
0x119e   : > { %6597 = vmatmul.mubr.msk.bf16.gmra.mrb[140].mxu0 %vm2074_vm8, %v3901_v0  ;;  %6601 = vmatmul.mubr.msk.bf16.gmra.mrb[140].mxu1 %vm2074_vm8, %v3901_v0 }
0x1259   : > { %v4028_v61 = vpop.f32.mrb[128].mxu0  ;;  %v9229_v11 = vpop.f32.mrb[128].mxu1 }
0x125a   : > { %10748 = vst [vmem:[#allocation37_spill] sm:$0xff] %v9229_v11  ;;  %v9237_v34 = vpop.f32.mrb[129].mxu0  ;;  %v9239_v4 = vpop.f32.mrb[129].mxu1  ;;  %v4722_v26 = vrot.slane %v9229_v11, 7  ;;  %v4818_v16 = vrot.slane %v4028_v61, 7  ;;  %v4904_v24 = vrot.slane %v9229_v11, 1 }
0x125b   : > { %10751 = vst [vmem:[#allocation38_spill] sm:$0xff] %v9237_v34  ;;  %10752 = vst [vmem:[#allocation39_spill] sm:$0xff] %v9239_v4  ;;  %v4597_v28 = vrot.slane %v9239_v4, 1  ;;  %v9253_v38 = vpop.f32.mrb[130].mxu0  ;;  %v9255_v52 = vpop.f32.mrb[130].mxu1  ;;  %v4298_v36 = vrot.slane %v9237_v34, 7 }
0x125c   : > { %10756 = vst [vmem:[#allocation43_spill] sm:$0xff] %v9253_v38  ;;  %10757 = vst [vmem:[#allocation44_spill] sm:$0xff] %v9255_v52  ;;  %v4819_v6 = vrot.slane %v9253_v38, 7  ;;  %v4723_v18 = vrot.slane %v9255_v52, 7  ;;  %v10657_v32 = vrot.slane %v9255_v52, 1  ;;  %v9261_v22 = vpop.f32.mrb[131].mxu0  ;;  %4737 = vrot.lane.b32.xlu0 %v4722_v26, %s7704_s22 }
0x125d   : > { %10758 = vst [vmem:[#allocation45_spill] sm:$0xff] %v9261_v22  ;;  %v9264_v21 = vpop.f32.mrb[131].mxu1  ;;  %v4393_v30 = vrot.slane %v9239_v4, 7  ;;  %v4299_v7 = vrot.slane %v9261_v22, 7  ;;  %v10656_v63 = vrot.slane %v9261_v22, 1  ;;  %4313 = vrot.lane.b32.xlu1 %v4298_v36, %s7704_s22  ;;  %v4524_v14 = vrot.slane %v9237_v34, 1 }
0x125e   : > { %10759 = vst [vmem:[#allocation46_spill] sm:$0xff] %v9264_v21  ;;  %v4394_v50 = vrot.slane %v9264_v21, 7  ;;  %v4598_v23 = vrot.slane %v9264_v21, 1  ;;  %v4820_v42 = vsel %vm1057_vm5, %v4818_v16, %v4819_v6  ;;  %v4724_v29 = vsel %vm1057_vm5, %v4722_v26, %v4723_v18 }
0x125f   : > { %v9278_v62 = vsel %vm3376_vm12, %v4904_v24, %v10657_v32  ;;  %v4300_v55 = vsel %vm1057_vm5, %v4298_v36, %v4299_v7  ;;  %v9289_v60 = vsel %vm3376_vm12, %v4524_v14, %v10656_v63  ;;  %v4976_v47 = vrot.slane %v9253_v38, 1 }
0x1260   : > { %v4395_v15 = vsel %vm1057_vm5, %v4393_v30, %v4394_v50  ;;  %v9283_v54 = vsel %vm3376_vm12, %v4597_v28, %v4598_v23  ;;  %4406 = vrot.lane.b32.xlu0 %v4393_v30, %s7704_s22  ;;  %10760 = vst [vmem:[#allocation47_spill] sm:$0xff] %v9289_v60  ;;  %v9319_v30 = vadd.s32 40, %v8343_v49 }
0x1261   : > { %4833 = vrot.lane.b32.xlu1 %v4820_v42, %s7704_s22  ;;  %v9292_v39 = vpop.f32.mrb[132].mxu0  ;;  %v9294_v37 = vpop.f32.mrb[132].mxu1  ;;  %v4619_v5 = vmul.f32 %v9299_v2, %v9283_v54 }
0x1262   : > { %10761 = vst [vmem:[#allocation48_spill] sm:$0xff] %v9292_v39  ;;  %10762 = vst [vmem:[#allocation49_spill] sm:$0xff] %v9294_v37  ;;  %v4821_v12 = vrot.slane %v9292_v39, 7  ;;  %v4725_v27 = vrot.slane %v9294_v37, 7  ;;  %v9305_v0 = vpop.f32.mrb[133].mxu0  ;;  %v9307_v41 = vpop.f32.mrb[133].mxu1 }
0x1263   : > { %10763 = vst [vmem:[#allocation50_spill] sm:$0xff] %v9307_v41  ;;  %v4301_v16 = vrot.slane %v9305_v0, 7  ;;  %v4396_v24 = vrot.slane %v9307_v41, 7  ;;  %v9314_v28 = vpop.f32.mrb[134].mxu0  ;;  %v9316_v36 = vpop.f32.mrb[134].mxu1  ;;  %10764 = vst [vmem:[#allocation51_spill] sm:$0xff] %v9319_v30 }
0x1264   : > { %v4600_v42 = vrot.slane %v9307_v41, 1  ;;  %v4823_v58 = vrot.slane %v9314_v28, 7  ;;  %v4727_v63 = vrot.slane %v9316_v36, 7  ;;  %v9325_v26 = vpop.f32.mrb[135].mxu0  ;;  %4739 = vrot.lane.b32.xlu0 %v4724_v29, %s7704_s22  ;;  %v9328_v61 = vpop.f32.mrb[135].mxu1  ;;  %v4822_v20 = vsel %vm1057_vm5, %v4819_v6, %v4821_v12 }
0x1265   : > { %10765 = vst [vmem:[#allocation52_spill] sm:$0xff] %v9328_v61  ;;  %v4303_v1 = vrot.slane %v9325_v26, 7  ;;  %v4398_v32 = vrot.slane %v9328_v61, 7  ;;  %v4602_v14 = vrot.slane %v9328_v61, 1  ;;  %4408 = vrot.lane.b32.xlu1 %v4395_v15, %s7704_s22  ;;  %v4726_v33 = vsel %vm1057_vm5, %v4723_v18, %v4725_v27 }
0x1266   : > { %v4397_v48 = vsel %vm1057_vm5, %v4394_v50, %v4396_v24  ;;  %v4728_v29 = vsel %vm1057_vm5, %v4725_v27, %v4727_v63  ;;  %v9340_v51 = vsel %vm1057_vm5, %v4299_v7, %v4301_v16  ;;  %v9346_v19 = vsel %vm1057_vm5, %v4821_v12, %v4823_v58 }
0x1267   : > { %v9343_v56 = vsel %vm1057_vm5, %v4396_v24, %v4398_v32  ;;  %v9349_v3 = vsel %vm1057_vm5, %v4301_v16, %v4303_v1  ;;  %v9353_v6 = vsel %vm3376_vm12, %v4598_v23, %v4600_v42  ;;  %v9356_v18 = vsel %vm3376_vm12, %v4600_v42, %v4602_v14 }
0x1268   : > { %4835 = vrot.lane.b32.xlu0 %v4822_v20, %s7704_s22  ;;  %v10766_v7 = vrot.slane %v9292_v39, 1  ;;  %v10767_v15 = vrot.slane %v9294_v37, 1  ;;  %v10768_v12 = vrot.slane %v9255_v52, 1  ;;  %v10770_v16 = vand.u32 7, %v8953_v43 }
0x1269   : > { %4315 = vrot.lane.b32.xlu1 %v4300_v55, %s7704_s22  ;;  %v9371_v20 = vpop.f32.mrb[136].mxu0  ;;  %v9373_v23 = vpop.f32.mrb[136].mxu1  ;;  %v4529_v60 = vrot.slane %v9325_v26, 1 }
0x126a   : > { %v9361_v50 = vsel %vm3376_vm12, %v4976_v47, %v10766_v7  ;;  %v9368_v27 = vsel %vm3376_vm12, %v10768_v12, %v10767_v15  ;;  %10769 = vst [vmem:[#allocation53_spill] sm:$0xff] %v9373_v23  ;;  %vm9377_vm0 = vcmp.ne.s32.totalorder %v10770_v16, 7  ;;  %v10773_v47 = vand.u32 7, %v9243_v25  ;;  %v9403_v13 = vpop.f32.mrb[137].mxu1 }
0x126b   : > { %v10776_v7 = vand.u32 7, %v9246_v10  ;;  %v10779_v15 = vand.u32 7, %v9249_v31  ;;  %v4825_v16 = vrot.slane %v9371_v20, 7  ;;  %v4729_v53 = vrot.slane %v9373_v23, 7  ;;  %10783 = vst [vmem:[#allocation55_spill] sm:$0xff] %v9403_v13  ;;  %v9414_v59 = vpop.f32.mrb[138].mxu1 }
0x126c   : > { %vm9383_vm1 = vcmp.ne.s32.totalorder %v10773_v47, 7  ;;  %v9401_v47 = vpop.f32.mrb[137].mxu0  ;;  %v4604_v57 = vrot.slane %v9403_v13, 1  ;;  %v4731_v45 = vrot.slane %v9414_v59, 7  ;;  %4741 = vrot.lane.b32.xlu0 %v4726_v33, %s7704_s22  ;;  %v9425_v34 = vpop.f32.mrb[139].mxu1 }
0x126d   : > { %vm9389_vm2 = vcmp.ne.s32.totalorder %v10776_v7, 7  ;;  %vm9395_vm3 = vcmp.ne.s32.totalorder %v10779_v15, 7  ;;  %10782 = vst [vmem:[#allocation54_spill] sm:$0xff] %v9401_v47  ;;  %v9407_v7 = vadd.s32 48, %v8343_v49  ;;  %v4305_v8 = vrot.slane %v9401_v47, 7  ;;  %v9412_v40 = vpop.f32.mrb[138].mxu0  ;;  %4633 = vrot.lane.b32.xlu1 %v4619_v5, %s7703_s17 }
0x126e   : > { %v4400_v15 = vrot.slane %v9403_v13, 7  ;;  %v4827_v35 = vrot.slane %v9412_v40, 7  ;;  %v9423_v9 = vpop.f32.mrb[139].mxu0  ;;  %10786 = vst [vmem:[#allocation58_spill] sm:$0xff] %v9425_v34  ;;  %v4402_v54 = vrot.slane %v9425_v34, 7  ;;  %v4606_v44 = vrot.slane %v9425_v34, 1 }
0x126f   : > { %10784 = vst [vmem:[#allocation56_spill] sm:$0xff] %v9407_v7  ;;  %10785 = vst [vmem:[#allocation57_spill] sm:$0xff] %v9423_v9  ;;  %v4307_v38 = vrot.slane %v9423_v9, 7  ;;  %v9436_v11 = vsel %vm1057_vm5, %v4823_v58, %v4825_v16  ;;  %v9439_v33 = vsel %vm1057_vm5, %v4729_v53, %v4731_v45  ;;  %v9442_v13 = vsel %vm1057_vm5, %v4727_v63, %v4729_v53 }
0x1270   : > { %v9433_v46 = vsel %vm1057_vm5, %v4398_v32, %v4400_v15  ;;  %v9445_v52 = vsel %vm3376_vm12, %v4602_v14, %v4604_v57  ;;  %v9448_v61 = vsel %vm1057_vm5, %v4303_v1, %v4305_v8  ;;  %v9454_v32 = vsel %vm1057_vm5, %v4825_v16, %v4827_v35  ;;  %4410 = vrot.lane.b32.xlu0 %v4397_v48, %s7704_s22 }
0x1271   : > { %v9451_v5 = vsel %vm1057_vm5, %v4305_v8, %v4307_v38  ;;  %v9458_v58 = vsel %vm1057_vm5, %v4400_v15, %v4402_v54  ;;  %v9461_v53 = vsel %vm3376_vm12, %v4604_v57, %v4606_v44  ;;  %v10787_v14 = vrot.slane %v9314_v28, 1  ;;  %4743 = vrot.lane.b32.xlu1 %v4728_v29, %s7704_s22  ;;  %v9472_v16 = vpop.f32.mrb[140].mxu0  ;;  %v9474_v48 = vpop.f32.mrb[140].mxu1 }
0x1272   : > { %v10788_v1 = vrot.slane %v9292_v39, 1  ;;  %10790 = vst [vmem:[#allocation60_spill] sm:$0xff] %v9474_v48  ;;  %v9479_v57 = vsel %vm9377_vm0, 1.0, %v10743_v17  ;;  %v10791_v15 = vrot.slane %v9305_v0, 1  ;;  %v10792_v63 = vrot.slane %v9261_v22, 1  ;;  %v9497_v41 = vpop.f32.mrb[141].mxu0 }
0x1273   : > { %v10795_v29 = vrot.slane %v9294_v37, 1  ;;  %v4829_v34 = vrot.slane %v9472_v16, 7  ;;  %v4733_v24 = vrot.slane %v9474_v48, 7  ;;  %10797 = vst [vmem:[#allocation63_spill] sm:$0xff] %v9497_v41  ;;  %v9499_v21 = vpop.f32.mrb[141].mxu1  ;;  %v9514_v37 = vpop.f32.mrb[142].mxu0 }
0x1274   : > { %v9469_v8 = vsel %vm3376_vm12, %v10788_v1, %v10787_v14  ;;  %v9486_v39 = vsel %vm3376_vm12, %v10792_v63, %v10791_v15  ;;  %v10794_v14 = vrot.slane %v9316_v36, 1  ;;  %10798 = vst [vmem:[#allocation64_spill] sm:$0xff] %v9499_v21  ;;  %v9504_v63 = vsel %vm9383_vm1, 1.0, %v10743_v17  ;;  %v9516_v31 = vpop.f32.mrb[142].mxu1  ;;  %4317 = vrot.lane.b32.xlu0 %v9340_v51, %s7704_s22  ;;  %v9527_v4 = vpop.f32.mrb[143].mxu0 }
0x1275   : > { %10789 = vst [vmem:[#allocation59_spill] sm:$0xff] %v9469_v8  ;;  %10793 = vst [vmem:[#allocation61_spill] sm:$0xff] %v9486_v39  ;;  %v9509_v15 = vsel %vm9389_vm2, 1.0, %v10743_v17  ;;  %v4608_v22 = vrot.slane %v9499_v21, 1  ;;  %v9521_v42 = vsel %vm9395_vm3, 1.0, %v10743_v17  ;;  %v4831_v10 = vrot.slane %v9514_v37, 7  ;;  %4412 = vrot.lane.b32.xlu1 %v9343_v56, %s7704_s22 }
0x1276   : > { %v9493_v1 = vsel %vm3376_vm12, %v10795_v29, %v10794_v14  ;;  %v4309_v14 = vrot.slane %v9497_v41, 7  ;;  %v4404_v29 = vrot.slane %v9499_v21, 7  ;;  %v4735_v55 = vrot.slane %v9516_v31, 7  ;;  %v4137_v25 = vpop.f32.mrb[143].mxu1 }
0x1277   : > { %10796 = vst [vmem:[#allocation62_spill] sm:$0xff] %v9493_v1  ;;  %v10799_v21 = vand.u32 7, %v9319_v30  ;;  %v10802_v12 = vand.u32 7, %v9407_v7  ;;  %v4911_v1 = vrot.slane %v9373_v23, 1  ;;  %v4311_v39 = vrot.slane %v9527_v4, 7 }
0x1278   : > { %v4610_v51 = vrot.slane %v4137_v25, 1  ;;  %v4830_v30 = vsel %vm1057_vm5, %v4827_v35, %v4829_v34  ;;  %v4983_v8 = vrot.slane %v9412_v40, 1  ;;  %v4405_v7 = vsel %vm1057_vm5, %v4402_v54, %v4404_v29  ;;  %4837 = vrot.lane.b32.xlu0 %v9346_v19, %s7704_s22 }
0x1279   : > { %vm9531_vm4 = vcmp.ne.s32.totalorder %v10799_v21, 7  ;;  %vm9537_vm6 = vcmp.ne.s32.totalorder %v10802_v12, 7  ;;  %v4981_v21 = vrot.slane %v9371_v20, 1  ;;  %v9550_v12 = vsel %vm1057_vm5, %v4731_v45, %v4733_v24  ;;  %4319 = vrot.lane.b32.xlu1 %v9349_v3, %s7704_s22 }
0x127a   : > { %v9554_v23 = vsel %vm1057_vm5, %v4829_v34, %v4831_v10  ;;  %v9557_v25 = vsel %vm1057_vm5, %v4307_v38, %v4309_v14  ;;  %v9560_v56 = vsel %vm3376_vm12, %v4606_v44, %v4608_v22  ;;  %v4531_v35 = vrot.slane %v9401_v47, 1 }
0x127b   : > { %v9566_v54 = vsel %vm1057_vm5, %v4733_v24, %v4735_v55  ;;  %v9569_v45 = vsel %vm1057_vm5, %v4309_v14, %v4311_v39  ;;  %v9572_v34 = vsel %vm3376_vm12, %v4608_v22, %v4610_v51  ;;  %v4913_v10 = vrot.slane %v9414_v59, 1 }
0x127c   : > { %v4985_v38 = vrot.slane %v9472_v16, 1  ;;  %v4620_v44 = vmul.f32 %v9479_v57, %v9353_v6  ;;  %v10805_v19 = vrot.slane %v9316_v36, 1  ;;  %v4915_v39 = vrot.slane %v9474_v48, 1 }
0x127d   : > { %v10806_v14 = vrot.slane %v9314_v28, 1  ;;  %v9593_v55 = vsel %vm3376_vm12, %v4981_v21, %v4983_v8  ;;  %v4533_v3 = vrot.slane %v9423_v9, 1  ;;  %v4621_v6 = vmul.f32 %v9504_v63, %v9356_v18 }
0x127e   : > { %v9583_v24 = vsel %vm3376_vm12, %v10805_v19, %v4911_v1  ;;  %v6615_v51 = vsel %vm9531_vm4, 1.0, %v10743_v17  ;;  %v6616_v19 = vsel %vm9537_vm6, 1.0, %v10743_v17  ;;  %v4535_v22 = vrot.slane %v9497_v41, 1  ;;  %4635 = vrot.lane.b32.xlu0 %v4620_v44, %s7703_s17 }
0x127f   : > { %v9590_v29 = vsel %vm3376_vm12, %v10806_v14, %v4981_v21  ;;  %v10807_v21 = vrot.slane %v9305_v0, 1  ;;  %v4532_v18 = vsel %vm3376_vm12, %v4529_v60, %v4531_v35  ;;  %4637 = vrot.lane.b32.xlu1 %v4621_v6, %s7703_s17  ;;  %v4914_v14 = vsel %vm3376_vm12, %v4911_v1, %v4913_v10 }
0x1280   : > { %v9617_v49 = vmul.f32 %v9509_v15, %v4532_v18  ;;  %v9621_v44 = vmul.f32 %v9521_v42, %v4914_v14  ;;  %v4916_v41 = vsel %vm3376_vm12, %v4913_v10, %v4915_v39  ;;  %v4534_v18 = vsel %vm3376_vm12, %v4531_v35, %v4533_v3 }
0x1281   : > { %v4530_v48 = vsel %vm3376_vm12, %v10807_v21, %v4529_v60  ;;  %v4986_v21 = vsel %vm3376_vm12, %v4983_v8, %v4985_v38  ;;  %v10808_v60 = vrot.slane %v9514_v37, 1  ;;  %v9628_v6 = vmul.f32 %v6615_v51, %v4916_v41 }
0x1282   : > { %v9614_v43 = vmul.f32 %v9504_v63, %v4530_v48  ;;  %v9630_v48 = vmul.f32 %v6615_v51, %v4986_v21  ;;  %4414 = vrot.lane.b32.xlu0 %v9433_v46, %s7704_s22  ;;  %v9638_v1 = vmul.f32 %v9521_v42, %v4534_v18  ;;  %v4536_v8 = vsel %vm3376_vm12, %v4533_v3, %v4535_v22  ;;  %v10819_v18 = vld [vmem:[#allocation40_spill] sm:$0xff] }
0x1283   : > { %v4988_v9 = vsel %vm3376_vm12, %v4985_v38, %v10808_v60  ;;  %v10809_v10 = vrot.slane %v9516_v31, 1  ;;  %4839 = vrot.lane.b32.xlu1 %v9436_v11, %s7704_s22  ;;  %v9646_v41 = vmul.f32 %v6615_v51, %v4536_v8  ;;  %v10810_v35 = vrot.slane %v9527_v4, 1 }
0x1284   : > { %v9632_v47 = vmul.f32 %v6616_v19, %v4988_v9  ;;  %v4928_v11 = vmul.f32 %v9299_v2, %v9278_v62  ;;  %v4624_v62 = vmul.f32 %v6615_v51, %v9560_v56  ;;  %v10820_v8 = vand.u32 7, %v10819_v18  ;;  %v10828_v18 = vld [vmem:[#allocation52_spill] sm:$0xff] }
0x1285   : > { %v4918_v38 = vsel %vm3376_vm12, %v4915_v39, %v10809_v10  ;;  %v4538_v46 = vsel %vm3376_vm12, %v4535_v22, %v10810_v35  ;;  %v4622_v39 = vmul.f32 %v9509_v15, %v9445_v52  ;;  %v4997_v52 = vmul.f32 %v9479_v57, %v9361_v50  ;;  %v10811_v50 = vld [vmem:[#allocation47_spill] sm:$0xff] }
0x1286   : > { %v9648_v9 = vmul.f32 %v6616_v19, %v4918_v38  ;;  %v9653_v14 = vmul.f32 %v6616_v19, %v4538_v46  ;;  %4747 = vrot.lane.b32.xlu0 %v9439_v33, %s7704_s22  ;;  %v10813_v33 = vld [vmem:[#allocation61_spill] sm:$0xff]  ;;  %vm4244_vm10 = vcmp.ne.s32.totalorder %v10820_v8, 0  ;;  %v10821_v38 = vld [vmem:[#allocation39_spill] sm:$0xff] }
0x1287   : > { %4745 = vrot.lane.b32.xlu1 %v9442_v13, %s7704_s22  ;;  %v4623_v13 = vmul.f32 %v9521_v42, %v9461_v53  ;;  %v4999_v53 = vmul.f32 %v9509_v15, %v9590_v29  ;;  %v9754_v46 = vsel %vm4244_vm10, 1.0, %v10743_v17 }
0x128a   : > { %4639 = vrot.lane.b32.xlu0 %v4622_v39, %s7703_s17 }
0x128b   : > { %4321 = vrot.lane.b32.xlu1 %v9448_v61, %s7704_s22  ;;  %v4929_v61 = vmul.f32 %v9479_v57, %v9368_v27  ;;  %v4548_v27 = vmul.f32 %v9299_v2, %v10811_v50  ;;  %v4931_v2 = vmul.f32 %v9509_v15, %v9583_v24  ;;  %v10817_v24 = vld [vmem:[#allocation36_spill] sm:$0xff] }
0x128c   : > { %v10818_v22 = vand.u32 7, %v10817_v24 }
0x128e   : > { %4323 = vrot.lane.b32.xlu0 %v9451_v5, %s7704_s22  ;;  %v4549_v5 = vmul.f32 %v9479_v57, %v10813_v33  ;;  %v5000_v57 = vmul.f32 %v9521_v42, %v9593_v55  ;;  %vm4243_vm9 = vcmp.ne.s32.totalorder %v10818_v22, 0  ;;  %v10824_v33 = vld [vmem:[#allocation42_spill] sm:$0xff] }
0x128f   : > { %4841 = vrot.lane.b32.xlu1 %v9454_v32, %s7704_s22  ;;  %v10814_v32 = vld [vmem:[#allocation62_spill] sm:$0xff]  ;;  %v9740_v55 = vsel %vm4243_vm9, 1.0, %v10743_v17 }
0x1292   : > { %4843 = vrot.lane.b32.xlu0 %v4830_v30, %s7704_s22  ;;  %v4625_v30 = vmul.f32 %v6616_v19, %v9572_v34 }
0x1293   : > { %4416 = vrot.lane.b32.xlu1 %v9458_v58, %s7704_s22  ;;  %v4930_v58 = vmul.f32 %v9504_v63, %v10814_v32 }
0x1296   : > { %4418 = vrot.lane.b32.xlu0 %v4405_v7, %s7704_s22 }
0x1297   : > { %4641 = vrot.lane.b32.xlu1 %v4623_v13, %s7703_s17 }
0x129a   : > { %4944 = vrot.lane.b32.xlu0 %v4928_v11, %s7703_s17 }
0x129b   : > { %4749 = vrot.lane.b32.xlu1 %v9550_v12, %s7704_s22 }
0x129e   : > { %5011 = vrot.lane.b32.xlu0 %v4997_v52, %s7703_s17  ;;  %v10822_v52 = vld [vmem:[#allocation41_spill] sm:$0xff] }
0x129f   : > { %4946 = vrot.lane.b32.xlu1 %v4929_v61, %s7703_s17  ;;  %v10823_v61 = vand.u32 7, %v10822_v52 }
0x12a1   : > { %vm4245_vm11 = vcmp.ne.s32.totalorder %v10823_v61, 0 }
0x12a2   : > { %4845 = vrot.lane.b32.xlu0 %v9554_v23, %s7704_s22  ;;  %v10812_v23 = vld [vmem:[#allocation59_spill] sm:$0xff] }
0x12a3   : > { %4325 = vrot.lane.b32.xlu1 %v9557_v25, %s7704_s22  ;;  %v4998_v7 = vmul.f32 %v9504_v63, %v10812_v23  ;;  %v10815_v25 = vld [vmem:[#allocation2_spill] sm:$0xff] }
0x12a4   : > { %v10816_v56 = vand.u32 7, %v10815_v25 }
0x12a6   : > { %4643 = vrot.lane.b32.xlu0 %v4624_v62, %s7703_s17  ;;  %vm4242_vm8 = vcmp.ne.s32.totalorder %v10816_v56, 0 }
0x12a7   : > { %4751 = vrot.lane.b32.xlu1 %v9566_v54, %s7704_s22 }
0x12aa   : > { %4327 = vrot.lane.b32.xlu0 %v9569_v45, %s7704_s22  ;;  %v9728_v45 = vsel %vm4242_vm8, 1.0, %v10743_v17 }
0x12ab   : > { %4645 = vrot.lane.b32.xlu1 %v4625_v30, %s7703_s17  ;;  %v9766_v30 = vsel %vm4245_vm11, 1.0, %v10743_v17 }
0x12ae   : > { %4564 = vrot.lane.b32.xlu0 %v4548_v27, %s7703_s17 }
0x12af   : > { %5013 = vrot.lane.b32.xlu1 %v4998_v7, %s7703_s17 }
0x12b2   : > { %4682 = vrot.lane.b32.xlu0 %v10743_v17, %s7703_s17 }
0x12b3   : > { %4566 = vrot.lane.b32.xlu1 %v4549_v5, %s7703_s17  ;;  %v10825_v5 = vand.u32 7, %v10824_v33 }
0x12b5   : > { %vm4246_vm13 = vcmp.ne.s32.totalorder %v10825_v5, 0 }
0x12b6   : > { %4948 = vrot.lane.b32.xlu0 %v4930_v58, %s7703_s17  ;;  %v10826_v58 = vld [vmem:[#allocation46_spill] sm:$0xff] }
0x12b7   : > { %4950 = vrot.lane.b32.xlu1 %v4931_v2, %s7703_s17 }
0x12ba   : > { %5015 = vrot.lane.b32.xlu0 %v4999_v53, %s7703_s17 }
0x12bb   : > { %5017 = vrot.lane.b32.xlu1 %v5000_v57, %s7703_s17  ;;  %v10827_v57 = vld [vmem:[#allocation50_spill] sm:$0xff] }
0x12ce   : > { %v9721_v12 = vpop.permute.xlu0 %4737 }
0x12cf   : > { %v9723_v63 = vpop.permute.xlu1 %4313 }
0x12d2   : > { %v4407_v54 = vpop.permute.xlu0 %4406 }
0x12d3   : > { %v4427_v15 = vsel %vm1057_vm5, 0.0, %v4407_v54  ;;  %v9731_v34 = vpop.permute.xlu1 %4833  ;;  %v9779_v54 = vsel %vm4246_vm13, 1.0, %v10743_v17 }
0x12d4   : > { %v4428_v42 = vmul.f32 %v9728_v45, %v4427_v15 }
0x12d6   : > { %v9736_v29 = vpop.permute.xlu0 %4739  ;;  %4442 = vrot.lane.b32.xlu0 %v4428_v42, %s7704_s22 }
0x12d7   : > { %v4409_v3 = vpop.permute.xlu1 %4408 }
0x12d8   : > { %v4429_v51 = vmul.f32 %v9740_v55, %v4409_v3 }
0x12da   : > { %v9743_v19 = vpop.permute.xlu0 %4835  ;;  %4444 = vrot.lane.b32.xlu1 %v4429_v51, %s7704_s22 }
0x12db   : > { %v9746_v21 = vpop.permute.xlu1 %4315 }
0x12de   : > { %v9748_v60 = vpop.permute.xlu0 %4741 }
0x12df   : > { %v4634_v10 = vpop.permute.xlu1 %4633 }
0x12e0   : > { %v4654_v35 = vadd.f32 %v4634_v10, %v10821_v38 }
0x12e2   : > { %v4411_v39 = vpop.permute.xlu0 %4410  ;;  %4668 = vrot.lane.b32.xlu1 %v4654_v35, %s7703_s17 }
0x12e3   : > { %v4430_v13 = vmul.f32 %v9754_v46, %v4411_v39  ;;  %v9758_v11 = vpop.permute.xlu1 %4743 }
0x12e5   : > { %4446 = vrot.lane.b32.xlu0 %v4430_v13, %s7704_s22  ;;  %v10830_v13 = vld [vmem:[#allocation51_spill] sm:$0xff] }
0x12e6   : > { %v9763_v62 = vpop.permute.xlu0 %4317  ;;  %v10831_v52 = vand.u32 7, %v10830_v13 }
0x12e7   : > { %v4413_v50 = vpop.permute.xlu1 %4412 }
0x12e8   : > { %v4431_v27 = vmul.f32 %v9766_v30, %v4413_v50  ;;  %vm4247_vm14 = vcmp.ne.s32.totalorder %v10831_v52, 0 }
0x12e9   : > { %v9804_v50 = vsel %vm4247_vm14, 1.0, %v10743_v17 }
0x12ea   : > { %v9769_v23 = vpop.permute.xlu0 %4837  ;;  %4448 = vrot.lane.b32.xlu1 %v4431_v27, %s7704_s22  ;;  %v10832_v27 = vld [vmem:[#allocation56_spill] sm:$0xff] }
0x12eb   : > { %v9772_v7 = vpop.permute.xlu1 %4319  ;;  %v10833_v33 = vand.u32 7, %v10832_v27  ;;  %v10836_v27 = vld [vmem:[#allocation37_spill] sm:$0xff] }
0x12ed   : > { %vm4248_vm15 = vcmp.ne.s32.totalorder %v10833_v33, 0 }
0x12f0   : > { %v4636_v32 = vpop.permute.xlu0 %4635 }
0x12f1   : > { %v4655_v2 = vadd.f32 %v4636_v32, %v10826_v58  ;;  %v4638_v53 = vpop.permute.xlu1 %4637 }
0x12f2   : > { %v4656_v56 = vadd.f32 %v4638_v53, %v10827_v57 }
0x12f3   : > { %4670 = vrot.lane.b32.xlu0 %v4655_v2, %s7703_s17  ;;  %v9810_v2 = vsel %vm4248_vm15, 1.0, %v10743_v17 }
0x12f4   : > { %v4415_v15 = vpop.permute.xlu0 %4414  ;;  %4672 = vrot.lane.b32.xlu1 %v4656_v56, %s7703_s17 }
0x12f5   : > { %v4432_v42 = vmul.f32 %v9779_v54, %v4415_v15  ;;  %v9784_v24 = vpop.permute.xlu1 %4839 }
0x12f7   : > { %4450 = vrot.lane.b32.xlu0 %v4432_v42, %s7704_s22  ;;  %v10834_v42 = vld [vmem:[#allocation55_spill] sm:$0xff] }
0x12f8   : > { %v9787_v22 = vpop.permute.xlu0 %4747 }
0x12f9   : > { %v9789_v3 = vpop.permute.xlu1 %4745 }
0x12fc   : > { %v4640_v51 = vpop.permute.xlu0 %4639 }
0x12fd   : > { %v4657_v8 = vadd.f32 %v4640_v51, %v10828_v18  ;;  %v9792_v10 = vpop.permute.xlu1 %4321 }
0x12ff   : > { %4674 = vrot.lane.b32.xlu0 %v4657_v8, %s7703_s17 }
0x1300   : > { %v9795_v35 = vpop.permute.xlu0 %4323 }
0x1301   : > { %10829 = vst [vmem:[#allocation47_spill] sm:$0xff] %v9795_v35  ;;  %v9797_v39 = vpop.permute.xlu1 %4841 }
0x1304   : > { %v9801_v61 = vpop.permute.xlu0 %4843 }
0x1305   : > { %v4417_v5 = vpop.permute.xlu1 %4416 }
0x1306   : > { %v4433_v32 = vmul.f32 %v9804_v50, %v4417_v5  ;;  %v10837_v5 = vld [vmem:[#allocation43_spill] sm:$0xff] }
0x1308   : > { %v4419_v53 = vpop.permute.xlu0 %4418  ;;  %4452 = vrot.lane.b32.xlu1 %v4433_v32, %s7704_s22 }
0x1309   : > { %v4434_v56 = vmul.f32 %v9810_v2, %v4419_v53  ;;  %v4642_v15 = vpop.permute.xlu1 %4641 }
0x130a   : > { %v4658_v51 = vadd.f32 %v4642_v15, %v10834_v42 }
0x130b   : > { %4454 = vrot.lane.b32.xlu0 %v4434_v56, %s7704_s22  ;;  %v9832_v56 = vadd.s32 56, %v10815_v25 }
0x130c   : > { %v4945_v8 = vpop.permute.xlu0 %4944  ;;  %4676 = vrot.lane.b32.xlu1 %v4658_v51, %s7703_s17 }
0x130d   : > { %v9817_v13 = vpop.permute.xlu1 %4749  ;;  %v4968_v33 = vadd.f32 %v4945_v8, %v10836_v27 }
0x130e   : > { %10835 = vst [vmem:[#allocation59_spill] sm:$0xff] %v9817_v13 }
0x130f   : > { %4568 = vrot.lane.b32.xlu0 %v9614_v43, %s7703_s17 }
0x1310   : > { %v5012_v52 = vpop.permute.xlu0 %5011  ;;  %4570 = vrot.lane.b32.xlu1 %v9617_v49, %s7703_s17  ;;  %v10705_v49 = vand.u32 7, %v9832_v56 }
0x1311   : > { %v5032_v32 = vadd.f32 %v5012_v52, %v10837_v5  ;;  %v4947_v53 = vpop.permute.xlu1 %4946 }
0x1312   : > { %vm4273_vm0 = vcmp.ne.s32.totalorder %v10705_v49, 7 }
0x1313   : > { %v9825_v15 = vadd.f32 %v5032_v32, %v4968_v33  ;;  %4952 = vrot.lane.b32.xlu0 %v9621_v44, %s7703_s17  ;;  %v10844_v32 = vld [vmem:[#allocation64_spill] sm:$0xff] }
0x1314   : > { %4954 = vrot.lane.b32.xlu1 %v9628_v6, %s7703_s17  ;;  %v9834_v43 = vpop.permute.xlu0 %4845 }
0x1315   : > { %10838 = vst [vmem:[#allocation61_spill] sm:$0xff] %v9825_v15  ;;  %10839 = vst [vmem:[#allocation62_spill] sm:$0xff] %v9834_v43  ;;  %v9836_v51 = vpop.permute.xlu1 %4325  ;;  %v10847_v43 = vld [vmem:[#allocation48_spill] sm:$0xff] }
0x1316   : > { %10840 = vst [vmem:[#allocation36_spill] sm:$0xff] %v9836_v51  ;;  %v10846_v51 = vld [vmem:[#allocation44_spill] sm:$0xff] }
0x1317   : > { %5019 = vrot.lane.b32.xlu0 %v9630_v48, %s7703_s17  ;;  %v10843_v48 = vld [vmem:[#allocation58_spill] sm:$0xff] }
0x1318   : > { %5021 = vrot.lane.b32.xlu1 %v9632_v47, %s7703_s17  ;;  %v4644_v8 = vpop.permute.xlu0 %4643  ;;  %v10845_v47 = vrot.slane %v9514_v37, 1 }
0x1319   : > { %v9843_v44 = vpop.permute.xlu1 %4751  ;;  %v4659_v52 = vadd.f32 %v4644_v8, %v10843_v48 }
0x131a   : > { %10841 = vst [vmem:[#allocation40_spill] sm:$0xff] %v9843_v44  ;;  %v4996_v44 = vsel %vm3376_vm12, %v10845_v47, 0.0 }
0x131b   : > { %4572 = vrot.lane.b32.xlu0 %v9638_v1, %s7703_s17  ;;  %v6617_v1 = vsel %vm4273_vm0, 1.0, %v10743_v17 }
0x131c   : > { %4574 = vrot.lane.b32.xlu1 %v9646_v41, %s7703_s17  ;;  %v9851_v6 = vpop.permute.xlu0 %4327  ;;  %v5003_v13 = vmul.f32 %v6617_v1, %v4996_v44  ;;  %v10850_v44 = vld [vmem:[#allocation49_spill] sm:$0xff] }
0x131d   : > { %10842 = vst [vmem:[#allocation39_spill] sm:$0xff] %v9851_v6  ;;  %v4646_v33 = vpop.permute.xlu1 %4645  ;;  %v4969_v6 = vadd.f32 %v4947_v53, %v10846_v51  ;;  %v10849_v53 = vrot.slane %v9516_v31, 1 }
0x131e   : > { %v4660_v25 = vadd.f32 %v4646_v33, %v10844_v32  ;;  %v10848_v33 = vrot.slane %v9527_v4, 1 }
0x131f   : > { %4678 = vrot.lane.b32.xlu0 %v4659_v52, %s7703_s17 }
0x1320   : > { %4680 = vrot.lane.b32.xlu1 %v4660_v25, %s7703_s17  ;;  %v9861_v49 = vpop.permute.xlu0 %4564  ;;  %v4547_v35 = vsel %vm3376_vm12, %v10848_v33, 0.0  ;;  %v4761_v33 = vsel %vm1057_vm5, 0.0, %v9721_v12 }
0x1321   : > { %v5014_v41 = vpop.permute.xlu1 %5013 }
0x1322   : > { %v5033_v8 = vadd.f32 %v5014_v41, %v10847_v43  ;;  %v4927_v41 = vsel %vm3376_vm12, %v10849_v53, 0.0  ;;  %v4555_v43 = vmul.f32 %v6617_v1, %v4547_v35  ;;  %v4763_v35 = vmul.f32 %v9740_v55, %v9736_v29 }
0x1323   : > { %4956 = vrot.lane.b32.xlu0 %v9648_v9, %s7703_s17 }
0x1324   : > { %v9870_v52 = vadd.f32 %v5033_v8, %v4969_v6  ;;  %5023 = vrot.lane.b32.xlu1 %v5003_v13, %s7703_s17  ;;  %v9873_v25 = vpop.permute.xlu0 %4682  ;;  %v4935_v6 = vmul.f32 %v6617_v1, %v4927_v41  ;;  %v4762_v8 = vmul.f32 %v9728_v45, %v4761_v33 }
0x1325   : > { %v9875_v47 = vpop.permute.xlu1 %4566 }
0x1327   : > { %4576 = vrot.lane.b32.xlu0 %v9653_v14, %s7703_s17 }
0x1328   : > { %4578 = vrot.lane.b32.xlu1 %v4555_v43, %s7703_s17  ;;  %v4949_v9 = vpop.permute.xlu0 %4948  ;;  %v4854_v43 = vmul.f32 %v9740_v55, %v9731_v34 }
0x1329   : > { %v4951_v13 = vpop.permute.xlu1 %4950  ;;  %v4970_v12 = vadd.f32 %v4949_v9, %v10850_v44 }
0x132a   : > { %v4971_v1 = vadd.f32 %v4951_v13, %v9316_v36 }
0x132b   : > { %4958 = vrot.lane.b32.xlu0 %v4935_v6, %s7703_s17 }
0x132c   : > { %4778 = vrot.lane.b32.xlu1 %v4762_v8, %s7704_s22  ;;  %v5016_v53 = vpop.permute.xlu0 %5015 }
0x132d   : > { %v5034_v15 = vadd.f32 %v5016_v53, %v9314_v28  ;;  %v5018_v14 = vpop.permute.xlu1 %5017 }
0x132e   : > { %v5035_v41 = vadd.f32 %v5018_v14, %v9371_v20 }
0x132f   : > { %v9898_v33 = vadd.f32 %v5034_v15, %v4970_v12  ;;  %4780 = vrot.lane.b32.xlu0 %v4763_v35, %s7704_s22 }
0x1330   : > { %v9901_v6 = vadd.f32 %v5035_v41, %v4971_v1  ;;  %4868 = vrot.lane.b32.xlu1 %v4854_v43, %s7704_s22 }
0x1332   : > { %v7499_v29 = vpack.i.bf16 %v9901_v6, %v9898_v33 }
0x1348   : > { %v4443_v9 = vpop.permute.xlu0 %4442 }
0x1349   : > { %v4463_v8 = vadd.f32 %v4443_v9, %v10821_v38 }
0x134b   : > { %4477 = vrot.lane.b32.xlu0 %v4463_v8, %s7701_s21 }
0x134c   : > { %v4445_v34 = vpop.permute.xlu1 %4444 }
0x134d   : > { %v4464_v13 = vadd.f32 %v4445_v34, %v10826_v58  ;;  %v4855_v34 = vmul.f32 %v9754_v46, %v9743_v19 }
0x134f   : > { %4479 = vrot.lane.b32.xlu1 %v4464_v13, %s7701_s21 }
0x1354   : > { %v4669_v15 = vpop.permute.xlu1 %4668 }
0x1355   : > { %4684 = vrot.lane.b32.xlu1 %v4669_v15, %s7703_s17  ;;  %v4337_v15 = vsel %vm1057_vm5, 0.0, %v9723_v63 }
0x1356   : > { %v4338_v19 = vmul.f32 %v9728_v45, %v4337_v15 }
0x1357   : > { %v4447_v53 = vpop.permute.xlu0 %4446 }
0x1358   : > { %v4465_v35 = vadd.f32 %v4447_v53, %v10827_v57 }
0x135a   : > { %4481 = vrot.lane.b32.xlu0 %v4465_v35, %s7701_s21  ;;  %v4339_v35 = vmul.f32 %v9740_v55, %v9746_v21 }
0x135c   : > { %v4449_v12 = vpop.permute.xlu1 %4448 }
0x135d   : > { %v4466_v14 = vadd.f32 %v4449_v12, %v10828_v18 }
0x135f   : > { %4483 = vrot.lane.b32.xlu1 %v4466_v14, %s7701_s21  ;;  %v10851_v14 = vld [vmem:[#allocation53_spill] sm:$0xff] }
0x1365   : > { %v4671_v38 = vpop.permute.xlu0 %4670 }
0x1366   : > { %v4673_v43 = vpop.permute.xlu1 %4672  ;;  %4686 = vrot.lane.b32.xlu0 %v4671_v38, %s7703_s17 }
0x1367   : > { %4688 = vrot.lane.b32.xlu1 %v4673_v43, %s7703_s17  ;;  %v4765_v43 = vmul.f32 %v9766_v30, %v9758_v11  ;;  %v4764_v11 = vmul.f32 %v9754_v46, %v9748_v60  ;;  %v4856_v60 = vmul.f32 %v9766_v30, %v9769_v23 }
0x1369   : > { %v4451_v58 = vpop.permute.xlu0 %4450 }
0x136a   : > { %v4467_v1 = vadd.f32 %v4451_v58, %v10834_v42 }
0x136c   : > { %4485 = vrot.lane.b32.xlu0 %v4467_v1, %s7701_s21 }
0x1371   : > { %v4675_v41 = vpop.permute.xlu0 %4674 }
0x1372   : > { %4690 = vrot.lane.b32.xlu0 %v4675_v41, %s7703_s17 }
0x137a   : > { %v4453_v57 = vpop.permute.xlu1 %4452 }
0x137b   : > { %v4468_v9 = vadd.f32 %v4453_v57, %v10843_v48 }
0x137d   : > { %4487 = vrot.lane.b32.xlu0 %v4468_v9, %s7701_s21  ;;  %v4455_v18 = vpop.permute.xlu0 %4454 }
0x137e   : > { %v4677_v8 = vpop.permute.xlu1 %4676  ;;  %v4469_v13 = vadd.f32 %v4455_v18, %v10844_v32  ;;  %v10852_v18 = vld [vmem:[#allocation54_spill] sm:$0xff] }
0x137f   : > { %4692 = vrot.lane.b32.xlu1 %v4677_v8, %s7703_s17 }
0x1381   : > { %4870 = vrot.lane.b32.xlu0 %v4855_v34, %s7704_s22  ;;  %v4569_v42 = vpop.permute.xlu0 %4568 }
0x1382   : > { %v9930_v53 = vadd.f32 %v4569_v42, %v9305_v0  ;;  %v4571_v48 = vpop.permute.xlu1 %4570  ;;  %v10853_v42 = vld [vmem:[#allocation57_spill] sm:$0xff] }
0x1383   : > { %v9935_v12 = vadd.f32 %v4571_v48, %v9325_v26  ;;  %4489 = vrot.lane.b32.xlu1 %v4469_v13, %s7701_s21 }
0x1385   : > { %4356 = vrot.lane.b32.xlu0 %v4339_v35, %s7704_s22  ;;  %v4953_v32 = vpop.permute.xlu0 %4952 }
0x1386   : > { %v4972_v38 = vadd.f32 %v4953_v32, %v10851_v14  ;;  %v4955_v63 = vpop.permute.xlu1 %4954 }
0x1387   : > { %v4973_v58 = vadd.f32 %v4955_v63, %v9414_v59  ;;  %4354 = vrot.lane.b32.xlu1 %v4338_v19, %s7704_s22  ;;  %v4857_v19 = vmul.f32 %v9779_v54, %v9784_v24  ;;  %v10855_v24 = vld [vmem:[#allocation63_spill] sm:$0xff] }
0x1389   : > { %4784 = vrot.lane.b32.xlu0 %v4765_v43, %s7704_s22  ;;  %v5020_v55 = vpop.permute.xlu0 %5019 }
0x138a   : > { %v5036_v21 = vadd.f32 %v5020_v55, %v9412_v40  ;;  %v5022_v1 = vpop.permute.xlu1 %5021  ;;  %v4340_v55 = vmul.f32 %v9754_v46, %v9763_v62  ;;  %v4767_v46 = vmul.f32 %v9804_v50, %v9787_v22  ;;  %v4766_v62 = vmul.f32 %v9779_v54, %v9789_v3 }
0x138b   : > { %v5037_v45 = vadd.f32 %v5022_v1, %v9472_v16  ;;  %4492 = vrot.lane.b32.xlu1 %v10743_v17, %s7704_s22  ;;  %v4858_v22 = vmul.f32 %v9804_v50, %v9797_v39  ;;  %v4859_v3 = vmul.f32 %v9810_v2, %v9801_v61  ;;  %v10857_v39 = vld [vmem:[#allocation47_spill] sm:$0xff] }
0x138c   : > { %v9950_v41 = vadd.f32 %v5036_v21, %v4972_v38  ;;  %v10854_v38 = vld [vmem:[#allocation60_spill] sm:$0xff]  ;;  %v4341_v21 = vmul.f32 %v9766_v30, %v9772_v7 }
0x138d   : > { %v9954_v57 = vadd.f32 %v5037_v45, %v4973_v58  ;;  %v4573_v9 = vpop.permute.xlu0 %4572 }
0x138e   : > { %v9957_v8 = vadd.f32 %v4573_v9, %v10852_v18  ;;  %v4575_v34 = vpop.permute.xlu1 %4574 }
0x138f   : > { %v7509_v13 = vpack.i.bf16 %v9954_v57, %v9950_v41  ;;  %v9962_v15 = vadd.f32 %v4575_v34, %v10853_v42  ;;  %4782 = vrot.lane.b32.xlu1 %v4764_v11, %s7704_s22 }
0x1391   : > { %v4679_v48 = vpop.permute.xlu0 %4678 }
0x1392   : > { %v4681_v35 = vpop.permute.xlu1 %4680 }
0x1393   : > { %4696 = vrot.lane.b32.xlu0 %v4681_v35, %s7703_s17  ;;  %4694 = vrot.lane.b32.xlu1 %v4679_v48, %s7703_s17 }
0x1395   : > { %v4957_v32 = vpop.permute.xlu0 %4956 }
0x1396   : > { %v4974_v63 = vadd.f32 %v4957_v32, %v10854_v38  ;;  %v5024_v43 = vpop.permute.xlu1 %5023 }
0x1397   : > { %v5038_v58 = vadd.f32 %v5024_v43, %v9514_v37  ;;  %4874 = vrot.lane.b32.xlu0 %v4857_v19, %s7704_s22  ;;  %4872 = vrot.lane.b32.xlu1 %v4856_v60, %s7704_s22  ;;  %v4342_v43 = vmul.f32 %v9779_v54, %v9792_v10  ;;  %v10860_v54 = vld [vmem:[#allocation36_spill] sm:$0xff] }
0x1398   : > { %v4344_v10 = vmul.f32 %v9810_v2, %v10860_v54 }
0x1399   : > { %v9979_v23 = vadd.f32 %v5038_v58, %v4974_v63  ;;  %v4577_v1 = vpop.permute.xlu0 %4576  ;;  %v10856_v63 = vand.u32 7, %v9832_v56  ;;  %v4343_v58 = vmul.f32 %v9804_v50, %v10857_v39  ;;  %v10858_v56 = vld [vmem:[#allocation59_spill] sm:$0xff] }
0x139a   : > { %v9982_v45 = vadd.f32 %v4577_v1, %v10855_v24  ;;  %v4579_v11 = vpop.permute.xlu1 %4578  ;;  %v10861_v50 = vld [vmem:[#allocation39_spill] sm:$0xff] }
0x139b   : > { %v9985_v9 = vadd.f32 %v4579_v11, %v9527_v4  ;;  %4360 = vrot.lane.b32.xlu0 %v4341_v21, %s7704_s22  ;;  %4358 = vrot.lane.b32.xlu1 %v4340_v55, %s7704_s22  ;;  %vm4249_vm5 = vcmp.ne.s32.totalorder %v10856_v63, 0 }
0x139c   : > { %v6609_v55 = vsel %vm4249_vm5, 1.0, %v10743_v17  ;;  %v10862_v17 = vld [vmem:[#allocation40_spill] sm:$0xff] }
0x139d   : > { %v4959_v30 = vpop.permute.xlu0 %4958  ;;  %v4345_v1 = vmul.f32 %v6609_v55, %v10861_v50  ;;  %v4769_v11 = vmul.f32 %v6609_v55, %v10862_v17  ;;  %v10865_v50 = vld [vmem:[#allocation48_spill] sm:$0xff] }
0x139e   : > { %v9994_v7 = vadd.f32 %v4959_v30, %v9516_v31  ;;  %v4779_v34 = vpop.permute.xlu1 %4778  ;;  %v10863_v30 = vld [vmem:[#allocation38_spill] sm:$0xff] }
0x139f   : > { %v4802_v48 = vadd.f32 %v4779_v34, %v10836_v27  ;;  %4788 = vrot.lane.b32.xlu0 %v4767_v46, %s7704_s22  ;;  %4786 = vrot.lane.b32.xlu1 %v4766_v62, %s7704_s22  ;;  %v4588_v34 = vadd.f32 %v9861_v49, %v10863_v30 }
0x13a0   : > { %v7519_v35 = vpack.i.bf16 %v9994_v7, %v9979_v23 }
0x13a1   : > { %v4781_v60 = vpop.permute.xlu0 %4780 }
0x13a2   : > { %v4803_v19 = vadd.f32 %v4781_v60, %v10846_v51  ;;  %v4869_v32 = vpop.permute.xlu1 %4868  ;;  %v10859_v51 = vld [vmem:[#allocation62_spill] sm:$0xff] }
0x13a3   : > { %v4889_v27 = vadd.f32 %v4869_v32, %v10837_v5  ;;  %4878 = vrot.lane.b32.xlu0 %v4859_v3, %s7704_s22  ;;  %4876 = vrot.lane.b32.xlu1 %v4858_v22, %s7704_s22  ;;  %v4768_v5 = vmul.f32 %v9810_v2, %v10858_v56  ;;  %v4860_v21 = vmul.f32 %v6609_v55, %v10859_v51  ;;  %v10864_v2 = vld [vmem:[#allocation45_spill] sm:$0xff] }
0x13a4   : > { %v4706_v3 = vadd.f32 %v9873_v25, %v4588_v34 }
0x13a5   : > { %v4896_v61 = vadd.f32 %v4889_v27, %v4802_v48  ;;  %v4589_v48 = vadd.f32 %v9875_v47, %v10864_v2 }
0x13a7   : > { %4364 = vrot.lane.b32.xlu0 %v4343_v58, %s7704_s22  ;;  %4362 = vrot.lane.b32.xlu1 %v4342_v43, %s7704_s22 }
0x13ab   : > { %4880 = vrot.lane.b32.xlu0 %v4860_v21, %s7704_s22  ;;  %4790 = vrot.lane.b32.xlu1 %v4768_v5, %s7704_s22 }
0x13af   : > { %4368 = vrot.lane.b32.xlu0 %v4345_v1, %s7704_s22  ;;  %4366 = vrot.lane.b32.xlu1 %v4344_v10, %s7704_s22 }
0x13b3   : > { %4792 = vrot.lane.b32.xlu1 %v4769_v11, %s7704_s22 }
0x13bd   : > { %v4478_v46 = vpop.permute.xlu0 %4477 }
0x13be   : > { %4494 = vrot.lane.b32.xlu0 %v4478_v46, %s7704_s22 }
0x13c1   : > { %v4480_v62 = vpop.permute.xlu1 %4479 }
0x13c2   : > { %4496 = vrot.lane.b32.xlu1 %v4480_v62, %s7704_s22 }
0x13c7   : > { %v4685_v22 = vpop.permute.xlu1 %4684 }
0x13c8   : > { %v4707_v60 = vadd.f32 %v4685_v22, %v4589_v48 }
0x13ca   : > { %v7494_v32 = vpack.i.bf16 %v4707_v60, %v4706_v3 }
0x13cc   : > { %v4482_v63 = vpop.permute.xlu0 %4481 }
0x13cd   : > { %4498 = vrot.lane.b32.xlu0 %v4482_v63, %s7704_s22 }
0x13d1   : > { %v4484_v27 = vpop.permute.xlu1 %4483 }
0x13d2   : > { %4500 = vrot.lane.b32.xlu1 %v4484_v27, %s7704_s22 }
0x13d8   : > { %v4687_v43 = vpop.permute.xlu0 %4686 }
0x13d9   : > { %v4708_v39 = vadd.f32 %v4687_v43, %v9930_v53  ;;  %v4689_v58 = vpop.permute.xlu1 %4688 }
0x13da   : > { %v4709_v49 = vadd.f32 %v4689_v58, %v9935_v12  ;;  %v10866_v12 = vld [vmem:[#allocation61_spill] sm:$0xff] }
0x13db   : > { %v10867_v1 = vpack.i.bf16 %v9870_v52, %v10866_v12 }
0x13dc   : > { %v7504_v55 = vpack.i.bf16 %v4709_v49, %v4708_v39 }
0x13de   : > { %v4486_v56 = vpop.permute.xlu0 %4485 }
0x13df   : > { %4502 = vrot.lane.b32.xlu0 %v4486_v56, %s7704_s22 }
0x13e4   : > { %v4691_v47 = vpop.permute.xlu0 %4690 }
0x13e5   : > { %v4710_v51 = vadd.f32 %v4691_v47, %v9957_v8 }
0x13ef   : > { %v4488_v25 = vpop.permute.xlu0 %4487 }
0x13f0   : > { %4504 = vrot.lane.b32.xlu0 %v4488_v25, %s7704_s22 }
0x13f1   : > { %v4693_v5 = vpop.permute.xlu1 %4692 }
0x13f2   : > { %v4711_v21 = vadd.f32 %v4693_v5, %v9962_v15 }
0x13f3   : > { %v4871_v54 = vpop.permute.xlu0 %4870 }
0x13f4   : > { %v7514_v10 = vpack.i.bf16 %v4711_v21, %v4710_v51  ;;  %v4890_v53 = vadd.f32 %v4871_v54, %v10865_v50  ;;  %7490 = vrot.lane.b32.xlu0 %v10867_v1, %s7701_s21 }
0x13f5   : > { %v4490_v17 = vpop.permute.xlu1 %4489 }
0x13f6   : > { %v4897_v11 = vadd.f32 %v4890_v53, %v4803_v19  ;;  %4506 = vrot.lane.b32.xlu1 %v4490_v17, %s7704_s22 }
0x13f7   : > { %v4357_v15 = vpop.permute.xlu0 %4356 }
0x13f8   : > { %v5151_v46 = vpack.c.bf16 %v4897_v11, %v4896_v61  ;;  %7500 = vrot.lane.b32.xlu0 %v7499_v29, %s7701_s21 }
0x13f9   : > { %v4355_v8 = vpop.permute.xlu1 %4354 }
0x13fa   : > { %7495 = vrot.lane.b32.xlu1 %v7494_v32, %s7701_s21  ;;  %v4378_v50 = vadd.f32 %v4355_v8, %v10863_v30 }
0x13fb   : > { %v4785_v19 = vpop.permute.xlu0 %4784 }
0x13fc   : > { %7510 = vrot.lane.b32.xlu0 %v7509_v13, %s7701_s21  ;;  %v4805_v34 = vadd.f32 %v4785_v19, %v9316_v36 }
0x13fd   : > { %v4493_v52 = vpop.permute.xlu1 %4492 }
0x13fe   : > { %7505 = vrot.lane.b32.xlu1 %v7504_v55, %s7701_s21  ;;  %v4516_v12 = vadd.f32 %v4493_v52, %v4378_v50 }
0x1400   : > { %7520 = vrot.lane.b32.xlu0 %v7519_v35, %s7701_s21 }
0x1401   : > { %v4783_v33 = vpop.permute.xlu1 %4782 }
0x1402   : > { %7515 = vrot.lane.b32.xlu1 %v7514_v10, %s7701_s21  ;;  %v4804_v23 = vadd.f32 %v4783_v33, %v10850_v44  ;;  %v4379_v10 = vadd.f32 %v4357_v15, %v10864_v2 }
0x1404   : > { %5357 = vrot.lane.b32.xlu0 %v5151_v46, %s7701_s21 }
0x1405   : > { %v4695_v6 = vpop.permute.xlu1 %4694  ;;  %v4697_v29 = vpop.permute.xlu0 %4696 }
0x1406   : > { %v4712_v61 = vadd.f32 %v4695_v6, %v9982_v45  ;;  %v4713_v41 = vadd.f32 %v4697_v29, %v9985_v9 }
0x1408   : > { %v7524_v57 = vpack.i.bf16 %v4713_v41, %v4712_v61 }
0x1409   : > { %v4873_v13 = vpop.permute.xlu1 %4872  ;;  %v4875_v62 = vpop.permute.xlu0 %4874 }
0x140a   : > { %v4891_v7 = vadd.f32 %v4873_v13, %v9314_v28  ;;  %v4892_v35 = vadd.f32 %v4875_v62, %v9371_v20  ;;  %7525 = vrot.lane.b32.xlu1 %v7524_v57, %s7701_s21 }
0x140c   : > { %v4898_v48 = vadd.f32 %v4891_v7, %v4804_v23  ;;  %v4899_v22 = vadd.f32 %v4892_v35, %v4805_v34 }
0x140d   : > { %v4359_v3 = vpop.permute.xlu1 %4358  ;;  %v4361_v60 = vpop.permute.xlu0 %4360 }
0x140e   : > { %v5152_v45 = vpack.c.bf16 %v4899_v22, %v4898_v48  ;;  %v4381_v17 = vadd.f32 %v4361_v60, %v9325_v26 }
0x1410   : > { %5359 = vrot.lane.b32.xlu0 %v5152_v45, %s7701_s21 }
0x1411   : > { %v4787_v9 = vpop.permute.xlu1 %4786  ;;  %v4789_v32 = vpop.permute.xlu0 %4788 }
0x1412   : > { %v4806_v36 = vadd.f32 %v4787_v9, %v10851_v14  ;;  %v4807_v44 = vadd.f32 %v4789_v32, %v9414_v59 }
0x1415   : > { %v4877_v63 = vpop.permute.xlu1 %4876  ;;  %v4879_v27 = vpop.permute.xlu0 %4878 }
0x1416   : > { %v4893_v28 = vadd.f32 %v4877_v63, %v9412_v40  ;;  %v4894_v20 = vadd.f32 %v4879_v27, %v9472_v16 }
0x1418   : > { %v4900_v43 = vadd.f32 %v4893_v28, %v4806_v36  ;;  %v4901_v39 = vadd.f32 %v4894_v20, %v4807_v44 }
0x1419   : > { %v4363_v58 = vpop.permute.xlu1 %4362  ;;  %v4365_v49 = vpop.permute.xlu0 %4364 }
0x141a   : > { %v5153_v55 = vpack.c.bf16 %v4901_v39, %v4900_v43  ;;  %v4382_v30 = vadd.f32 %v4363_v58, %v10852_v18  ;;  %v4383_v8 = vadd.f32 %v4365_v49, %v10853_v42  ;;  %v7633_v58 = vld [vmem:[%s10641_s6 + $0x4] ss:$8 sps:$4 sm:$0xff]  }
0x141b   : > { %5421 = vmatprep.mubr.bf16.mxu0 %v7633_v58  ;;  %v10214_v58 = vld [vmem:[%s10637_s2 + $0x1] ss:$0 sm:$0xff] }
0x141c   : > { %5361 = vrot.lane.b32.xlu0 %v5153_v55, %s7701_s21 }
0x141d   : > { %v4791_v56 = vpop.permute.xlu1 %4790  ;;  %v4881_v47 = vpop.permute.xlu0 %4880 }
0x141e   : > { %v4808_v25 = vadd.f32 %v4791_v56, %v10854_v38  ;;  %v4895_v5 = vadd.f32 %v4881_v47, %v9514_v37 }
0x1420   : > { %v4902_v14 = vadd.f32 %v4895_v5, %v4808_v25 }
0x1421   : > { %v4367_v51 = vpop.permute.xlu1 %4366  ;;  %v4369_v54 = vpop.permute.xlu0 %4368 }
0x1422   : > { %v4384_v59 = vadd.f32 %v4367_v51, %v10855_v24  ;;  %v4380_v24 = vadd.f32 %v4359_v3, %v9305_v0  ;;  %v4385_v26 = vadd.f32 %v4369_v54, %v9527_v4 }
0x1425   : > { %v4793_v40 = vpop.permute.xlu1 %4792 }
0x1426   : > { %v4809_v16 = vadd.f32 %v4793_v40, %v9516_v31 }
0x1428   : > { %v5154_v21 = vpack.c.bf16 %v4809_v16, %v4902_v14 }
0x142a   : > { %5363 = vrot.lane.b32.xlu0 %v5154_v21, %s7701_s21 }
0x1430   : > { %v4495_v53 = vpop.permute.xlu0 %4494 }
0x1431   : > { %v4517_v38 = vadd.f32 %v4495_v53, %v4379_v10 }
0x1433   : > { %v5143_v1 = vpack.c.bf16 %v4517_v38, %v4516_v12 }
0x1434   : > { %v4497_v37 = vpop.permute.xlu1 %4496 }
0x1435   : > { %5341 = vrot.lane.b32.xlu1 %v5143_v1, %s7701_s21  ;;  %v4518_v11 = vadd.f32 %v4497_v37, %v4380_v24 }
0x143f   : > { %v4499_v31 = vpop.permute.xlu0 %4498 }
0x1440   : > { %v4519_v46 = vadd.f32 %v4499_v31, %v4381_v17 }
0x1442   : > { %v5144_v19 = vpack.c.bf16 %v4519_v46, %v4518_v11  ;;  %v7631_v46 = vld [vmem:[%s10641_s6] ss:$8 sps:$4 sm:$0xff]  }
0x1444   : > { %5343 = vrot.lane.b32.xlu1 %v5144_v19, %s7701_s21  ;;  %v4501_v2 = vpop.permute.xlu1 %4500  ;;  %v7634_v19 = vld [vmem:[%s10641_s6 + $0x14] ss:$8 sps:$4 sm:$0xff]  }
0x1445   : > { %v4520_v52 = vadd.f32 %v4501_v2, %v4382_v30  ;;  %v7636_v2 = vld [vmem:[%s10641_s6 + $0x10] ss:$8 sps:$4 sm:$0xff]   ;;  %v7637_v30 = vld [vmem:[%s10641_s6 + $0x24] ss:$8 sps:$4 sm:$0xff]  }
0x1451   : > { %v4503_v15 = vpop.permute.xlu0 %4502 }
0x1452   : > { %v4521_v33 = vadd.f32 %v4503_v15, %v4383_v8  ;;  %v7639_v8 = vld [vmem:[%s10641_s6 + $0x20] ss:$8 sps:$4 sm:$0xff]   ;;  %v7640_v15 = vld [vmem:[%s10641_s6 + $0x34] ss:$8 sps:$4 sm:$0xff]  }
0x1454   : > { %v5145_v6 = vpack.c.bf16 %v4521_v33, %v4520_v52  ;;  %v7642_v52 = vld [vmem:[%s10641_s6 + $0x30] ss:$8 sps:$4 sm:$0xff]   ;;  %v7643_v33 = vld [vmem:[%s10641_s6 + $0x44] ss:$8 sps:$4 sm:$0xff]  }
0x1456   : > { %5345 = vrot.lane.b32.xlu1 %v5145_v6, %s7701_s21  ;;  %v7645_v6 = vld [vmem:[%s10641_s6 + $0x40] ss:$8 sps:$4 sm:$0xff]  }
0x1462   : > { %v4505_v0 = vpop.permute.xlu0 %4504 }
0x1463   : > { %v4522_v13 = vadd.f32 %v4505_v0, %v4384_v59  ;;  %v7646_v0 = vld [vmem:[%s10641_s6 + $0x54] ss:$8 sps:$4 sm:$0xff]  }
0x1466   : > { %v7491_v29 = vpop.permute.xlu0 %7490 }
0x1467   : > { %v7493_v61 = vunpack.i.h.bf16 %v7491_v29  ;;  %v7492_v41 = vunpack.i.l.bf16 %v7491_v29  ;;  %v7648_v29 = vld [vmem:[%s10641_s6 + $0x50] ss:$8 sps:$4 sm:$0xff]  }
0x1468   : > { %v4507_v57 = vpop.permute.xlu1 %4506 }
0x1469   : > { %v5155_v62 = vpack.c.bf16 %v7493_v61, %v7492_v41  ;;  %v4523_v34 = vadd.f32 %v4507_v57, %v4385_v26  ;;  %v7649_v26 = vld [vmem:[%s10641_s6 + $0x64] ss:$8 sps:$4 sm:$0xff]   ;;  %v7651_v61 = vld [vmem:[%s10641_s6 + $0x60] ss:$8 sps:$4 sm:$0xff]   ;;  %v7652_v41 = vld [vmem:[%s10641_s6 + $0x74] ss:$8 sps:$4 sm:$0xff]  }
0x146a   : > { %v7501_v23 = vpop.permute.xlu0 %7500  ;;  %v7654_v57 = vld [vmem:[%s10641_s6 + $0x70] ss:$8 sps:$4 sm:$0xff]  }
0x146b   : > { %v5146_v18 = vpack.c.bf16 %v4523_v34, %v4522_v13  ;;  %v7503_v7 = vunpack.i.h.bf16 %v7501_v23  ;;  %v7502_v42 = vunpack.i.l.bf16 %v7501_v23  ;;  %5365 = vrot.lane.b32.xlu0 %v5155_v62, %s7701_s21  ;;  %v7655_v13 = vld [vmem:[%s10641_s6 + $0x84] ss:$8 sps:$4 sm:$0xff]   ;;  %v7657_v62 = vld [vmem:[%s10641_s6 + $0x80] ss:$8 sps:$4 sm:$0xff]   ;;  %v7658_v34 = vld [vmem:[%s10641_s6 + $0x94] ss:$8 sps:$4 sm:$0xff]  }
0x146c   : > { %v7496_v35 = vpop.permute.xlu1 %7495  ;;  %v7660_v23 = vld [vmem:[%s10641_s6 + $0x90] ss:$8 sps:$4 sm:$0xff]  }
0x146d   : > { %v5156_v48 = vpack.c.bf16 %v7503_v7, %v7502_v42  ;;  %v7498_v22 = vunpack.i.h.bf16 %v7496_v35  ;;  %v7497_v3 = vunpack.i.l.bf16 %v7496_v35  ;;  %5347 = vrot.lane.b32.xlu1 %v5146_v18, %s7701_s21  ;;  %v7661_v18 = vld [vmem:[%s10641_s6 + $0xa4] ss:$8 sps:$4 sm:$0xff]   ;;  %v7663_v7 = vld [vmem:[%s10641_s6 + $0xa0] ss:$8 sps:$4 sm:$0xff]   ;;  %v7664_v42 = vld [vmem:[%s10641_s6 + $0xb4] ss:$8 sps:$4 sm:$0xff]  }
0x146e   : > { %v7511_v60 = vpop.permute.xlu0 %7510  ;;  %v7666_v35 = vld [vmem:[%s10641_s6 + $0xb0] ss:$8 sps:$4 sm:$0xff]  }
0x146f   : > { %v5147_v4 = vpack.c.bf16 %v7498_v22, %v7497_v3  ;;  %v7513_v45 = vunpack.i.h.bf16 %v7511_v60  ;;  %v7512_v9 = vunpack.i.l.bf16 %v7511_v60  ;;  %5367 = vrot.lane.b32.xlu0 %v5156_v48, %s7701_s21  ;;  %v7667_v48 = vld [vmem:[%s10641_s6 + $0xc4] ss:$8 sps:$4 sm:$0xff]   ;;  %v7669_v22 = vld [vmem:[%s10641_s6 + $0xc0] ss:$8 sps:$4 sm:$0xff]   ;;  %v7670_v3 = vld [vmem:[%s10641_s6 + $0xd4] ss:$8 sps:$4 sm:$0xff]  }
0x1470   : > { %v7506_v32 = vpop.permute.xlu1 %7505  ;;  %v7672_v60 = vld [vmem:[%s10641_s6 + $0xd0] ss:$8 sps:$4 sm:$0xff]  }
0x1471   : > { %v5157_v63 = vpack.c.bf16 %v7513_v45, %v7512_v9  ;;  %v7508_v27 = vunpack.i.h.bf16 %v7506_v32  ;;  %v7507_v36 = vunpack.i.l.bf16 %v7506_v32  ;;  %5349 = vrot.lane.b32.xlu1 %v5147_v4, %s7701_s21  ;;  %v7673_v4 = vld [vmem:[%s10641_s6 + $0xe4] ss:$8 sps:$4 sm:$0xff]   ;;  %v7675_v32 = vld [vmem:[%s10641_s6 + $0xe0] ss:$8 sps:$4 sm:$0xff]  }
0x1472   : > { %v7521_v44 = vpop.permute.xlu0 %7520  ;;  %v7679_v45 = vld [vmem:[%s10636_s1 + $0xc0] sm:$0xff]   ;;  %v7680_v9 = vld [vmem:[%s10636_s1 + $0xc8] sm:$0xff]  }
0x1473   : > { %v5148_v28 = vpack.c.bf16 %v7508_v27, %v7507_v36  ;;  %v7523_v20 = vunpack.i.h.bf16 %v7521_v44  ;;  %v7522_v43 = vunpack.i.l.bf16 %v7521_v44  ;;  %5369 = vrot.lane.b32.xlu0 %v5157_v63, %s7701_s21  ;;  %7355 = vmatprep.subr.bf16.mxu1 %v7679_v45  ;;  %v7676_v63 = vld [vmem:[%s10641_s6 + $0xf4] ss:$8 sps:$4 sm:$0xff]   ;;  %v7678_v27 = vld [vmem:[%s10641_s6 + $0xf0] ss:$8 sps:$4 sm:$0xff]   ;;  %v10209_v44 = vld [vmem:[%s10637_s2 + $0x9] ss:$0 sm:$0xff] }
0x1474   : > { %v7516_v39 = vpop.permute.xlu1 %7515  ;;  %7356 = vmatpush3.bf16.msra.mxu1 %v7679_v45 }
0x1475   : > { %v5158_v49 = vpack.c.bf16 %v7523_v20, %v7522_v43  ;;  %v7518_v55 = vunpack.i.h.bf16 %v7516_v39  ;;  %v7517_v56 = vunpack.i.l.bf16 %v7516_v39  ;;  %5351 = vrot.lane.b32.xlu1 %v5148_v28, %s7701_s21  ;;  %7357 = vmatprep.subr.bf16.mxu1 %v7680_v9 }
0x1476   : > { %v5358_v47 = vpop.permute.xlu0 %5357 }
0x1477   : > { %v5149_v25 = vpack.c.bf16 %v7518_v55, %v7517_v56  ;;  %6927 = vmatprep.subr.bf16.mxu0 %v5358_v47  ;;  %5371 = vrot.lane.b32.xlu0 %v5158_v49, %s7701_s21  ;;  %v10868_v49 = vld [vmem:[#allocation5_spill] sm:$0xff] }
0x1478   : > { %7358 = vmatpush3.bf16.msra.mxu1 %v7680_v9  ;;  %v1250_v55 = vadd.f32 %v10214_v58, %v10868_v49 }
0x1479   : > { %5353 = vrot.lane.b32.xlu1 %v5149_v25, %s7701_s21  ;;  %7391 = vmatprep.subr.bf16.mxu1 %v7679_v45  ;;  %v10869_v25 = vld [vmem:[#allocation7_spill] sm:$0xff] }
0x147c   : > { %v7526_v5 = vpop.permute.xlu1 %7525 }
0x147d   : > { %v7528_v14 = vunpack.i.h.bf16 %v7526_v5  ;;  %v7527_v51 = vunpack.i.l.bf16 %v7526_v5  ;;  %v1253_v5 = vadd.f32 %v10214_v58, %v10869_v25 }
0x147f   : > { %v5150_v59 = vpack.c.bf16 %v7528_v14, %v7527_v51 }
0x1481   : > { %5355 = vrot.lane.b32.xlu1 %v5150_v59, %s7701_s21  ;;  %s6353_s21 = sshll.u32 %s10904_s10, 1 }
0x1482   : > { %v5360_v16 = vpop.permute.xlu0 %5359  ;;  %s330_s26 = scalar_lea.vmem %s10644_s9, %s6353_s21 }
0x148e   : > { %v5362_v54 = vpop.permute.xlu0 %5361 }
0x149c   : > { %v5364_v50 = vpop.permute.xlu0 %5363 }
0x14a7   : > { %v5342_v40 = vpop.permute.xlu1 %5341 }
0x14a8   : > { %6928 = vmatpush3.bf16.msra.mxu0 %v5342_v40 }
0x14a9   : > { %6929 = vmatprep.subr.bf16.mxu0 %v5360_v16 }
0x14b6   : > { %v5344_v21 = vpop.permute.xlu1 %5343 }
0x14b7   : > { %6930 = vmatpush3.bf16.msra.mxu0 %v5344_v21 }
0x14b8   : > { %6931 = vmatprep.subr.bf16.mxu0 %v5362_v54 }
0x14c8   : > { %v5346_v10 = vpop.permute.xlu1 %5345 }
0x14c9   : > { %6932 = vmatpush3.bf16.msra.mxu0 %v5346_v10 }
0x14ca   : > { %6933 = vmatprep.subr.bf16.mxu0 %v5364_v50 }
0x14dd   : > { %v5366_v53 = vpop.permute.xlu0 %5365 }
0x14df   : > { %v5348_v12 = vpop.permute.xlu1 %5347 }
0x14e0   : > { %6934 = vmatpush3.bf16.msra.mxu0 %v5348_v12 }
0x14e1   : > { %6935 = vmatprep.subr.bf16.mxu0 %v5366_v53  ;;  %v5368_v38 = vpop.permute.xlu0 %5367  ;;  %v10870_v53 = vld [vmem:[#allocation4_spill] sm:$0xff] }
0x14e2   : > { %v1258_v12 = vadd.f32 %v10214_v58, %v10870_v53 }
0x14e3   : > { %v5350_v1 = vpop.permute.xlu1 %5349 }
0x14e4   : > { %6936 = vmatpush3.bf16.msra.mxu0 %v5350_v1 }
0x14e5   : > { %6937 = vmatprep.subr.bf16.mxu0 %v5368_v38  ;;  %v5370_v37 = vpop.permute.xlu0 %5369 }
0x14e7   : > { %v5352_v24 = vpop.permute.xlu1 %5351 }
0x14e8   : > { %6938 = vmatpush3.bf16.msra.mxu0 %v5352_v24 }
0x14e9   : > { %6939 = vmatprep.subr.bf16.mxu0 %v5370_v37  ;;  %v5372_v31 = vpop.permute.xlu0 %5371  ;;  %v10871_v37 = vld [vmem:[#allocation6_spill] sm:$0xff] }
0x14ea   : > { %v1261_v24 = vadd.f32 %v10214_v58, %v10871_v37 }
0x14eb   : > { %v5354_v17 = vpop.permute.xlu1 %5353 }
0x14ec   : > { %6940 = vmatpush3.bf16.msra.mxu0 %v5354_v17 }
0x14ed   : > { %6941 = vmatprep.subr.bf16.mxu0 %v5372_v31 }
0x14f3   : > { %v5356_v11 = vpop.permute.xlu1 %5355 }
0x14f4   : > { %6942 = vmatpush3.bf16.msra.mxu0 %v5356_v11 }
0x14f7   : > { %5422 = vmatmul.mubr.bf16.vlgmr.msra.gmra.mrb[144].mxu0 %v7631_v46 }
0x14f8   : > { %5429 = vmatprep.mubr.bf16.mxu0 %v7634_v19 }
0x14ff   : > { %5430 = vmatmul.mubr.bf16.gmra.mrb[148].mxu0 %v7636_v2 }
0x1500   : > { %5437 = vmatprep.mubr.bf16.mxu0 %v7637_v30 }
0x1507   : > { %5438 = vmatmul.mubr.bf16.gmra.mrb[152].mxu0 %v7639_v8 }
0x1508   : > { %5445 = vmatprep.mubr.bf16.mxu0 %v7640_v15 }
0x150f   : > { %5446 = vmatmul.mubr.bf16.gmra.mrb[156].mxu0 %v7642_v52  ;;  %v10872_v52 = vld [vmem:[#allocation9_spill] sm:$0xff] }
0x1510   : > { %5453 = vmatprep.mubr.bf16.mxu0 %v7643_v33  ;;  %v1266_v33 = vadd.f32 %v10214_v58, %v10872_v52 }
0x1517   : > { %5454 = vmatmul.mubr.bf16.gmra.mrb[160].mxu0 %v7645_v6 }
0x1518   : > { %5461 = vmatprep.mubr.bf16.mxu0 %v7646_v0 }
0x151f   : > { %5462 = vmatmul.mubr.bf16.gmra.mrb[164].mxu0 %v7648_v29  ;;  %v10873_v29 = vld [vmem:[#allocation11_spill] sm:$0xff] }
0x1520   : > { %5469 = vmatprep.mubr.bf16.mxu0 %v7649_v26  ;;  %v1269_v26 = vadd.f32 %v10214_v58, %v10873_v29 }
0x1527   : > { %5470 = vmatmul.mubr.bf16.gmra.mrb[168].mxu0 %v7651_v61 }
0x1528   : > { %5477 = vmatprep.mubr.bf16.mxu0 %v7652_v41 }
0x152f   : > { %5478 = vmatmul.mubr.bf16.gmra.mrb[172].mxu0 %v7654_v57 }
0x1530   : > { %5485 = vmatprep.mubr.bf16.mxu0 %v7655_v13 }
0x1537   : > { %5486 = vmatmul.mubr.bf16.gmra.mrb[176].mxu0 %v7657_v62 }
0x1538   : > { %5493 = vmatprep.mubr.bf16.mxu0 %v7658_v34 }
0x153f   : > { %5494 = vmatmul.mubr.bf16.gmra.mrb[180].mxu0 %v7660_v23 }
0x1540   : > { %5501 = vmatprep.mubr.bf16.mxu0 %v7661_v18 }
0x1547   : > { %5502 = vmatmul.mubr.bf16.gmra.mrb[184].mxu0 %v7663_v7 }
0x1548   : > { %5509 = vmatprep.mubr.bf16.mxu0 %v7664_v42  ;;  %v10874_v42 = vld [vmem:[#allocation8_spill] sm:$0xff] }
0x154f   : > { %5510 = vmatmul.mubr.bf16.gmra.mrb[188].mxu0 %v7666_v35  ;;  %v1274_v35 = vadd.f32 %v10214_v58, %v10874_v42 }
0x1550   : > { %5517 = vmatprep.mubr.bf16.mxu0 %v7667_v48 }
0x1557   : > { %5518 = vmatmul.mubr.bf16.gmra.mrb[192].mxu0 %v7669_v22 }
0x1558   : > { %5525 = vmatprep.mubr.bf16.mxu0 %v7670_v3  ;;  %v10875_v3 = vld [vmem:[#allocation10_spill] sm:$0xff] }
0x155f   : > { %5526 = vmatmul.mubr.bf16.gmra.mrb[196].mxu0 %v7672_v60  ;;  %v1277_v60 = vadd.f32 %v10214_v58, %v10875_v3 }
0x1560   : > { %5533 = vmatprep.mubr.bf16.mxu0 %v7673_v4 }
0x1567   : > { %5534 = vmatmul.mubr.bf16.gmra.mrb[200].mxu0 %v7675_v32 }
0x1568   : > { %5541 = vmatprep.mubr.bf16.mxu0 %v7676_v63 }
0x156f   : > { %5542 = vmatmul.mubr.bf16.gmra.mrb[204].mxu0 %v7678_v27 }
0x15ca   : > { %v6943_v36 = vpop.f32.mrb[144].mxu0 }
0x15cb   : > { %v6944_v28 = vpop.f32.mrb[145].mxu0 }
0x15cc   : > { %v6945_v20 = vadd.f32 %v6944_v28, %v6943_v36  ;;  %v6946_v43 = vpop.f32.mrb[146].mxu0 }
0x15cd   : > { %v6947_v39 = vpop.f32.mrb[147].mxu0 }
0x15ce   : > { %v5424_v56 = vadd.f32 %v6945_v20, %v10209_v44  ;;  %v6948_v47 = vadd.f32 %v6947_v39, %v6946_v43  ;;  %v10876_v43 = vld [vmem:[#allocation13_spill] sm:$0xff] }
0x15cf   : > { %v1282_v39 = vadd.f32 %v10214_v58, %v10876_v43  ;;  %v10884_v43 = vld [vmem:[#allocation21_spill] sm:$0xff] }
0x15d0   : > { %v5550_v14 = vadd.f32 %v5424_v56, %v1250_v55  ;;  %v5427_v51 = vadd.f32 %v6948_v47, %v10209_v44  ;;  %v10877_v56 = vld [vmem:[#allocation15_spill] sm:$0xff] }
0x15d1   : > { %v1285_v47 = vadd.f32 %v10214_v58, %v10877_v56 }
0x15d2   : > { %v5551_v59 = vadd.f32 %v5427_v51, %v1253_v5  ;;  %v6949_v40 = vpop.f32.mrb[148].mxu0 }
0x15d3   : > { %v6950_v16 = vpop.f32.mrb[149].mxu0 }
0x15d4   : > { %v5587_v21 = vpack.c.bf16 %v5551_v59, %v5550_v14  ;;  %v6951_v54 = vadd.f32 %v6950_v16, %v6949_v40  ;;  %v6952_v10 = vpop.f32.mrb[150].mxu0 }
0x15d5   : > { %v6953_v50 = vpop.f32.mrb[151].mxu0 }
0x15d6   : > { %v5432_v38 = vadd.f32 %v6951_v54, %v10209_v44  ;;  %v6954_v1 = vadd.f32 %v6953_v50, %v6952_v10  ;;  %7359 = vmatprep.mubr.msk.bf16.mxu1 %vm1960_vm7, %v5587_v21  ;;  %v10878_v10 = vld [vmem:[#allocation12_spill] sm:$0xff] }
0x15d7   : > { %v1290_v50 = vadd.f32 %v10214_v58, %v10878_v10  ;;  %v10887_v10 = vld [vmem:[#allocation22_spill] sm:$0xff] }
0x15d8   : > { %v5552_v17 = vadd.f32 %v5432_v38, %v1258_v12  ;;  %v5435_v31 = vadd.f32 %v6954_v1, %v10209_v44  ;;  %v10879_v38 = vld [vmem:[#allocation14_spill] sm:$0xff] }
0x15d9   : > { %v1293_v1 = vadd.f32 %v10214_v58, %v10879_v38 }
0x15da   : > { %v5553_v11 = vadd.f32 %v5435_v31, %v1261_v24  ;;  %v6955_v46 = vpop.f32.mrb[152].mxu0 }
0x15db   : > { %v6956_v19 = vpop.f32.mrb[153].mxu0 }
0x15dc   : > { %v5588_v2 = vpack.c.bf16 %v5553_v11, %v5552_v17  ;;  %v6957_v30 = vadd.f32 %v6956_v19, %v6955_v46  ;;  %v6958_v8 = vpop.f32.mrb[154].mxu0 }
0x15dd   : > { %v6959_v15 = vpop.f32.mrb[155].mxu0 }
0x15de   : > { %v5440_v6 = vadd.f32 %v6957_v30, %v10209_v44  ;;  %v6960_v0 = vadd.f32 %v6959_v15, %v6958_v8  ;;  %7360 = vmatmul.mubr.msk.bf16.vlgmr.msra.gmra.mrb[144].mxu1 %vm1960_vm7, %v5588_v2  ;;  %v10880_v8 = vld [vmem:[#allocation17_spill] sm:$0xff] }
0x15df   : > { %7392 = vmatpush3.bf16.msra.mxu1 %v7679_v45  ;;  %v1298_v15 = vadd.f32 %v10214_v58, %v10880_v8 }
0x15e0   : > { %v5554_v61 = vadd.f32 %v5440_v6, %v1266_v33  ;;  %v5443_v41 = vadd.f32 %v6960_v0, %v10209_v44  ;;  %7393 = vmatprep.subr.bf16.mxu1 %v7680_v9  ;;  %v10881_v6 = vld [vmem:[#allocation19_spill] sm:$0xff] }
0x15e1   : > { %v1301_v0 = vadd.f32 %v10214_v58, %v10881_v6 }
0x15e2   : > { %v5555_v57 = vadd.f32 %v5443_v41, %v1269_v26  ;;  %v6961_v13 = vpop.f32.mrb[156].mxu0 }
0x15e3   : > { %v6962_v62 = vpop.f32.mrb[157].mxu0  ;;  %7394 = vmatpush3.bf16.msra.mxu1 %v7680_v9 }
0x15e4   : > { %v5589_v34 = vpack.c.bf16 %v5555_v57, %v5554_v61  ;;  %v6963_v23 = vadd.f32 %v6962_v62, %v6961_v13  ;;  %v6964_v18 = vpop.f32.mrb[158].mxu0 }
0x15e5   : > { %v6965_v7 = vpop.f32.mrb[159].mxu0 }
0x15e6   : > { %v5448_v48 = vadd.f32 %v6963_v23, %v10209_v44  ;;  %v6966_v22 = vadd.f32 %v6965_v7, %v6964_v18  ;;  %7363 = vmatprep.mubr.msk.bf16.mxu1 %vm1960_vm7, %v5589_v34  ;;  %v10882_v18 = vld [vmem:[#allocation16_spill] sm:$0xff] }
0x15e7   : > { %v1306_v7 = vadd.f32 %v10214_v58, %v10882_v18 }
0x15e8   : > { %v5556_v4 = vadd.f32 %v5448_v48, %v1274_v35  ;;  %v5451_v45 = vadd.f32 %v6966_v22, %v10209_v44  ;;  %v10883_v48 = vld [vmem:[#allocation18_spill] sm:$0xff] }
0x15e9   : > { %v1309_v22 = vadd.f32 %v10214_v58, %v10883_v48  ;;  %v10885_v58 = vld [vmem:[#allocation23_spill] sm:$0xff] }
0x15ea   : > { %v5557_v32 = vadd.f32 %v5451_v45, %v1277_v60  ;;  %v6967_v9 = vpop.f32.mrb[160].mxu0 }
0x15eb   : > { %v6968_v63 = vpop.f32.mrb[161].mxu0 }
0x15ec   : > { %v5590_v27 = vpack.c.bf16 %v5557_v32, %v5556_v4  ;;  %v6969_v36 = vadd.f32 %v6968_v63, %v6967_v9  ;;  %v6970_v28 = vpop.f32.mrb[162].mxu0 }
0x15ed   : > { %v6971_v20 = vpop.f32.mrb[163].mxu0 }
0x15ee   : > { %v5456_v49 = vadd.f32 %v6969_v36, %v10209_v44  ;;  %v6972_v55 = vadd.f32 %v6971_v20, %v6970_v28  ;;  %7364 = vmatmul.mubr.msk.bf16.gmra.mrb[148].mxu1 %vm1960_vm7, %v5590_v27 }
0x15f0   : > { %v5558_v25 = vadd.f32 %v5456_v49, %v1282_v39  ;;  %v5459_v5 = vadd.f32 %v6972_v55, %v10209_v44 }
0x15f2   : > { %v5559_v14 = vadd.f32 %v5459_v5, %v1285_v47  ;;  %v6973_v51 = vpop.f32.mrb[164].mxu0 }
0x15f3   : > { %v6974_v59 = vpop.f32.mrb[165].mxu0 }
0x15f4   : > { %v5591_v40 = vpack.c.bf16 %v5559_v14, %v5558_v25  ;;  %v6975_v16 = vadd.f32 %v6974_v59, %v6973_v51  ;;  %v6976_v21 = vpop.f32.mrb[166].mxu0 }
0x15f5   : > { %v6977_v54 = vpop.f32.mrb[167].mxu0 }
0x15f6   : > { %v5464_v53 = vadd.f32 %v6975_v16, %v10209_v44  ;;  %v6978_v12 = vadd.f32 %v6977_v54, %v6976_v21  ;;  %7367 = vmatprep.mubr.msk.bf16.mxu1 %vm1960_vm7, %v5591_v40  ;;  %v10886_v16 = vld [vmem:[#allocation20_spill] sm:$0xff] }
0x15f8   : > { %v5560_v37 = vadd.f32 %v5464_v53, %v1290_v50  ;;  %v5467_v24 = vadd.f32 %v6978_v12, %v10209_v44 }
0x15fa   : > { %v5561_v17 = vadd.f32 %v5467_v24, %v1293_v1  ;;  %v6979_v31 = vpop.f32.mrb[168].mxu0 }
0x15fb   : > { %v6980_v11 = vpop.f32.mrb[169].mxu0 }
0x15fc   : > { %v5592_v46 = vpack.c.bf16 %v5561_v17, %v5560_v37  ;;  %v6981_v19 = vadd.f32 %v6980_v11, %v6979_v31  ;;  %v6982_v2 = vpop.f32.mrb[170].mxu0  ;;  %v10888_v11 = vld [vmem:[#allocation25_spill] sm:$0xff] }
0x15fd   : > { %v6983_v30 = vpop.f32.mrb[171].mxu0 }
0x15fe   : > { %v5472_v52 = vadd.f32 %v6981_v19, %v10209_v44  ;;  %v6984_v33 = vadd.f32 %v6983_v30, %v6982_v2  ;;  %7368 = vmatmul.mubr.msk.bf16.gmra.mrb[152].mxu1 %vm1960_vm7, %v5592_v46  ;;  %v10889_v2 = vld [vmem:[#allocation27_spill] sm:$0xff] }
0x1600   : > { %v5562_v29 = vadd.f32 %v5472_v52, %v1298_v15  ;;  %v5475_v26 = vadd.f32 %v6984_v33, %v10209_v44 }
0x1602   : > { %v5563_v61 = vadd.f32 %v5475_v26, %v1301_v0  ;;  %v6985_v41 = vpop.f32.mrb[172].mxu0 }
0x1603   : > { %v6986_v57 = vpop.f32.mrb[173].mxu0 }
0x1604   : > { %v5593_v13 = vpack.c.bf16 %v5563_v61, %v5562_v29  ;;  %v6987_v62 = vadd.f32 %v6986_v57, %v6985_v41  ;;  %v6988_v34 = vpop.f32.mrb[174].mxu0  ;;  %v10890_v61 = vld [vmem:[#allocation24_spill] sm:$0xff] }
0x1605   : > { %v6989_v23 = vpop.f32.mrb[175].mxu0 }
0x1606   : > { %v5480_v42 = vadd.f32 %v6987_v62, %v10209_v44  ;;  %v6990_v35 = vadd.f32 %v6989_v23, %v6988_v34  ;;  %7371 = vmatprep.mubr.msk.bf16.mxu1 %vm1960_vm7, %v5593_v13  ;;  %v10891_v13 = vld [vmem:[#allocation26_spill] sm:$0xff] }
0x1608   : > { %v5564_v3 = vadd.f32 %v5480_v42, %v1306_v7  ;;  %v5483_v60 = vadd.f32 %v6990_v35, %v10209_v44 }
0x160a   : > { %v5565_v4 = vadd.f32 %v5483_v60, %v1309_v22  ;;  %v6991_v45 = vpop.f32.mrb[176].mxu0 }
0x160b   : > { %v6992_v32 = vpop.f32.mrb[177].mxu0 }
0x160c   : > { %v5594_v9 = vpack.c.bf16 %v5565_v4, %v5564_v3  ;;  %v6993_v63 = vadd.f32 %v6992_v32, %v6991_v45  ;;  %v6994_v27 = vpop.f32.mrb[178].mxu0  ;;  %v10892_v3 = vld [vmem:[#allocation29_spill] sm:$0xff]  ;;  %v10893_v45 = vld [vmem:[#allocation31_spill] sm:$0xff] }
0x160d   : > { %v6995_v36 = vpop.f32.mrb[179].mxu0 }
0x160e   : > { %v5488_v28 = vadd.f32 %v6993_v63, %v10209_v44  ;;  %v6996_v20 = vadd.f32 %v6995_v36, %v6994_v27  ;;  %7372 = vmatmul.mubr.msk.bf16.gmra.mrb[156].mxu1 %vm1960_vm7, %v5594_v9 }
0x1610   : > { %v5566_v39 = vadd.f32 %v5488_v28, %v10884_v43  ;;  %v5491_v49 = vadd.f32 %v6996_v20, %v10209_v44 }
0x1612   : > { %v5567_v55 = vadd.f32 %v5491_v49, %v10885_v58  ;;  %v6997_v56 = vpop.f32.mrb[180].mxu0  ;;  %v10894_v49 = vld [vmem:[#allocation28_spill] sm:$0xff] }
0x1613   : > { %v6998_v47 = vpop.f32.mrb[181].mxu0 }
0x1614   : > { %v5595_v25 = vpack.c.bf16 %v5567_v55, %v5566_v39  ;;  %v6999_v5 = vadd.f32 %v6998_v47, %v6997_v56  ;;  %v7000_v14 = vpop.f32.mrb[182].mxu0  ;;  %v10895_v56 = vld [vmem:[#allocation30_spill] sm:$0xff] }
0x1615   : > { %v7001_v51 = vpop.f32.mrb[183].mxu0 }
0x1616   : > { %v5496_v59 = vadd.f32 %v6999_v5, %v10209_v44  ;;  %v7002_v40 = vadd.f32 %v7001_v51, %v7000_v14  ;;  %7375 = vmatprep.mubr.msk.bf16.mxu1 %vm1960_vm7, %v5595_v25 }
0x1618   : > { %v5568_v21 = vadd.f32 %v5496_v59, %v10886_v16  ;;  %v5499_v54 = vadd.f32 %v7002_v40, %v10209_v44 }
0x161a   : > { %v5569_v50 = vadd.f32 %v5499_v54, %v10887_v10  ;;  %v7003_v53 = vpop.f32.mrb[184].mxu0  ;;  %v10896_v54 = vld [vmem:[#allocation33_spill] sm:$0xff] }
0x161b   : > { %v7004_v12 = vpop.f32.mrb[185].mxu0 }
0x161c   : > { %v5596_v38 = vpack.c.bf16 %v5569_v50, %v5568_v21  ;;  %v7005_v1 = vadd.f32 %v7004_v12, %v7003_v53  ;;  %v7006_v37 = vpop.f32.mrb[186].mxu0  ;;  %v10897_v53 = vld [vmem:[#allocation35_spill] sm:$0xff] }
0x161d   : > { %v7007_v24 = vpop.f32.mrb[187].mxu0 }
0x161e   : > { %v5504_v17 = vadd.f32 %v7005_v1, %v10209_v44  ;;  %v7008_v31 = vadd.f32 %v7007_v24, %v7006_v37  ;;  %7376 = vmatmul.mubr.msk.bf16.gmra.mrb[160].mxu1 %vm1960_vm7, %v5596_v38 }
0x1620   : > { %v5570_v46 = vadd.f32 %v5504_v17, %v10888_v11  ;;  %v5507_v19 = vadd.f32 %v7008_v31, %v10209_v44 }
0x1622   : > { %v5571_v30 = vadd.f32 %v5507_v19, %v10889_v2  ;;  %v7009_v8 = vpop.f32.mrb[188].mxu0  ;;  %v10898_v19 = vld [vmem:[#allocation32_spill] sm:$0xff] }
0x1623   : > { %v7010_v15 = vpop.f32.mrb[189].mxu0 }
0x1624   : > { %v5597_v52 = vpack.c.bf16 %v5571_v30, %v5570_v46  ;;  %v7011_v33 = vadd.f32 %v7010_v15, %v7009_v8  ;;  %v7012_v6 = vpop.f32.mrb[190].mxu0  ;;  %v10899_v8 = vld [vmem:[#allocation34_spill] sm:$0xff] }
0x1625   : > { %v7013_v0 = vpop.f32.mrb[191].mxu0 }
0x1626   : > { %v5512_v29 = vadd.f32 %v7011_v33, %v10209_v44  ;;  %v7014_v26 = vadd.f32 %v7013_v0, %v7012_v6  ;;  %7379 = vmatprep.mubr.msk.bf16.mxu1 %vm1960_vm7, %v5597_v52  ;;  %v10315_v33 = vld [vmem:[%s10637_s2 + $0xa] ss:$0 sm:$0xff] }
0x1628   : > { %v5572_v41 = vadd.f32 %v5512_v29, %v10890_v61  ;;  %v5515_v57 = vadd.f32 %v7014_v26, %v10209_v44 }
0x162a   : > { %v5573_v62 = vadd.f32 %v5515_v57, %v10891_v13  ;;  %v7015_v34 = vpop.f32.mrb[192].mxu0 }
0x162b   : > { %v7016_v23 = vpop.f32.mrb[193].mxu0 }
0x162c   : > { %v5598_v18 = vpack.c.bf16 %v5573_v62, %v5572_v41  ;;  %v7017_v7 = vadd.f32 %v7016_v23, %v7015_v34  ;;  %v7018_v42 = vpop.f32.mrb[194].mxu0 }
0x162d   : > { %v7019_v35 = vpop.f32.mrb[195].mxu0 }
0x162e   : > { %v5520_v48 = vadd.f32 %v7017_v7, %v10209_v44  ;;  %v7020_v22 = vadd.f32 %v7019_v35, %v7018_v42  ;;  %7380 = vmatmul.mubr.msk.bf16.gmra.mrb[164].mxu1 %vm1960_vm7, %v5598_v18 }
0x1630   : > { %v5574_v60 = vadd.f32 %v5520_v48, %v10892_v3  ;;  %v5523_v4 = vadd.f32 %v7020_v22, %v10209_v44 }
0x1632   : > { %v5575_v32 = vadd.f32 %v5523_v4, %v10893_v45  ;;  %v7021_v9 = vpop.f32.mrb[196].mxu0 }
0x1633   : > { %v7022_v63 = vpop.f32.mrb[197].mxu0 }
0x1634   : > { %v5599_v27 = vpack.c.bf16 %v5575_v32, %v5574_v60  ;;  %v7023_v36 = vadd.f32 %v7022_v63, %v7021_v9  ;;  %v7024_v28 = vpop.f32.mrb[198].mxu0 }
0x1635   : > { %v7025_v20 = vpop.f32.mrb[199].mxu0 }
0x1636   : > { %v5528_v43 = vadd.f32 %v7023_v36, %v10209_v44  ;;  %v7026_v39 = vadd.f32 %v7025_v20, %v7024_v28  ;;  %7383 = vmatprep.mubr.msk.bf16.mxu1 %vm1960_vm7, %v5599_v27 }
0x1638   : > { %v5576_v58 = vadd.f32 %v5528_v43, %v10894_v49  ;;  %v5531_v55 = vadd.f32 %v7026_v39, %v10209_v44 }
0x163a   : > { %v5577_v47 = vadd.f32 %v5531_v55, %v10895_v56  ;;  %v7027_v25 = vpop.f32.mrb[200].mxu0 }
0x163b   : > { %v7028_v5 = vpop.f32.mrb[201].mxu0 }
0x163c   : > { %v5600_v14 = vpack.c.bf16 %v5577_v47, %v5576_v58  ;;  %v7029_v51 = vadd.f32 %v7028_v5, %v7027_v25  ;;  %v7030_v59 = vpop.f32.mrb[202].mxu0 }
0x163d   : > { %v7031_v40 = vpop.f32.mrb[203].mxu0 }
0x163e   : > { %v5536_v16 = vadd.f32 %v7029_v51, %v10209_v44  ;;  %v7032_v21 = vadd.f32 %v7031_v40, %v7030_v59  ;;  %7384 = vmatmul.mubr.msk.bf16.gmra.mrb[168].mxu1 %vm1960_vm7, %v5600_v14 }
0x1640   : > { %v5578_v10 = vadd.f32 %v5536_v16, %v10896_v54  ;;  %v5539_v50 = vadd.f32 %v7032_v21, %v10209_v44 }
0x1642   : > { %v5579_v12 = vadd.f32 %v5539_v50, %v10897_v53  ;;  %v7033_v38 = vpop.f32.mrb[204].mxu0 }
0x1643   : > { %v7034_v1 = vpop.f32.mrb[205].mxu0 }
0x1644   : > { %v5601_v37 = vpack.c.bf16 %v5579_v12, %v5578_v10  ;;  %v7035_v24 = vadd.f32 %v7034_v1, %v7033_v38  ;;  %v7036_v17 = vpop.f32.mrb[206].mxu0 }
0x1645   : > { %v7037_v31 = vpop.f32.mrb[207].mxu0 }
0x1646   : > { %v5544_v11 = vadd.f32 %v7035_v24, %v10209_v44  ;;  %v7038_v46 = vadd.f32 %v7037_v31, %v7036_v17  ;;  %7387 = vmatprep.mubr.msk.bf16.mxu1 %vm1960_vm7, %v5601_v37 }
0x1648   : > { %v5580_v2 = vadd.f32 %v5544_v11, %v10898_v19  ;;  %v5547_v30 = vadd.f32 %v7038_v46, %v10209_v44 }
0x164a   : > { %v5581_v15 = vadd.f32 %v5547_v30, %v10899_v8 }
0x164c   : > { %v5602_v52 = vpack.c.bf16 %v5581_v15, %v5580_v2 }
0x164e   : > { %7388 = vmatmul.mubr.msk.bf16.gmra.mrb[172].mxu1 %vm1960_vm7, %v5602_v52 }
0x16b1   : > { %v7361_v6 = vpop.f32.mrb[144].mxu1 }
0x16b2   : > { %v5703_v0 = vpop.f32.mrb[145].mxu1  ;;  %v10321_v61 = vadd.f32 %v7361_v6, %v10315_v33 }
0x16b3   : > { %v10318_v29 = vadd.f32 %v10315_v33, %v5703_v0  ;;  %v7362_v26 = vpop.f32.mrb[146].mxu1 }
0x16b4   : > { %v10324_v44 = vadd.f32 %v7362_v26, %v10315_v33  ;;  %v5706_v41 = vpop.f32.mrb[147].mxu1  ;;  %v5832_v23 = vmax.f32 %v10321_v61, 0.0 }
0x16b5   : > { %v10327_v57 = vadd.f32 %v10315_v33, %v5706_v41  ;;  %v5830_v62 = vmax.f32 %v10318_v29, 0.0 }
0x16b6   : > { %v5833_v13 = vmax.f32 %v10324_v44, 0.0 }
0x16b7   : > { %v5831_v34 = vmax.f32 %v10327_v57, 0.0 }
0x16b8   : > { %v5863_v7 = vpack.c.bf16 %v5833_v13, %v5832_v23 }
0x16b9   : > { %v5862_v18 = vpack.c.bf16 %v5831_v34, %v5830_v62 }
0x16bb   : > { %7395 = vmatprep.mubr.msk.bf16.mxu1 %vm1960_vm7, %v5862_v18 }
0x16bc   : > { %7396 = vmatmul.mubr.msk.bf16.vlgmr.msra.gmra.mrb[176].mxu1 %vm1960_vm7, %v5863_v7 }
0x16c1   : > { %v7365_v42 = vpop.f32.mrb[148].mxu1 }
0x16c2   : > { %v5719_v35 = vpop.f32.mrb[149].mxu1  ;;  %v10339_v3 = vadd.f32 %v7365_v42, %v10315_v33 }
0x16c3   : > { %v10336_v48 = vadd.f32 %v10315_v33, %v5719_v35  ;;  %v7366_v22 = vpop.f32.mrb[150].mxu1 }
0x16c4   : > { %v10342_v60 = vadd.f32 %v7366_v22, %v10315_v33  ;;  %v5722_v4 = vpop.f32.mrb[151].mxu1  ;;  %v5836_v27 = vmax.f32 %v10339_v3, 0.0 }
0x16c5   : > { %v10345_v45 = vadd.f32 %v10315_v33, %v5722_v4  ;;  %v5834_v9 = vmax.f32 %v10336_v48, 0.0 }
0x16c6   : > { %v5837_v32 = vmax.f32 %v10342_v60, 0.0 }
0x16c7   : > { %v5835_v63 = vmax.f32 %v10345_v45, 0.0 }
0x16c8   : > { %v5865_v28 = vpack.c.bf16 %v5837_v32, %v5836_v27 }
0x16c9   : > { %v5864_v36 = vpack.c.bf16 %v5835_v63, %v5834_v9 }
0x16cb   : > { %7399 = vmatprep.mubr.msk.bf16.mxu1 %vm1960_vm7, %v5864_v36 }
0x16cc   : > { %7400 = vmatmul.mubr.msk.bf16.gmra.mrb[180].mxu1 %vm1960_vm7, %v5865_v28 }
0x16d1   : > { %v7369_v20 = vpop.f32.mrb[152].mxu1 }
0x16d2   : > { %v5735_v43 = vpop.f32.mrb[153].mxu1  ;;  %v10357_v58 = vadd.f32 %v7369_v20, %v10315_v33 }
0x16d3   : > { %v10354_v39 = vadd.f32 %v10315_v33, %v5735_v43  ;;  %v7370_v49 = vpop.f32.mrb[154].mxu1 }
0x16d4   : > { %v10360_v55 = vadd.f32 %v7370_v49, %v10315_v33  ;;  %v5738_v56 = vpop.f32.mrb[155].mxu1  ;;  %v5840_v51 = vmax.f32 %v10357_v58, 0.0 }
0x16d5   : > { %v10363_v47 = vadd.f32 %v10315_v33, %v5738_v56  ;;  %v5838_v5 = vmax.f32 %v10354_v39, 0.0 }
0x16d6   : > { %v5841_v25 = vmax.f32 %v10360_v55, 0.0 }
0x16d7   : > { %v5839_v14 = vmax.f32 %v10363_v47, 0.0 }
0x16d8   : > { %v5867_v40 = vpack.c.bf16 %v5841_v25, %v5840_v51 }
0x16d9   : > { %v5866_v59 = vpack.c.bf16 %v5839_v14, %v5838_v5 }
0x16db   : > { %7403 = vmatprep.mubr.msk.bf16.mxu1 %vm1960_vm7, %v5866_v59 }
0x16dc   : > { %7404 = vmatmul.mubr.msk.bf16.gmra.mrb[184].mxu1 %vm1960_vm7, %v5867_v40 }
0x16e1   : > { %v7373_v16 = vpop.f32.mrb[156].mxu1 }
0x16e2   : > { %v5751_v21 = vpop.f32.mrb[157].mxu1  ;;  %v10375_v50 = vadd.f32 %v7373_v16, %v10315_v33 }
0x16e3   : > { %v10372_v54 = vadd.f32 %v10315_v33, %v5751_v21  ;;  %v7374_v10 = vpop.f32.mrb[158].mxu1 }
0x16e4   : > { %v10378_v53 = vadd.f32 %v7374_v10, %v10315_v33  ;;  %v5754_v12 = vpop.f32.mrb[159].mxu1  ;;  %v5844_v17 = vmax.f32 %v10375_v50, 0.0 }
0x16e5   : > { %v10381_v38 = vadd.f32 %v10315_v33, %v5754_v12  ;;  %v5842_v37 = vmax.f32 %v10372_v54, 0.0 }
0x16e6   : > { %v5845_v1 = vmax.f32 %v10378_v53, 0.0 }
0x16e7   : > { %v5843_v24 = vmax.f32 %v10381_v38, 0.0 }
0x16e8   : > { %v5869_v11 = vpack.c.bf16 %v5845_v1, %v5844_v17 }
0x16e9   : > { %v5868_v31 = vpack.c.bf16 %v5843_v24, %v5842_v37 }
0x16eb   : > { %7407 = vmatprep.mubr.msk.bf16.mxu1 %vm1960_vm7, %v5868_v31 }
0x16ec   : > { %7408 = vmatmul.mubr.msk.bf16.gmra.mrb[188].mxu1 %vm1960_vm7, %v5869_v11 }
0x16f1   : > { %v7377_v46 = vpop.f32.mrb[160].mxu1 }
0x16f2   : > { %v5767_v19 = vpop.f32.mrb[161].mxu1  ;;  %v10393_v8 = vadd.f32 %v7377_v46, %v10315_v33 }
0x16f3   : > { %v10390_v2 = vadd.f32 %v10315_v33, %v5767_v19  ;;  %v7378_v30 = vpop.f32.mrb[162].mxu1 }
0x16f4   : > { %v10396_v15 = vadd.f32 %v7378_v30, %v10315_v33  ;;  %v5770_v52 = vpop.f32.mrb[163].mxu1  ;;  %v5848_v13 = vmax.f32 %v10393_v8, 0.0 }
0x16f5   : > { %v10399_v6 = vadd.f32 %v10315_v33, %v5770_v52  ;;  %v5846_v26 = vmax.f32 %v10390_v2, 0.0 }
0x16f6   : > { %v5849_v0 = vmax.f32 %v10396_v15, 0.0 }
0x16f7   : > { %v5847_v41 = vmax.f32 %v10399_v6, 0.0 }
0x16f8   : > { %v5871_v34 = vpack.c.bf16 %v5849_v0, %v5848_v13 }
0x16f9   : > { %v5870_v62 = vpack.c.bf16 %v5847_v41, %v5846_v26 }
0x16fb   : > { %7411 = vmatprep.mubr.msk.bf16.mxu1 %vm1960_vm7, %v5870_v62 }
0x16fc   : > { %7412 = vmatmul.mubr.msk.bf16.gmra.mrb[192].mxu1 %vm1960_vm7, %v5871_v34 }
0x1701   : > { %v7381_v23 = vpop.f32.mrb[164].mxu1 }
0x1702   : > { %v5783_v18 = vpop.f32.mrb[165].mxu1  ;;  %v10411_v35 = vadd.f32 %v7381_v23, %v10315_v33 }
0x1703   : > { %v10408_v7 = vadd.f32 %v10315_v33, %v5783_v18  ;;  %v7382_v42 = vpop.f32.mrb[166].mxu1 }
0x1704   : > { %v10414_v22 = vadd.f32 %v7382_v42, %v10315_v33  ;;  %v5786_v4 = vpop.f32.mrb[167].mxu1  ;;  %v5852_v36 = vmax.f32 %v10411_v35, 0.0 }
0x1705   : > { %v10417_v32 = vadd.f32 %v10315_v33, %v5786_v4  ;;  %v5850_v63 = vmax.f32 %v10408_v7, 0.0 }
0x1706   : > { %v5853_v9 = vmax.f32 %v10414_v22, 0.0 }
0x1707   : > { %v5851_v27 = vmax.f32 %v10417_v32, 0.0 }
0x1708   : > { %v5873_v20 = vpack.c.bf16 %v5853_v9, %v5852_v36 }
0x1709   : > { %v5872_v28 = vpack.c.bf16 %v5851_v27, %v5850_v63 }
0x170b   : > { %7415 = vmatprep.mubr.msk.bf16.mxu1 %vm1960_vm7, %v5872_v28 }
0x170c   : > { %7416 = vmatmul.mubr.msk.bf16.gmra.mrb[196].mxu1 %vm1960_vm7, %v5873_v20 }
0x1711   : > { %v7385_v43 = vpop.f32.mrb[168].mxu1 }
0x1712   : > { %v5799_v49 = vpop.f32.mrb[169].mxu1  ;;  %v10429_v5 = vadd.f32 %v7385_v43, %v10315_v33  ;;  %v10468_v43 = vld [vmem:[%s10636_s1 + $0xd0] sm:$0x1] }
0x1713   : > { %v10426_v56 = vadd.f32 %v10315_v33, %v5799_v49  ;;  %v7386_v25 = vpop.f32.mrb[170].mxu1  ;;  %7091 = vmatprep.mubr.msk.bf16.mxu0 %vm1960_vm7, %v10468_v43 }
0x1714   : > { %v10432_v14 = vadd.f32 %v7386_v25, %v10315_v33  ;;  %v5802_v51 = vpop.f32.mrb[171].mxu1  ;;  %v5856_v10 = vmax.f32 %v10429_v5, 0.0 }
0x1715   : > { %v10435_v59 = vadd.f32 %v10315_v33, %v5802_v51  ;;  %v5854_v16 = vmax.f32 %v10426_v56, 0.0 }
0x1716   : > { %v5857_v40 = vmax.f32 %v10432_v14, 0.0 }
0x1717   : > { %v5855_v21 = vmax.f32 %v10435_v59, 0.0 }
0x1718   : > { %v5875_v1 = vpack.c.bf16 %v5857_v40, %v5856_v10 }
0x1719   : > { %v5874_v12 = vpack.c.bf16 %v5855_v21, %v5854_v16 }
0x171b   : > { %7419 = vmatprep.mubr.msk.bf16.mxu1 %vm1960_vm7, %v5874_v12 }
0x171c   : > { %7420 = vmatmul.mubr.msk.bf16.gmra.mrb[200].mxu1 %vm1960_vm7, %v5875_v1 }
0x1721   : > { %v7389_v37 = vpop.f32.mrb[172].mxu1 }
0x1722   : > { %v5815_v24 = vpop.f32.mrb[173].mxu1  ;;  %v10447_v11 = vadd.f32 %v7389_v37, %v10315_v33 }
0x1723   : > { %v10444_v17 = vadd.f32 %v10315_v33, %v5815_v24  ;;  %v7390_v31 = vpop.f32.mrb[174].mxu1 }
0x1724   : > { %v10450_v46 = vadd.f32 %v7390_v31, %v10315_v33  ;;  %v5818_v19 = vpop.f32.mrb[175].mxu1  ;;  %v5860_v41 = vmax.f32 %v10447_v11, 0.0 }
0x1725   : > { %v10453_v30 = vadd.f32 %v10315_v33, %v5818_v19  ;;  %v5858_v0 = vmax.f32 %v10444_v17, 0.0 }
0x1726   : > { %v5861_v52 = vmax.f32 %v10450_v46, 0.0 }
0x1727   : > { %v5859_v26 = vmax.f32 %v10453_v30, 0.0 }
0x1728   : > { %v5877_v62 = vpack.c.bf16 %v5861_v52, %v5860_v41 }
0x1729   : > { %v5876_v13 = vpack.c.bf16 %v5859_v26, %v5858_v0 }
0x172b   : > { %7423 = vmatprep.mubr.msk.bf16.mxu1 %vm1960_vm7, %v5876_v13 }
0x172c   : > { %7424 = vmatmul.mubr.msk.bf16.gmra.mrb[204].mxu1 %vm1960_vm7, %v5877_v62 }
0x178f   : > { %v7397_v34 = vpop.f32.mrb[176].mxu1 }
0x1790   : > { %v5969_v23 = vadd.f32 %v7397_v34, %v10315_v33  ;;  %v5960_v18 = vpop.f32.mrb[177].mxu1 }
0x1791   : > { %v5961_v42 = vadd.f32 %v10315_v33, %v5960_v18  ;;  %v7398_v4 = vpop.f32.mrb[178].mxu1 }
0x1792   : > { %v6089_v9 = vmax.f32 %v5969_v23, 0.0  ;;  %v5972_v63 = vadd.f32 %v7398_v4, %v10315_v33  ;;  %v5963_v27 = vpop.f32.mrb[179].mxu1 }
0x1793   : > { %v6087_v36 = vmax.f32 %v5961_v42, 0.0  ;;  %v5964_v28 = vadd.f32 %v10315_v33, %v5963_v27 }
0x1794   : > { %v6090_v20 = vmax.f32 %v5972_v63, 0.0  ;;  %v10473_v25 = vadd.f32 %v6089_v9, %v10321_v61  ;;  %v6168_v61 = vld [vmem:[%s10637_s2 + $0xb] sm:$0x1] }
0x1795   : > { %v6088_v49 = vmax.f32 %v5964_v28, 0.0  ;;  %v10479_v40 = vadd.f32 %v6087_v36, %v10318_v29  ;;  %6171 = vperm.xlu0 %7529, %v6168_v61  }
0x1796   : > { %v10476_v51 = vadd.f32 %v6090_v20, %v10324_v44 }
0x1797   : > { %v10482_v16 = vadd.f32 %v6088_v49, %v10327_v57 }
0x1798   : > { %v6153_v21 = vpack.c.bf16 %v10476_v51, %v10473_v25 }
0x1799   : > { %v6152_v10 = vpack.c.bf16 %v10482_v16, %v10479_v40 }
0x179a   : > { %v6185_v40 = vsel %vm1960_vm7, %v6153_v21, 0 }
0x179f   : > { %v7401_v12 = vpop.f32.mrb[180].mxu1 }
0x17a0   : > { %v5985_v44 = vadd.f32 %v7401_v12, %v10315_v33  ;;  %v5976_v1 = vpop.f32.mrb[181].mxu1 }
0x17a1   : > { %v5977_v29 = vadd.f32 %v10315_v33, %v5976_v1  ;;  %v7402_v37 = vpop.f32.mrb[182].mxu1 }
0x17a2   : > { %v6093_v57 = vmax.f32 %v5985_v44, 0.0  ;;  %v5988_v24 = vadd.f32 %v7402_v37, %v10315_v33  ;;  %v5979_v31 = vpop.f32.mrb[183].mxu1 }
0x17a3   : > { %v6091_v19 = vmax.f32 %v5977_v29, 0.0  ;;  %v5980_v52 = vadd.f32 %v10315_v33, %v5979_v31 }
0x17a4   : > { %v6094_v0 = vmax.f32 %v5988_v24, 0.0  ;;  %v10496_v41 = vadd.f32 %v6093_v57, %v10339_v3 }
0x17a5   : > { %v6092_v26 = vmax.f32 %v5980_v52, 0.0  ;;  %v10502_v62 = vadd.f32 %v6091_v19, %v10336_v48 }
0x17a6   : > { %v10499_v13 = vadd.f32 %v6094_v0, %v10342_v60 }
0x17a7   : > { %v10505_v34 = vadd.f32 %v6092_v26, %v10345_v45 }
0x17a8   : > { %v6155_v23 = vpack.c.bf16 %v10499_v13, %v10496_v41 }
0x17a9   : > { %v6154_v18 = vpack.c.bf16 %v10505_v34, %v10502_v62 }
0x17aa   : > { %v6191_v62 = vsel %vm1960_vm7, %v6155_v23, 0 }
0x17ab   : > { %v6188_v25 = vsel %vm1960_vm7, %v6154_v18, 0 }
0x17af   : > { %v7405_v42 = vpop.f32.mrb[184].mxu1 }
0x17b0   : > { %v6001_v4 = vadd.f32 %v7405_v42, %v10315_v33  ;;  %v5992_v3 = vpop.f32.mrb[185].mxu1 }
0x17b1   : > { %v5993_v9 = vadd.f32 %v10315_v33, %v5992_v3  ;;  %v7406_v60 = vpop.f32.mrb[186].mxu1 }
0x17b2   : > { %v6097_v63 = vmax.f32 %v6001_v4, 0.0  ;;  %v6004_v48 = vadd.f32 %v7406_v60, %v10315_v33  ;;  %v5995_v27 = vpop.f32.mrb[187].mxu1 }
0x17b3   : > { %v6095_v36 = vmax.f32 %v5993_v9, 0.0  ;;  %v5996_v45 = vadd.f32 %v10315_v33, %v5995_v27 }
0x17b4   : > { %v6098_v28 = vmax.f32 %v6004_v48, 0.0  ;;  %v10516_v49 = vadd.f32 %v6097_v63, %v10357_v58 }
0x17b5   : > { %v6096_v20 = vmax.f32 %v5996_v45, 0.0  ;;  %v10522_v12 = vadd.f32 %v6095_v36, %v10354_v39 }
0x17b6   : > { %v10519_v61 = vadd.f32 %v6098_v28, %v10360_v55 }
0x17b7   : > { %v10525_v44 = vadd.f32 %v6096_v20, %v10363_v47 }
0x17b8   : > { %v6157_v1 = vpack.c.bf16 %v10519_v61, %v10516_v49  ;;  %v10900_v49 = vld [vmem:[#allocation3_spill] sm:$0xff] }
0x17b9   : > { %v6156_v29 = vpack.c.bf16 %v10525_v44, %v10522_v12 }
0x17ba   : > { %v6197_v12 = vsel %vm1960_vm7, %v6157_v1, 0 }
0x17bb   : > { %v6194_v41 = vsel %vm1960_vm7, %v6156_v29, 0 }
0x17bf   : > { %v7409_v37 = vpop.f32.mrb[188].mxu1 }
0x17c0   : > { %v6017_v57 = vadd.f32 %v7409_v37, %v10315_v33  ;;  %v6008_v58 = vpop.f32.mrb[189].mxu1 }
0x17c1   : > { %v6009_v24 = vadd.f32 %v10315_v33, %v6008_v58  ;;  %v7410_v55 = vpop.f32.mrb[190].mxu1 }
0x17c2   : > { %v6101_v31 = vmax.f32 %v6017_v57, 0.0  ;;  %v6020_v39 = vadd.f32 %v7410_v55, %v10315_v33  ;;  %v6011_v19 = vpop.f32.mrb[191].mxu1 }
0x17c3   : > { %v6099_v52 = vmax.f32 %v6009_v24, 0.0  ;;  %v6012_v47 = vadd.f32 %v10315_v33, %v6011_v19 }
0x17c4   : > { %v6102_v0 = vmax.f32 %v6020_v39, 0.0  ;;  %v10536_v42 = vadd.f32 %v6101_v31, %v10375_v50 }
0x17c5   : > { %v6100_v26 = vmax.f32 %v6012_v47, 0.0  ;;  %v10542_v3 = vadd.f32 %v6099_v52, %v10372_v54  ;;  %v6182_v52 = vsel %vm1960_vm7, %v6152_v10, 0 }
0x17c6   : > { %v10539_v4 = vadd.f32 %v6102_v0, %v10378_v53 }
0x17c7   : > { %v10545_v9 = vadd.f32 %v6100_v26, %v10381_v38 }
0x17c8   : > { %v6159_v60 = vpack.c.bf16 %v10539_v4, %v10536_v42 }
0x17c9   : > { %v6158_v63 = vpack.c.bf16 %v10545_v9, %v10542_v3 }
0x17cf   : > { %v7413_v48 = vpop.f32.mrb[192].mxu1 }
0x17d0   : > { %v6033_v27 = vadd.f32 %v7413_v48, %v10315_v33  ;;  %v6024_v50 = vpop.f32.mrb[193].mxu1 }
0x17d1   : > { %v6025_v36 = vadd.f32 %v10315_v33, %v6024_v50  ;;  %v7414_v53 = vpop.f32.mrb[194].mxu1 }
0x17d2   : > { %v6105_v45 = vmax.f32 %v6033_v27, 0.0  ;;  %v6036_v54 = vadd.f32 %v7414_v53, %v10315_v33  ;;  %v6027_v28 = vpop.f32.mrb[195].mxu1 }
0x17d3   : > { %v6103_v20 = vmax.f32 %v6025_v36, 0.0  ;;  %v6028_v38 = vadd.f32 %v10315_v33, %v6027_v28 }
0x17d4   : > { %v6106_v37 = vmax.f32 %v6036_v54, 0.0  ;;  %v6137_v58 = vadd.f32 %v6105_v45, %v10393_v8 }
0x17d5   : > { %v6104_v57 = vmax.f32 %v6028_v38, 0.0  ;;  %v6135_v55 = vadd.f32 %v6103_v20, %v10390_v2 }
0x17d6   : > { %v6138_v24 = vadd.f32 %v6106_v37, %v10396_v15 }
0x17d7   : > { %v6136_v31 = vadd.f32 %v6104_v57, %v10399_v6 }
0x17d8   : > { %v6161_v39 = vpack.c.bf16 %v6138_v24, %v6137_v58 }
0x17d9   : > { %v6160_v19 = vpack.c.bf16 %v6136_v31, %v6135_v55 }
0x17db   : > { %7455 = vmatprep.subr.msk.bf16.mxu0 %vm1960_vm7, %v6160_v19 }
0x17dc   : > { %7076 = vmatpush3.bf16.xpose.msra.mxu0 %v6182_v52 }
0x17dd   : > { %7456 = vmatprep.subr.msk.bf16.mxu0 %vm1960_vm7, %v6161_v39 }
0x17df   : > { %v7417_v47 = vpop.f32.mrb[196].mxu1 }
0x17e0   : > { %v6049_v8 = vadd.f32 %v7417_v47, %v10315_v33  ;;  %v6040_v15 = vpop.f32.mrb[197].mxu1 }
0x17e1   : > { %v6041_v2 = vadd.f32 %v10315_v33, %v6040_v15  ;;  %v7418_v0 = vpop.f32.mrb[198].mxu1 }
0x17e2   : > { %v6109_v6 = vmax.f32 %v6049_v8, 0.0  ;;  %v6052_v26 = vadd.f32 %v7418_v0, %v10315_v33  ;;  %v6043_v48 = vpop.f32.mrb[199].mxu1 }
0x17e3   : > { %v6107_v27 = vmax.f32 %v6041_v2, 0.0  ;;  %v6044_v50 = vadd.f32 %v10315_v33, %v6043_v48 }
0x17e4   : > { %v6110_v16 = vmax.f32 %v6052_v26, 0.0  ;;  %7078 = vmatpush3.bf16.xpose.msra.mxu0 %v6185_v40  ;;  %v6141_v36 = vadd.f32 %v6109_v6, %v10411_v35 }
0x17e5   : > { %v6108_v10 = vmax.f32 %v6044_v50, 0.0  ;;  %v6139_v45 = vadd.f32 %v6107_v27, %v10408_v7 }
0x17e6   : > { %v6142_v53 = vadd.f32 %v6110_v16, %v10414_v22  ;;  %v10901_v16 = vld [vmem:[#allocation2_spill] sm:$0xff] }
0x17e7   : > { %v6140_v54 = vadd.f32 %v6108_v10, %v10417_v32 }
0x17e8   : > { %v6163_v28 = vpack.c.bf16 %v6142_v53, %v6141_v36 }
0x17e9   : > { %v6162_v20 = vpack.c.bf16 %v6140_v54, %v6139_v45 }
0x17eb   : > { %7457 = vmatprep.subr.msk.bf16.mxu0 %vm1960_vm7, %v6162_v20 }
0x17ec   : > { %7080 = vmatpush3.bf16.xpose.msra.mxu0 %v6188_v25 }
0x17ed   : > { %7458 = vmatprep.subr.msk.bf16.mxu0 %vm1960_vm7, %v6163_v28 }
0x17ef   : > { %v7421_v51 = vpop.f32.mrb[200].mxu1 }
0x17f0   : > { %v6065_v35 = vadd.f32 %v7421_v51, %v10315_v33  ;;  %v6056_v22 = vpop.f32.mrb[201].mxu1 }
0x17f1   : > { %v6057_v7 = vadd.f32 %v10315_v33, %v6056_v22  ;;  %v7422_v21 = vpop.f32.mrb[202].mxu1 }
0x17f2   : > { %v6113_v32 = vmax.f32 %v6065_v35, 0.0  ;;  %v6068_v38 = vadd.f32 %v7422_v21, %v10315_v33  ;;  %v6059_v37 = vpop.f32.mrb[203].mxu1 }
0x17f3   : > { %v6111_v57 = vmax.f32 %v6057_v7, 0.0  ;;  %v6060_v58 = vadd.f32 %v10315_v33, %v6059_v37 }
0x17f4   : > { %v6114_v34 = vmax.f32 %v6068_v38, 0.0  ;;  %7082 = vmatpush3.bf16.xpose.msra.mxu0 %v6191_v62  ;;  %v6145_v24 = vadd.f32 %v6113_v32, %v10429_v5 }
0x17f5   : > { %v6112_v18 = vmax.f32 %v6060_v58, 0.0  ;;  %v6143_v31 = vadd.f32 %v6111_v57, %v10426_v56 }
0x17f6   : > { %v6146_v55 = vadd.f32 %v6114_v34, %v10432_v14 }
0x17f7   : > { %v6144_v39 = vadd.f32 %v6112_v18, %v10435_v59 }
0x17f8   : > { %v6165_v19 = vpack.c.bf16 %v6146_v55, %v6145_v24 }
0x17f9   : > { %v6164_v52 = vpack.c.bf16 %v6144_v39, %v6143_v31 }
0x17fb   : > { %7459 = vmatprep.subr.msk.bf16.mxu0 %vm1960_vm7, %v6164_v52 }
0x17fc   : > { %7084 = vmatpush3.bf16.xpose.msra.mxu0 %v6194_v41 }
0x17fd   : > { %7460 = vmatprep.subr.msk.bf16.mxu0 %vm1960_vm7, %v6165_v19 }
0x17ff   : > { %v7425_v13 = vpop.f32.mrb[204].mxu1 }
0x1800   : > { %v6081_v5 = vadd.f32 %v7425_v13, %v10315_v33  ;;  %v6072_v14 = vpop.f32.mrb[205].mxu1 }
0x1801   : > { %v6073_v56 = vadd.f32 %v10315_v33, %v6072_v14  ;;  %v7426_v23 = vpop.f32.mrb[206].mxu1 }
0x1802   : > { %v6117_v59 = vmax.f32 %v6081_v5, 0.0  ;;  %v6084_v47 = vadd.f32 %v7426_v23, %v10315_v33  ;;  %v6075_v8 = vpop.f32.mrb[207].mxu1 }
0x1803   : > { %v6115_v15 = vmax.f32 %v6073_v56, 0.0  ;;  %v6076_v2 = vadd.f32 %v10315_v33, %v6075_v8  ;;  %v6200_v33 = vsel %vm1960_vm7, %v6158_v63, 0 }
0x1804   : > { %v6118_v44 = vmax.f32 %v6084_v47, 0.0  ;;  %7086 = vmatpush3.bf16.xpose.msra.mxu0 %v6197_v12  ;;  %v6149_v0 = vadd.f32 %v6117_v59, %v10447_v11 }
0x1805   : > { %v6116_v29 = vmax.f32 %v6076_v2, 0.0  ;;  %v6147_v26 = vadd.f32 %v6115_v15, %v10444_v17  ;;  %v6203_v17 = vsel %vm1960_vm7, %v6159_v60, 0 }
0x1806   : > { %v6150_v6 = vadd.f32 %v6118_v44, %v10450_v46  ;;  %v7705_v46 = vmov 1966171168  }
0x1807   : > { %v6148_v48 = vadd.f32 %v6116_v29, %v10453_v30  ;;  %v6274_v30 = vunpack.c.l.s4 %v7705_v46 }
0x1808   : > { %v6167_v27 = vpack.c.bf16 %v6150_v6, %v6149_v0 }
0x1809   : > { %v6166_v50 = vpack.c.bf16 %v6148_v48, %v6147_v26  ;;  %v6275_v1 = vunpack.c.0.s8 %v6274_v30 }
0x180b   : > { %7461 = vmatprep.subr.msk.bf16.mxu0 %vm1960_vm7, %v6166_v50  ;;  %v6278_v10 = vsub.s32 %v6275_v1, %v10901_v16 }
0x180c   : > { %7088 = vmatpush3.bf16.xpose.msra.mxu0 %v6200_v33 }
0x180d   : > { %7462 = vmatprep.subr.msk.bf16.mxu0 %vm1960_vm7, %v6167_v27 }
0x1814   : > { %7090 = vmatpush3.bf16.xpose.msra.mxu0 %v6203_v17  ;;  %v6172_v11 = vpop.permute.xlu0 %6171 }
0x1815   : > { %v6177_v61 = vrot.slane %v6172_v11, %v10900_v49 }
0x181b   : > { %7092 = vmatmul.mubr.msk.bf16.vlgmr.msra.gmra.mrb[208].mxu0 %vm1960_vm7, %v10468_v43  ;;  %v10902_v43 = vlaneseq }
0x181d   : > { %vm6290_vm7 = vcmp.lt.s32.totalorder %v10902_v43, 256 }
0x18ee   : > { %v6263_v3 = vpop.f32.mrb[208].mxu0 }
0x18ef   : > { %v6264_v9 = vadd.f32 %v6263_v3, %v6177_v61  ;;  %v6265_v63 = vpop.f32.mrb[209].mxu0 }
0x18f0   : > { %v6266_v40 = vadd.f32 %v6265_v63, %v6177_v61  ;;  %v6267_v42 = vpop.f32.mrb[210].mxu0 }
0x18f1   : > { %v6268_v4 = vpop.f32.mrb[211].mxu0 }
0x18f2   : > { %v6272_v60 = vcombine.low %v6264_v9, %v6266_v40 }
0x18f4   : > { %v6279_v36 = vrot.slane %v6272_v60, %v6278_v10 }
0x18f6   : > { %v6286_v53 = vrot.slane %v6279_v36, %v6278_v10 }
0x18f8   : > { %6292 = vst.msk [vmem:[%s330_s26] sm:$0x3] %vm6290_vm7, %v6286_v53 }
0x18f9 PF: > { %s19_s30 = sadd.s32 1, %s7696_s30  }
0x18fa   : > { %p16_p4 = scmp.ge.s32.totalorder %s19_s30, 4  }
0x18fc   :  { %18 = sbr.rel (!%p16_p4) target bundleno = 1 (0x1), region = 86 }

</bundles_post_ra>
